<compile_context>
chip_gen: v7x
topology: tpu7x:2x2x1
jax: 0.10.0
libtpu: 0.0.40
codegen_flags: <defaults>
</compile_context>

<pallas_src>
import numpy as np
import jax
import jax.numpy as jnp
from jax import lax
from jax.experimental import pallas as pl
from jax.experimental.pallas import tpu as pltpu

# ----------------------------- tiny T5 config --------------------------------
VOCAB = 128
D_MODEL = 64
D_KV = 16
N_HEADS = 4
HD = N_HEADS * D_KV          # 64
D_FF = 128
N_LAYERS = 2
N_BUCKETS = 32
MAX_DIST = 128
PAD_ID = 0                   # T5: pad_token_id == decoder_start_token_id == 0
EPS = 1e-6
NEG_INF = -1e9               # additive mask value


# --------------------------- in-kernel helpers --------------------------------
def _rms(x, w):
    # x: (L, D) f32, w: (1, D) f32
    var = jnp.mean(x * x, axis=-1, keepdims=True)
    return x * lax.rsqrt(var + EPS) * w


def _softmax(s):
    m = jnp.max(s, axis=-1, keepdims=True)
    p = jnp.exp(s - m)
    return p * pl.reciprocal(jnp.sum(p, axis=-1, keepdims=True), approx=True)


def _mha(q_in, kv_in, wqkv, wo, bias, mask, fused_qkv):
    """T5 multi-head attention on VMEM-resident values.

    q_in:  (Lq, D) normalized query-side hidden states
    kv_in: (Lk, D) key/value-side hidden states (== q_in for self-attention)
    wqkv:  (D, 3*HD) concatenated Wq|Wk|Wv
    wo:    (HD, D)
    bias:  (H, Lq, Lk) relative-position bias, or None
    mask:  (Lq, Lk) additive mask, or None
    T5 applies NO 1/sqrt(dk) scaling.
    """
    if fused_qkv:
        qkv = jnp.dot(q_in, wqkv, preferred_element_type=jnp.float32)     # (Lq, 3HD)
        q, k_all, v_all = qkv[:, 0:HD], qkv[:, HD:2 * HD], qkv[:, 2 * HD:3 * HD]
    else:
        q = jnp.dot(q_in, wqkv[:, 0:HD], preferred_element_type=jnp.float32)
        kvp = jnp.dot(kv_in, wqkv[:, HD:3 * HD], preferred_element_type=jnp.float32)
        k_all, v_all = kvp[:, 0:HD], kvp[:, HD:2 * HD]

    out = None
    for hh in range(N_HEADS):
        lo, hi = hh * D_KV, (hh + 1) * D_KV
        s = lax.dot_general(q[:, lo:hi], k_all[:, lo:hi],
                            (((1,), (1,)), ((), ())),
                            preferred_element_type=jnp.float32)           # (Lq, Lk)
        if bias is not None:
            s = s + bias[hh]
        if mask is not None:
            s = s + mask
        p = _softmax(s)
        ctx_h = jnp.dot(p, v_all[:, lo:hi], preferred_element_type=jnp.float32)  # (Lq, dk)
        part = jnp.dot(ctx_h, wo[lo:hi, :], preferred_element_type=jnp.float32)  # (Lq, D)
        out = part if out is None else out + part
    return out


# ------------------------------ Pallas kernels --------------------------------
def _encoder_kernel(h_ref, bias_ref, ln_ref, wqkv_ref, wo_ref, wi_ref, wo2_ref,
                    fln_ref, o_ref):
    # All encoder layers + final RMSNorm, one batch element per grid step.
    h = h_ref[0]                                   # (Le, D)
    bias = bias_ref[...]                           # (H, Le, Le)
    for l in range(N_LAYERS):
        ln = ln_ref[l]                             # (2, D)
        n = _rms(h, ln[0:1])
        h = h + _mha(n, n, wqkv_ref[l], wo_ref[l], bias, None, fused_qkv=True)
        n = _rms(h, ln[1:2])
        ff = jnp.maximum(jnp.dot(n, wi_ref[l], preferred_element_type=jnp.float32), 0.0)
        h = h + jnp.dot(ff, wo2_ref[l], preferred_element_type=jnp.float32)
    o_ref[0] = _rms(h, fln_ref[...]).astype(o_ref.dtype)


def _decoder_loss_kernel(dh_ref, enc_ref, mask_ref, onehot_ref, bias_ref,
                         ln_ref, sa_wqkv_ref, sa_wo_ref, ca_wqkv_ref, ca_wo_ref,
                         wi_ref, wo_ref, fln_ref, emb_ref,
                         loss_ref, sum_sc, cnt_sc):
    # All decoder layers + final RMSNorm + tied lm-head + CE; loss accumulated
    # across the batch grid into VMEM scratch -> single (1,1) scalar output.
    b = pl.program_id(0)

    @pl.when(b == 0)
    def _():
        sum_sc[...] = jnp.zeros_like(sum_sc)
        cnt_sc[...] = jnp.zeros_like(cnt_sc)

    h = dh_ref[0]                                  # (Ld, D)
    enc = enc_ref[0]                               # (Le, D)
    mask = mask_ref[0]                             # (Ld, Ld) causal+padding additive mask
    bias = bias_ref[...]                           # (H, Ld, Ld)
    emb = emb_ref[...]                             # (V, D)

    for l in range(N_LAYERS):
        ln = ln_ref[l]                             # (3, D)
        # self-attention (relative bias + causal/padding mask)
        n = _rms(h, ln[0:1])
        h = h + _mha(n, n, sa_wqkv_ref[l], sa_wo_ref[l], bias, mask, fused_qkv=True)
        # cross-attention (no relative bias; encoder attention mask is all ones)
        n = _rms(h, ln[1:2])
        h = h + _mha(n, enc, ca_wqkv_ref[l], ca_wo_ref[l], None, None, fused_qkv=False)
        # FFN
        n = _rms(h, ln[2:3])
        ff = jnp.maximum(jnp.dot(n, wi_ref[l], preferred_element_type=jnp.float32), 0.0)
        h = h + jnp.dot(ff, wo_ref[l], preferred_element_type=jnp.float32)

    # final RMSNorm + tied-embedding rescale + lm-head (logits stay in VMEM)
    n = _rms(h, fln_ref[...]) * (D_MODEL ** -0.5)
    logits = lax.dot_general(n, emb, (((1,), (1,)), ((), ())),
                             preferred_element_type=jnp.float32)          # (Ld, V)

    # cross-entropy with ignore_index=-100 encoded as an all-zero one-hot row
    onehot = onehot_ref[0]                                                # (Ld, V)
    m = jnp.max(logits, axis=-1, keepdims=True)
    lse = m + jnp.log(jnp.sum(jnp.exp(logits - m), axis=-1, keepdims=True))  # (Ld,1)
    picked = jnp.sum(onehot * logits, axis=-1, keepdims=True)             # (Ld,1)
    valid = jnp.sum(onehot, axis=-1, keepdims=True)                       # (Ld,1) in {0,1}

    sum_sc[...] += jnp.sum(valid * (lse - picked), axis=0, keepdims=True)  # (1,1)
    cnt_sc[...] += jnp.sum(valid, axis=0, keepdims=True)                   # (1,1)

    # output block index is constant -> stays resident; safe to rewrite each step
    loss_ref[...] = sum_sc[...] / jnp.maximum(cnt_sc[...], 1.0)


# ------------------------------ kernel wrappers --------------------------------
def encoder_call(h, bias, enc_w):
    B, Le, D = h.shape
    L = N_LAYERS
    return pl.pallas_call(
        _encoder_kernel,
        out_shape=jax.ShapeDtypeStruct((B, Le, D), jnp.float32),
        grid=(B,),
        in_specs=[
            pl.BlockSpec((1, Le, D), lambda b: (b, 0, 0)),             # h (per batch)
            pl.BlockSpec((N_HEADS, Le, Le), lambda b: (0, 0, 0)),      # rel bias
            pl.BlockSpec((L, 2, D), lambda b: (0, 0, 0)),              # [attn ln | ff ln]
            pl.BlockSpec((L, D, 3 * HD), lambda b: (0, 0, 0)),         # wqkv
            pl.BlockSpec((L, HD, D), lambda b: (0, 0, 0)),             # wo
            pl.BlockSpec((L, D, D_FF), lambda b: (0, 0, 0)),           # wi
            pl.BlockSpec((L, D_FF, D), lambda b: (0, 0, 0)),           # wo2
            pl.BlockSpec((1, D), lambda b: (0, 0)),                    # final ln
        ],
        out_specs=pl.BlockSpec((1, Le, D), lambda b: (b, 0, 0)),
        compiler_params=pltpu.CompilerParams(dimension_semantics=("parallel",)),
    )(h, bias, enc_w['ln'], enc_w['wqkv'], enc_w['wo'], enc_w['wi'], enc_w['wo2'],
      enc_w['final_ln'])


def decoder_loss_call(dh, enc_out, self_mask, onehot, bias, dec_w, emb):
    B, Ld, D = dh.shape
    Le = enc_out.shape[1]
    V = emb.shape[0]
    L = N_LAYERS
    out = pl.pallas_call(
        _decoder_loss_kernel,
        out_shape=jax.ShapeDtypeStruct((1, 1), jnp.float32),
        grid=(B,),
        in_specs=[
            pl.BlockSpec((1, Ld, D), lambda b: (b, 0, 0)),             # dec input emb
            pl.BlockSpec((1, Le, D), lambda b: (b, 0, 0)),             # encoder output
            pl.BlockSpec((1, Ld, Ld), lambda b: (b, 0, 0)),            # additive mask
            pl.BlockSpec((1, Ld, V), lambda b: (b, 0, 0)),             # label one-hot
            pl.BlockSpec((N_HEADS, Ld, Ld), lambda b: (0, 0, 0)),      # rel bias
            pl.BlockSpec((L, 3, D), lambda b: (0, 0, 0)),              # [sa|ca|ff] ln
            pl.BlockSpec((L, D, 3 * HD), lambda b: (0, 0, 0)),         # sa wqkv
            pl.BlockSpec((L, HD, D), lambda b: (0, 0, 0)),             # sa wo
            pl.BlockSpec((L, D, 3 * HD), lambda b: (0, 0, 0)),         # ca wqkv
            pl.BlockSpec((L, HD, D), lambda b: (0, 0, 0)),             # ca wo
            pl.BlockSpec((L, D, D_FF), lambda b: (0, 0, 0)),           # wi
            pl.BlockSpec((L, D_FF, D), lambda b: (0, 0, 0)),           # wo
            pl.BlockSpec((1, D), lambda b: (0, 0)),                    # final ln
            pl.BlockSpec((V, D), lambda b: (0, 0)),                    # tied embedding
        ],
        out_specs=pl.BlockSpec((1, 1), lambda b: (0, 0)),
        scratch_shapes=[pltpu.VMEM((1, 1), jnp.float32),               # loss numerator
                        pltpu.VMEM((1, 1), jnp.float32)],              # valid-token count
        compiler_params=pltpu.CompilerParams(dimension_semantics=("arbitrary",)),
    )(dh, enc_out, self_mask, onehot, bias,
      dec_w['ln'], dec_w['sa_wqkv'], dec_w['sa_wo'],
      dec_w['ca_wqkv'], dec_w['ca_wo'], dec_w['wi'], dec_w['wo'],
      dec_w['final_ln'], emb)
    return out[0, 0]


# -------------------------- T5 glue (plain JAX) --------------------------------
def _relative_position_bucket(relative_position, bidirectional,
                              num_buckets=N_BUCKETS, max_distance=MAX_DIST):
    if bidirectional:
        num_buckets //= 2
        buckets = (relative_position > 0).astype(jnp.int32) * num_buckets
        rp = jnp.abs(relative_position)
    else:
        buckets = jnp.zeros_like(relative_position)
        rp = -jnp.minimum(relative_position, 0)
    max_exact = num_buckets // 2
    is_small = rp < max_exact
    rp_f = jnp.maximum(rp.astype(jnp.float32), 1.0)
    val_large = max_exact + (jnp.log(rp_f / max_exact)
                             / np.log(max_distance / max_exact)
                             * (num_buckets - max_exact)).astype(jnp.int32)
    val_large = jnp.minimum(val_large, num_buckets - 1)
    return buckets + jnp.where(is_small, rp, val_large)


def compute_position_bias(qlen, klen, rel_emb, bidirectional):
    ctx = jnp.arange(qlen)[:, None]
    mem = jnp.arange(klen)[None, :]
    buckets = _relative_position_bucket(mem - ctx, bidirectional)
    vals = rel_emb[buckets]                        # (q, k, H)
    return jnp.transpose(vals, (2, 0, 1))          # (H, q, k)


def shift_right(labels):
    shifted = jnp.concatenate(
        [jnp.full((labels.shape[0], 1), PAD_ID, labels.dtype), labels[:, :-1]], axis=1)
    return jnp.where(shifted == -100, PAD_ID, shifted)


def t5_loss(params, input_embedded, input_labels, output_ids, output_masks, mask_pos):
    # input_labels / mask_pos mirror the PyTorch signature but are unused in forward().
    del input_labels, mask_pos
    B, Le, D = input_embedded.shape

    # ------------------------------ encoder --------------------------------
    enc_bias = compute_position_bias(Le, Le, params['enc']['rel_bias'], bidirectional=True)
    enc_out = encoder_call(input_embedded, enc_bias, params['enc'])

    # ------------------------------ decoder --------------------------------
    dec_ids = shift_right(output_ids)                  # labels -> decoder_input_ids
    Ld = dec_ids.shape[1]
    dh = params['shared'][dec_ids]                     # embedding lookup (glue)

    causal = jnp.tril(jnp.ones((Ld, Ld), jnp.float32))
    combined = causal[None, :, :] * output_masks.astype(jnp.float32)[:, None, :]
    self_mask = (1.0 - combined) * NEG_INF             # (B, Ld, Ld) additive mask
    dec_bias = compute_position_bias(Ld, Ld, params['dec']['rel_bias'], bidirectional=False)

    # -100 labels -> all-zero one-hot rows (ignored by the in-kernel CE)
    onehot = jax.nn.one_hot(output_ids, VOCAB, dtype=jnp.float32)        # (B, Ld, V)

    return decoder_loss_call(dh, enc_out, self_mask, onehot, dec_bias,
                             params['dec'], params['shared'])

# TODO(synk): generate()/evaluate() (autoregressive decoding + HF tokenizer string
# post-processing) have no clean Pallas equivalent and are not implemented.


# ---------------------------- parameter init -----------------------------------
def init_params(key):
    keys = iter(jax.random.split(key, 32))
    nk = lambda: next(keys)
    normal = lambda k, shape, s=0.02: jax.random.normal(k, shape, jnp.float32) * s

    params = dict(
        shared=normal(nk(), (VOCAB, D_MODEL), 0.5),
        enc=dict(
            ln=jnp.ones((N_LAYERS, 2, D_MODEL), jnp.float32),
            wqkv=normal(nk(), (N_LAYERS, D_MODEL, 3 * HD)),
            wo=normal(nk(), (N_LAYERS, HD, D_MODEL)),
            wi=normal(nk(), (N_LAYERS, D_MODEL, D_FF)),
            wo2=normal(nk(), (N_LAYERS, D_FF, D_MODEL)),
            rel_bias=normal(nk(), (N_BUCKETS, N_HEADS), 0.1),
            final_ln=jnp.ones((1, D_MODEL), jnp.float32),
        ),
        dec=dict(
            ln=jnp.ones((N_LAYERS, 3, D_MODEL), jnp.float32),
            sa_wqkv=normal(nk(), (N_LAYERS, D_MODEL, 3 * HD)),
            sa_wo=normal(nk(), (N_LAYERS, HD, D_MODEL)),
            ca_wqkv=normal(nk(), (N_LAYERS, D_MODEL, 3 * HD)),
            ca_wo=normal(nk(), (N_LAYERS, HD, D_MODEL)),
            wi=normal(nk(), (N_LAYERS, D_MODEL, D_FF)),
            wo=normal(nk(), (N_LAYERS, D_FF, D_MODEL)),
            rel_bias=normal(nk(), (N_BUCKETS, N_HEADS), 0.1),
            final_ln=jnp.ones((1, D_MODEL), jnp.float32),
        ),
    )
    return params


# --------------------------------- main ----------------------------------------
if __name__ == "__main__":
    B, Le, Ld = 2, 8, 8
    key = jax.random.PRNGKey(0)
    kp, ke, kl = jax.random.split(key, 3)

    params = init_params(kp)
    input_embedded = jax.random.normal(ke, (B, Le, D_MODEL), jnp.float32)
    output_ids = jax.random.randint(kl, (B, Ld), 1, VOCAB, dtype=jnp.int32)
    output_ids = output_ids.at[1, -2:].set(-100)          # padded labels -> ignored by CE
    output_masks = jnp.ones((B, Ld), jnp.int32).at[1, -2:].set(0)
    input_labels = output_ids                             # unused by forward()
    mask_pos = jnp.zeros((B,), jnp.int32)                 # unused by forward()

    loss_fn = jax.jit(t5_loss)
    loss = loss_fn(params, input_embedded, input_labels, output_ids, output_masks, mask_pos)
    jax.block_until_ready(loss)
    assert loss.shape == () and bool(jnp.isfinite(loss))
    print("KERNEL_OK")
</pallas_src>

<mosaic_0001>
module attributes {stable_mosaic.version = 11 : i64} {
  func.func @_encoder_kernel(%arg0: i32, %arg1: memref<1x8x64xf32, #tpu.memory_space<vmem>>, %arg2: memref<4x8x8xf32, #tpu.memory_space<vmem>>, %arg3: memref<2x2x64xf32, #tpu.memory_space<vmem>>, %arg4: memref<2x64x192xf32, #tpu.memory_space<vmem>>, %arg5: memref<2x64x64xf32, #tpu.memory_space<vmem>>, %arg6: memref<2x64x128xf32, #tpu.memory_space<vmem>>, %arg7: memref<2x128x64xf32, #tpu.memory_space<vmem>>, %arg8: memref<1x64xf32, #tpu.memory_space<vmem>>, %arg9: memref<1x8x64xf32, #tpu.memory_space<vmem>>) attributes {dimension_semantics = [#tpu.dimension_semantics<parallel>], iteration_bounds = array<i64: 2>, scalar_prefetch = 0 : i64, scratch_operands = 0 : i64, tpu.core_type = #tpu.core_type<tc>, window_params = [{transform_indices = @transform_0, window_bounds = array<i64: 1, 8, 64>}, {pipeline_mode = #tpu.pipeline_mode<synchronous>, transform_indices = @transform_1, window_bounds = array<i64: 4, 8, 8>}, {pipeline_mode = #tpu.pipeline_mode<synchronous>, transform_indices = @transform_2, window_bounds = array<i64: 2, 2, 64>}, {pipeline_mode = #tpu.pipeline_mode<synchronous>, transform_indices = @transform_3, window_bounds = array<i64: 2, 64, 192>}, {pipeline_mode = #tpu.pipeline_mode<synchronous>, transform_indices = @transform_4, window_bounds = array<i64: 2, 64, 64>}, {pipeline_mode = #tpu.pipeline_mode<synchronous>, transform_indices = @transform_5, window_bounds = array<i64: 2, 64, 128>}, {pipeline_mode = #tpu.pipeline_mode<synchronous>, transform_indices = @transform_6, window_bounds = array<i64: 2, 128, 64>}, {pipeline_mode = #tpu.pipeline_mode<synchronous>, transform_indices = @transform_7, window_bounds = array<i64: 1, 64>}, {transform_indices = @transform_8, window_bounds = array<i64: 1, 8, 64>}]} {
    %c0 = arith.constant 0 : index
    %c0_0 = arith.constant 0 : index
    %c0_1 = arith.constant 0 : index
    %0 = vector.load %arg1[%c0, %c0_0, %c0_1] : memref<1x8x64xf32, #tpu.memory_space<vmem>>, vector<1x8x64xf32>
    %1 = vector.shape_cast %0 : vector<1x8x64xf32> to vector<8x64xf32>
    %c0_2 = arith.constant 0 : index
    %c0_3 = arith.constant 0 : index
    %c0_4 = arith.constant 0 : index
    %2 = vector.load %arg2[%c0_2, %c0_3, %c0_4] : memref<4x8x8xf32, #tpu.memory_space<vmem>>, vector<4x8x8xf32>
    %c0_5 = arith.constant 0 : index
    %c0_6 = arith.constant 0 : index
    %c0_7 = arith.constant 0 : index
    %3 = vector.load %arg3[%c0_5, %c0_6, %c0_7] : memref<2x2x64xf32, #tpu.memory_space<vmem>>, vector<1x2x64xf32>
    %4 = vector.shape_cast %3 : vector<1x2x64xf32> to vector<2x64xf32>
    %5 = vector.extract_strided_slice %4 {offsets = [0, 0], sizes = [1, 64], strides = [1, 1]} : vector<2x64xf32> to vector<1x64xf32>
    %6 = arith.mulf %1, %1 : vector<8x64xf32>
    %cst = arith.constant dense<0.000000e+00> : vector<8xf32>
    %7 = vector.multi_reduction <add>, %6, %cst [1] : vector<8x64xf32> to vector<8xf32>
    %8 = vector.shape_cast %7 : vector<8xf32> to vector<8x1xf32>
    %cst_8 = arith.constant 6.400000e+01 : f32
    %9 = vector.broadcast %cst_8 : f32 to vector<8x1xf32>
    %10 = arith.divf %8, %9 : vector<8x1xf32>
    %cst_9 = arith.constant 9.99999997E-7 : f32
    %11 = vector.broadcast %cst_9 : f32 to vector<8x1xf32>
    %12 = arith.addf %10, %11 : vector<8x1xf32>
    %13 = math.rsqrt %12 : vector<8x1xf32>
    %14 = vector.broadcast %13 : vector<8x1xf32> to vector<8x64xf32>
    %15 = arith.mulf %1, %14 : vector<8x64xf32>
    %16 = vector.broadcast %5 : vector<1x64xf32> to vector<8x64xf32>
    %17 = arith.mulf %15, %16 : vector<8x64xf32>
    %c0_10 = arith.constant 0 : index
    %c0_11 = arith.constant 0 : index
    %c0_12 = arith.constant 0 : index
    %18 = vector.load %arg4[%c0_10, %c0_11, %c0_12] : memref<2x64x192xf32, #tpu.memory_space<vmem>>, vector<1x64x192xf32>
    %19 = vector.shape_cast %18 : vector<1x64x192xf32> to vector<64x192xf32>
    %c0_13 = arith.constant 0 : index
    %c0_14 = arith.constant 0 : index
    %c0_15 = arith.constant 0 : index
    %20 = vector.load %arg5[%c0_13, %c0_14, %c0_15] : memref<2x64x64xf32, #tpu.memory_space<vmem>>, vector<1x64x64xf32>
    %21 = vector.shape_cast %20 : vector<1x64x64xf32> to vector<64x64xf32>
    %cst_16 = arith.constant dense<0.000000e+00> : vector<8x192xf32>
    %22 = tpu.matmul %17, %19, %cst_16 {dimension_numbers = #tpu.dot_dimension_numbers<[1], [0], [0], [1], [0, 0, 1, 1], [], []>} : vector<8x64xf32>, vector<64x192xf32>, vector<8x192xf32> -> vector<8x192xf32>
    %23 = vector.extract_strided_slice %22 {offsets = [0, 0], sizes = [8, 64], strides = [1, 1]} : vector<8x192xf32> to vector<8x64xf32>
    %24 = vector.extract_strided_slice %22 {offsets = [0, 64], sizes = [8, 64], strides = [1, 1]} : vector<8x192xf32> to vector<8x64xf32>
    %25 = vector.extract_strided_slice %22 {offsets = [0, 128], sizes = [8, 64], strides = [1, 1]} : vector<8x192xf32> to vector<8x64xf32>
    %26 = vector.extract_strided_slice %23 {offsets = [0, 0], sizes = [8, 16], strides = [1, 1]} : vector<8x64xf32> to vector<8x16xf32>
    %27 = vector.extract_strided_slice %24 {offsets = [0, 0], sizes = [8, 16], strides = [1, 1]} : vector<8x64xf32> to vector<8x16xf32>
    %cst_17 = arith.constant dense<0.000000e+00> : vector<8x8xf32>
    %28 = tpu.matmul %26, %27, %cst_17 {dimension_numbers = #tpu.dot_dimension_numbers<[1], [1], [0], [0], [0, 0, 1, 0], [], []>} : vector<8x16xf32>, vector<8x16xf32>, vector<8x8xf32> -> vector<8x8xf32>
    %29 = vector.extract_strided_slice %2 {offsets = [0, 0, 0], sizes = [1, 8, 8], strides = [1, 1, 1]} : vector<4x8x8xf32> to vector<1x8x8xf32>
    %30 = vector.shape_cast %29 : vector<1x8x8xf32> to vector<8x8xf32>
    %31 = arith.addf %28, %30 : vector<8x8xf32>
    %cst_18 = arith.constant dense<0xFF800000> : vector<8xf32>
    %32 = vector.multi_reduction <maximumf>, %31, %cst_18 [1] : vector<8x8xf32> to vector<8xf32>
    %33 = vector.shape_cast %32 : vector<8xf32> to vector<8x1xf32>
    %34 = vector.broadcast %33 : vector<8x1xf32> to vector<8x8xf32>
    %35 = arith.subf %31, %34 : vector<8x8xf32>
    %36 = math.exp %35 : vector<8x8xf32>
    %cst_19 = arith.constant dense<0.000000e+00> : vector<8xf32>
    %37 = vector.multi_reduction <add>, %36, %cst_19 [1] : vector<8x8xf32> to vector<8xf32>
    %38 = vector.shape_cast %37 : vector<8xf32> to vector<8x1xf32>
    %39 = tpu.reciprocal %38 {approx = true} : vector<8x1xf32> -> vector<8x1xf32>
    %40 = vector.broadcast %39 : vector<8x1xf32> to vector<8x8xf32>
    %41 = arith.mulf %36, %40 : vector<8x8xf32>
    %42 = vector.extract_strided_slice %25 {offsets = [0, 0], sizes = [8, 16], strides = [1, 1]} : vector<8x64xf32> to vector<8x16xf32>
    %cst_20 = arith.constant dense<0.000000e+00> : vector<8x16xf32>
    %43 = tpu.matmul %41, %42, %cst_20 {dimension_numbers = #tpu.dot_dimension_numbers<[1], [0], [0], [1], [0, 0, 1, 1], [], []>} : vector<8x8xf32>, vector<8x16xf32>, vector<8x16xf32> -> vector<8x16xf32>
    %44 = vector.extract_strided_slice %21 {offsets = [0, 0], sizes = [16, 64], strides = [1, 1]} : vector<64x64xf32> to vector<16x64xf32>
    %cst_21 = arith.constant dense<0.000000e+00> : vector<8x64xf32>
    %45 = tpu.matmul %43, %44, %cst_21 {dimension_numbers = #tpu.dot_dimension_numbers<[1], [0], [0], [1], [0, 0, 1, 1], [], []>} : vector<8x16xf32>, vector<16x64xf32>, vector<8x64xf32> -> vector<8x64xf32>
    %46 = vector.extract_strided_slice %23 {offsets = [0, 16], sizes = [8, 16], strides = [1, 1]} : vector<8x64xf32> to vector<8x16xf32>
    %47 = vector.extract_strided_slice %24 {offsets = [0, 16], sizes = [8, 16], strides = [1, 1]} : vector<8x64xf32> to vector<8x16xf32>
    %cst_22 = arith.constant dense<0.000000e+00> : vector<8x8xf32>
    %48 = tpu.matmul %46, %47, %cst_22 {dimension_numbers = #tpu.dot_dimension_numbers<[1], [1], [0], [0], [0, 0, 1, 0], [], []>} : vector<8x16xf32>, vector<8x16xf32>, vector<8x8xf32> -> vector<8x8xf32>
    %49 = vector.extract_strided_slice %2 {offsets = [1, 0, 0], sizes = [1, 8, 8], strides = [1, 1, 1]} : vector<4x8x8xf32> to vector<1x8x8xf32>
    %50 = vector.shape_cast %49 : vector<1x8x8xf32> to vector<8x8xf32>
    %51 = arith.addf %48, %50 : vector<8x8xf32>
    %cst_23 = arith.constant dense<0xFF800000> : vector<8xf32>
    %52 = vector.multi_reduction <maximumf>, %51, %cst_23 [1] : vector<8x8xf32> to vector<8xf32>
    %53 = vector.shape_cast %52 : vector<8xf32> to vector<8x1xf32>
    %54 = vector.broadcast %53 : vector<8x1xf32> to vector<8x8xf32>
    %55 = arith.subf %51, %54 : vector<8x8xf32>
    %56 = math.exp %55 : vector<8x8xf32>
    %cst_24 = arith.constant dense<0.000000e+00> : vector<8xf32>
    %57 = vector.multi_reduction <add>, %56, %cst_24 [1] : vector<8x8xf32> to vector<8xf32>
    %58 = vector.shape_cast %57 : vector<8xf32> to vector<8x1xf32>
    %59 = tpu.reciprocal %58 {approx = true} : vector<8x1xf32> -> vector<8x1xf32>
    %60 = vector.broadcast %59 : vector<8x1xf32> to vector<8x8xf32>
    %61 = arith.mulf %56, %60 : vector<8x8xf32>
    %62 = vector.extract_strided_slice %25 {offsets = [0, 16], sizes = [8, 16], strides = [1, 1]} : vector<8x64xf32> to vector<8x16xf32>
    %cst_25 = arith.constant dense<0.000000e+00> : vector<8x16xf32>
    %63 = tpu.matmul %61, %62, %cst_25 {dimension_numbers = #tpu.dot_dimension_numbers<[1], [0], [0], [1], [0, 0, 1, 1], [], []>} : vector<8x8xf32>, vector<8x16xf32>, vector<8x16xf32> -> vector<8x16xf32>
    %64 = vector.extract_strided_slice %21 {offsets = [16, 0], sizes = [16, 64], strides = [1, 1]} : vector<64x64xf32> to vector<16x64xf32>
    %cst_26 = arith.constant dense<0.000000e+00> : vector<8x64xf32>
    %65 = tpu.matmul %63, %64, %cst_26 {dimension_numbers = #tpu.dot_dimension_numbers<[1], [0], [0], [1], [0, 0, 1, 1], [], []>} : vector<8x16xf32>, vector<16x64xf32>, vector<8x64xf32> -> vector<8x64xf32>
    %66 = arith.addf %45, %65 : vector<8x64xf32>
    %67 = vector.extract_strided_slice %23 {offsets = [0, 32], sizes = [8, 16], strides = [1, 1]} : vector<8x64xf32> to vector<8x16xf32>
    %68 = vector.extract_strided_slice %24 {offsets = [0, 32], sizes = [8, 16], strides = [1, 1]} : vector<8x64xf32> to vector<8x16xf32>
    %cst_27 = arith.constant dense<0.000000e+00> : vector<8x8xf32>
    %69 = tpu.matmul %67, %68, %cst_27 {dimension_numbers = #tpu.dot_dimension_numbers<[1], [1], [0], [0], [0, 0, 1, 0], [], []>} : vector<8x16xf32>, vector<8x16xf32>, vector<8x8xf32> -> vector<8x8xf32>
    %70 = vector.extract_strided_slice %2 {offsets = [2, 0, 0], sizes = [1, 8, 8], strides = [1, 1, 1]} : vector<4x8x8xf32> to vector<1x8x8xf32>
    %71 = vector.shape_cast %70 : vector<1x8x8xf32> to vector<8x8xf32>
    %72 = arith.addf %69, %71 : vector<8x8xf32>
    %cst_28 = arith.constant dense<0xFF800000> : vector<8xf32>
    %73 = vector.multi_reduction <maximumf>, %72, %cst_28 [1] : vector<8x8xf32> to vector<8xf32>
    %74 = vector.shape_cast %73 : vector<8xf32> to vector<8x1xf32>
    %75 = vector.broadcast %74 : vector<8x1xf32> to vector<8x8xf32>
    %76 = arith.subf %72, %75 : vector<8x8xf32>
    %77 = math.exp %76 : vector<8x8xf32>
    %cst_29 = arith.constant dense<0.000000e+00> : vector<8xf32>
    %78 = vector.multi_reduction <add>, %77, %cst_29 [1] : vector<8x8xf32> to vector<8xf32>
    %79 = vector.shape_cast %78 : vector<8xf32> to vector<8x1xf32>
    %80 = tpu.reciprocal %79 {approx = true} : vector<8x1xf32> -> vector<8x1xf32>
    %81 = vector.broadcast %80 : vector<8x1xf32> to vector<8x8xf32>
    %82 = arith.mulf %77, %81 : vector<8x8xf32>
    %83 = vector.extract_strided_slice %25 {offsets = [0, 32], sizes = [8, 16], strides = [1, 1]} : vector<8x64xf32> to vector<8x16xf32>
    %cst_30 = arith.constant dense<0.000000e+00> : vector<8x16xf32>
    %84 = tpu.matmul %82, %83, %cst_30 {dimension_numbers = #tpu.dot_dimension_numbers<[1], [0], [0], [1], [0, 0, 1, 1], [], []>} : vector<8x8xf32>, vector<8x16xf32>, vector<8x16xf32> -> vector<8x16xf32>
    %85 = vector.extract_strided_slice %21 {offsets = [32, 0], sizes = [16, 64], strides = [1, 1]} : vector<64x64xf32> to vector<16x64xf32>
    %cst_31 = arith.constant dense<0.000000e+00> : vector<8x64xf32>
    %86 = tpu.matmul %84, %85, %cst_31 {dimension_numbers = #tpu.dot_dimension_numbers<[1], [0], [0], [1], [0, 0, 1, 1], [], []>} : vector<8x16xf32>, vector<16x64xf32>, vector<8x64xf32> -> vector<8x64xf32>
    %87 = arith.addf %66, %86 : vector<8x64xf32>
    %88 = vector.extract_strided_slice %23 {offsets = [0, 48], sizes = [8, 16], strides = [1, 1]} : vector<8x64xf32> to vector<8x16xf32>
    %89 = vector.extract_strided_slice %24 {offsets = [0, 48], sizes = [8, 16], strides = [1, 1]} : vector<8x64xf32> to vector<8x16xf32>
    %cst_32 = arith.constant dense<0.000000e+00> : vector<8x8xf32>
    %90 = tpu.matmul %88, %89, %cst_32 {dimension_numbers = #tpu.dot_dimension_numbers<[1], [1], [0], [0], [0, 0, 1, 0], [], []>} : vector<8x16xf32>, vector<8x16xf32>, vector<8x8xf32> -> vector<8x8xf32>
    %91 = vector.extract_strided_slice %2 {offsets = [3, 0, 0], sizes = [1, 8, 8], strides = [1, 1, 1]} : vector<4x8x8xf32> to vector<1x8x8xf32>
    %92 = vector.shape_cast %91 : vector<1x8x8xf32> to vector<8x8xf32>
    %93 = arith.addf %90, %92 : vector<8x8xf32>
    %cst_33 = arith.constant dense<0xFF800000> : vector<8xf32>
    %94 = vector.multi_reduction <maximumf>, %93, %cst_33 [1] : vector<8x8xf32> to vector<8xf32>
    %95 = vector.shape_cast %94 : vector<8xf32> to vector<8x1xf32>
    %96 = vector.broadcast %95 : vector<8x1xf32> to vector<8x8xf32>
    %97 = arith.subf %93, %96 : vector<8x8xf32>
    %98 = math.exp %97 : vector<8x8xf32>
    %cst_34 = arith.constant dense<0.000000e+00> : vector<8xf32>
    %99 = vector.multi_reduction <add>, %98, %cst_34 [1] : vector<8x8xf32> to vector<8xf32>
    %100 = vector.shape_cast %99 : vector<8xf32> to vector<8x1xf32>
    %101 = tpu.reciprocal %100 {approx = true} : vector<8x1xf32> -> vector<8x1xf32>
    %102 = vector.broadcast %101 : vector<8x1xf32> to vector<8x8xf32>
    %103 = arith.mulf %98, %102 : vector<8x8xf32>
    %104 = vector.extract_strided_slice %25 {offsets = [0, 48], sizes = [8, 16], strides = [1, 1]} : vector<8x64xf32> to vector<8x16xf32>
    %cst_35 = arith.constant dense<0.000000e+00> : vector<8x16xf32>
    %105 = tpu.matmul %103, %104, %cst_35 {dimension_numbers = #tpu.dot_dimension_numbers<[1], [0], [0], [1], [0, 0, 1, 1], [], []>} : vector<8x8xf32>, vector<8x16xf32>, vector<8x16xf32> -> vector<8x16xf32>
    %106 = vector.extract_strided_slice %21 {offsets = [48, 0], sizes = [16, 64], strides = [1, 1]} : vector<64x64xf32> to vector<16x64xf32>
    %cst_36 = arith.constant dense<0.000000e+00> : vector<8x64xf32>
    %107 = tpu.matmul %105, %106, %cst_36 {dimension_numbers = #tpu.dot_dimension_numbers<[1], [0], [0], [1], [0, 0, 1, 1], [], []>} : vector<8x16xf32>, vector<16x64xf32>, vector<8x64xf32> -> vector<8x64xf32>
    %108 = arith.addf %87, %107 : vector<8x64xf32>
    %109 = arith.addf %1, %108 : vector<8x64xf32>
    %110 = vector.extract_strided_slice %4 {offsets = [1, 0], sizes = [1, 64], strides = [1, 1]} : vector<2x64xf32> to vector<1x64xf32>
    %111 = arith.mulf %109, %109 : vector<8x64xf32>
    %cst_37 = arith.constant dense<0.000000e+00> : vector<8xf32>
    %112 = vector.multi_reduction <add>, %111, %cst_37 [1] : vector<8x64xf32> to vector<8xf32>
    %113 = vector.shape_cast %112 : vector<8xf32> to vector<8x1xf32>
    %cst_38 = arith.constant 6.400000e+01 : f32
    %114 = vector.broadcast %cst_38 : f32 to vector<8x1xf32>
    %115 = arith.divf %113, %114 : vector<8x1xf32>
    %cst_39 = arith.constant 9.99999997E-7 : f32
    %116 = vector.broadcast %cst_39 : f32 to vector<8x1xf32>
    %117 = arith.addf %115, %116 : vector<8x1xf32>
    %118 = math.rsqrt %117 : vector<8x1xf32>
    %119 = vector.broadcast %118 : vector<8x1xf32> to vector<8x64xf32>
    %120 = arith.mulf %109, %119 : vector<8x64xf32>
    %121 = vector.broadcast %110 : vector<1x64xf32> to vector<8x64xf32>
    %122 = arith.mulf %120, %121 : vector<8x64xf32>
    %c0_40 = arith.constant 0 : index
    %c0_41 = arith.constant 0 : index
    %c0_42 = arith.constant 0 : index
    %123 = vector.load %arg6[%c0_40, %c0_41, %c0_42] : memref<2x64x128xf32, #tpu.memory_space<vmem>>, vector<1x64x128xf32>
    %124 = vector.shape_cast %123 : vector<1x64x128xf32> to vector<64x128xf32>
    %cst_43 = arith.constant dense<0.000000e+00> : vector<8x128xf32>
    %125 = tpu.matmul %122, %124, %cst_43 {dimension_numbers = #tpu.dot_dimension_numbers<[1], [0], [0], [1], [0, 0, 1, 1], [], []>} : vector<8x64xf32>, vector<64x128xf32>, vector<8x128xf32> -> vector<8x128xf32>
    %cst_44 = arith.constant 0.000000e+00 : f32
    %126 = vector.broadcast %cst_44 : f32 to vector<8x128xf32>
    %127 = arith.maximumf %125, %126 : vector<8x128xf32>
    %c0_45 = arith.constant 0 : index
    %c0_46 = arith.constant 0 : index
    %c0_47 = arith.constant 0 : index
    %128 = vector.load %arg7[%c0_45, %c0_46, %c0_47] : memref<2x128x64xf32, #tpu.memory_space<vmem>>, vector<1x128x64xf32>
    %129 = vector.shape_cast %128 : vector<1x128x64xf32> to vector<128x64xf32>
    %cst_48 = arith.constant dense<0.000000e+00> : vector<8x64xf32>
    %130 = tpu.matmul %127, %129, %cst_48 {dimension_numbers = #tpu.dot_dimension_numbers<[1], [0], [0], [1], [0, 0, 1, 1], [], []>} : vector<8x128xf32>, vector<128x64xf32>, vector<8x64xf32> -> vector<8x64xf32>
    %131 = arith.addf %109, %130 : vector<8x64xf32>
    %c1 = arith.constant 1 : index
    %c0_49 = arith.constant 0 : index
    %c0_50 = arith.constant 0 : index
    %132 = vector.load %arg3[%c1, %c0_49, %c0_50] : memref<2x2x64xf32, #tpu.memory_space<vmem>>, vector<1x2x64xf32>
    %133 = vector.shape_cast %132 : vector<1x2x64xf32> to vector<2x64xf32>
    %134 = vector.extract_strided_slice %133 {offsets = [0, 0], sizes = [1, 64], strides = [1, 1]} : vector<2x64xf32> to vector<1x64xf32>
    %135 = arith.mulf %131, %131 : vector<8x64xf32>
    %cst_51 = arith.constant dense<0.000000e+00> : vector<8xf32>
    %136 = vector.multi_reduction <add>, %135, %cst_51 [1] : vector<8x64xf32> to vector<8xf32>
    %137 = vector.shape_cast %136 : vector<8xf32> to vector<8x1xf32>
    %cst_52 = arith.constant 6.400000e+01 : f32
    %138 = vector.broadcast %cst_52 : f32 to vector<8x1xf32>
    %139 = arith.divf %137, %138 : vector<8x1xf32>
    %cst_53 = arith.constant 9.99999997E-7 : f32
    %140 = vector.broadcast %cst_53 : f32 to vector<8x1xf32>
    %141 = arith.addf %139, %140 : vector<8x1xf32>
    %142 = math.rsqrt %141 : vector<8x1xf32>
    %143 = vector.broadcast %142 : vector<8x1xf32> to vector<8x64xf32>
    %144 = arith.mulf %131, %143 : vector<8x64xf32>
    %145 = vector.broadcast %134 : vector<1x64xf32> to vector<8x64xf32>
    %146 = arith.mulf %144, %145 : vector<8x64xf32>
    %c1_54 = arith.constant 1 : index
    %c0_55 = arith.constant 0 : index
    %c0_56 = arith.constant 0 : index
    %147 = vector.load %arg4[%c1_54, %c0_55, %c0_56] : memref<2x64x192xf32, #tpu.memory_space<vmem>>, vector<1x64x192xf32>
    %148 = vector.shape_cast %147 : vector<1x64x192xf32> to vector<64x192xf32>
    %c1_57 = arith.constant 1 : index
    %c0_58 = arith.constant 0 : index
    %c0_59 = arith.constant 0 : index
    %149 = vector.load %arg5[%c1_57, %c0_58, %c0_59] : memref<2x64x64xf32, #tpu.memory_space<vmem>>, vector<1x64x64xf32>
    %150 = vector.shape_cast %149 : vector<1x64x64xf32> to vector<64x64xf32>
    %cst_60 = arith.constant dense<0.000000e+00> : vector<8x192xf32>
    %151 = tpu.matmul %146, %148, %cst_60 {dimension_numbers = #tpu.dot_dimension_numbers<[1], [0], [0], [1], [0, 0, 1, 1], [], []>} : vector<8x64xf32>, vector<64x192xf32>, vector<8x192xf32> -> vector<8x192xf32>
    %152 = vector.extract_strided_slice %151 {offsets = [0, 0], sizes = [8, 64], strides = [1, 1]} : vector<8x192xf32> to vector<8x64xf32>
    %153 = vector.extract_strided_slice %151 {offsets = [0, 64], sizes = [8, 64], strides = [1, 1]} : vector<8x192xf32> to vector<8x64xf32>
    %154 = vector.extract_strided_slice %151 {offsets = [0, 128], sizes = [8, 64], strides = [1, 1]} : vector<8x192xf32> to vector<8x64xf32>
    %155 = vector.extract_strided_slice %152 {offsets = [0, 0], sizes = [8, 16], strides = [1, 1]} : vector<8x64xf32> to vector<8x16xf32>
    %156 = vector.extract_strided_slice %153 {offsets = [0, 0], sizes = [8, 16], strides = [1, 1]} : vector<8x64xf32> to vector<8x16xf32>
    %cst_61 = arith.constant dense<0.000000e+00> : vector<8x8xf32>
    %157 = tpu.matmul %155, %156, %cst_61 {dimension_numbers = #tpu.dot_dimension_numbers<[1], [1], [0], [0], [0, 0, 1, 0], [], []>} : vector<8x16xf32>, vector<8x16xf32>, vector<8x8xf32> -> vector<8x8xf32>
    %158 = vector.extract_strided_slice %2 {offsets = [0, 0, 0], sizes = [1, 8, 8], strides = [1, 1, 1]} : vector<4x8x8xf32> to vector<1x8x8xf32>
    %159 = vector.shape_cast %158 : vector<1x8x8xf32> to vector<8x8xf32>
    %160 = arith.addf %157, %159 : vector<8x8xf32>
    %cst_62 = arith.constant dense<0xFF800000> : vector<8xf32>
    %161 = vector.multi_reduction <maximumf>, %160, %cst_62 [1] : vector<8x8xf32> to vector<8xf32>
    %162 = vector.shape_cast %161 : vector<8xf32> to vector<8x1xf32>
    %163 = vector.broadcast %162 : vector<8x1xf32> to vector<8x8xf32>
    %164 = arith.subf %160, %163 : vector<8x8xf32>
    %165 = math.exp %164 : vector<8x8xf32>
    %cst_63 = arith.constant dense<0.000000e+00> : vector<8xf32>
    %166 = vector.multi_reduction <add>, %165, %cst_63 [1] : vector<8x8xf32> to vector<8xf32>
    %167 = vector.shape_cast %166 : vector<8xf32> to vector<8x1xf32>
    %168 = tpu.reciprocal %167 {approx = true} : vector<8x1xf32> -> vector<8x1xf32>
    %169 = vector.broadcast %168 : vector<8x1xf32> to vector<8x8xf32>
    %170 = arith.mulf %165, %169 : vector<8x8xf32>
    %171 = vector.extract_strided_slice %154 {offsets = [0, 0], sizes = [8, 16], strides = [1, 1]} : vector<8x64xf32> to vector<8x16xf32>
    %cst_64 = arith.constant dense<0.000000e+00> : vector<8x16xf32>
    %172 = tpu.matmul %170, %171, %cst_64 {dimension_numbers = #tpu.dot_dimension_numbers<[1], [0], [0], [1], [0, 0, 1, 1], [], []>} : vector<8x8xf32>, vector<8x16xf32>, vector<8x16xf32> -> vector<8x16xf32>
    %173 = vector.extract_strided_slice %150 {offsets = [0, 0], sizes = [16, 64], strides = [1, 1]} : vector<64x64xf32> to vector<16x64xf32>
    %cst_65 = arith.constant dense<0.000000e+00> : vector<8x64xf32>
    %174 = tpu.matmul %172, %173, %cst_65 {dimension_numbers = #tpu.dot_dimension_numbers<[1], [0], [0], [1], [0, 0, 1, 1], [], []>} : vector<8x16xf32>, vector<16x64xf32>, vector<8x64xf32> -> vector<8x64xf32>
    %175 = vector.extract_strided_slice %152 {offsets = [0, 16], sizes = [8, 16], strides = [1, 1]} : vector<8x64xf32> to vector<8x16xf32>
    %176 = vector.extract_strided_slice %153 {offsets = [0, 16], sizes = [8, 16], strides = [1, 1]} : vector<8x64xf32> to vector<8x16xf32>
    %cst_66 = arith.constant dense<0.000000e+00> : vector<8x8xf32>
    %177 = tpu.matmul %175, %176, %cst_66 {dimension_numbers = #tpu.dot_dimension_numbers<[1], [1], [0], [0], [0, 0, 1, 0], [], []>} : vector<8x16xf32>, vector<8x16xf32>, vector<8x8xf32> -> vector<8x8xf32>
    %178 = vector.extract_strided_slice %2 {offsets = [1, 0, 0], sizes = [1, 8, 8], strides = [1, 1, 1]} : vector<4x8x8xf32> to vector<1x8x8xf32>
    %179 = vector.shape_cast %178 : vector<1x8x8xf32> to vector<8x8xf32>
    %180 = arith.addf %177, %179 : vector<8x8xf32>
    %cst_67 = arith.constant dense<0xFF800000> : vector<8xf32>
    %181 = vector.multi_reduction <maximumf>, %180, %cst_67 [1] : vector<8x8xf32> to vector<8xf32>
    %182 = vector.shape_cast %181 : vector<8xf32> to vector<8x1xf32>
    %183 = vector.broadcast %182 : vector<8x1xf32> to vector<8x8xf32>
    %184 = arith.subf %180, %183 : vector<8x8xf32>
    %185 = math.exp %184 : vector<8x8xf32>
    %cst_68 = arith.constant dense<0.000000e+00> : vector<8xf32>
    %186 = vector.multi_reduction <add>, %185, %cst_68 [1] : vector<8x8xf32> to vector<8xf32>
    %187 = vector.shape_cast %186 : vector<8xf32> to vector<8x1xf32>
    %188 = tpu.reciprocal %187 {approx = true} : vector<8x1xf32> -> vector<8x1xf32>
    %189 = vector.broadcast %188 : vector<8x1xf32> to vector<8x8xf32>
    %190 = arith.mulf %185, %189 : vector<8x8xf32>
    %191 = vector.extract_strided_slice %154 {offsets = [0, 16], sizes = [8, 16], strides = [1, 1]} : vector<8x64xf32> to vector<8x16xf32>
    %cst_69 = arith.constant dense<0.000000e+00> : vector<8x16xf32>
    %192 = tpu.matmul %190, %191, %cst_69 {dimension_numbers = #tpu.dot_dimension_numbers<[1], [0], [0], [1], [0, 0, 1, 1], [], []>} : vector<8x8xf32>, vector<8x16xf32>, vector<8x16xf32> -> vector<8x16xf32>
    %193 = vector.extract_strided_slice %150 {offsets = [16, 0], sizes = [16, 64], strides = [1, 1]} : vector<64x64xf32> to vector<16x64xf32>
    %cst_70 = arith.constant dense<0.000000e+00> : vector<8x64xf32>
    %194 = tpu.matmul %192, %193, %cst_70 {dimension_numbers = #tpu.dot_dimension_numbers<[1], [0], [0], [1], [0, 0, 1, 1], [], []>} : vector<8x16xf32>, vector<16x64xf32>, vector<8x64xf32> -> vector<8x64xf32>
    %195 = arith.addf %174, %194 : vector<8x64xf32>
    %196 = vector.extract_strided_slice %152 {offsets = [0, 32], sizes = [8, 16], strides = [1, 1]} : vector<8x64xf32> to vector<8x16xf32>
    %197 = vector.extract_strided_slice %153 {offsets = [0, 32], sizes = [8, 16], strides = [1, 1]} : vector<8x64xf32> to vector<8x16xf32>
    %cst_71 = arith.constant dense<0.000000e+00> : vector<8x8xf32>
    %198 = tpu.matmul %196, %197, %cst_71 {dimension_numbers = #tpu.dot_dimension_numbers<[1], [1], [0], [0], [0, 0, 1, 0], [], []>} : vector<8x16xf32>, vector<8x16xf32>, vector<8x8xf32> -> vector<8x8xf32>
    %199 = vector.extract_strided_slice %2 {offsets = [2, 0, 0], sizes = [1, 8, 8], strides = [1, 1, 1]} : vector<4x8x8xf32> to vector<1x8x8xf32>
    %200 = vector.shape_cast %199 : vector<1x8x8xf32> to vector<8x8xf32>
    %201 = arith.addf %198, %200 : vector<8x8xf32>
    %cst_72 = arith.constant dense<0xFF800000> : vector<8xf32>
    %202 = vector.multi_reduction <maximumf>, %201, %cst_72 [1] : vector<8x8xf32> to vector<8xf32>
    %203 = vector.shape_cast %202 : vector<8xf32> to vector<8x1xf32>
    %204 = vector.broadcast %203 : vector<8x1xf32> to vector<8x8xf32>
    %205 = arith.subf %201, %204 : vector<8x8xf32>
    %206 = math.exp %205 : vector<8x8xf32>
    %cst_73 = arith.constant dense<0.000000e+00> : vector<8xf32>
    %207 = vector.multi_reduction <add>, %206, %cst_73 [1] : vector<8x8xf32> to vector<8xf32>
    %208 = vector.shape_cast %207 : vector<8xf32> to vector<8x1xf32>
    %209 = tpu.reciprocal %208 {approx = true} : vector<8x1xf32> -> vector<8x1xf32>
    %210 = vector.broadcast %209 : vector<8x1xf32> to vector<8x8xf32>
    %211 = arith.mulf %206, %210 : vector<8x8xf32>
    %212 = vector.extract_strided_slice %154 {offsets = [0, 32], sizes = [8, 16], strides = [1, 1]} : vector<8x64xf32> to vector<8x16xf32>
    %cst_74 = arith.constant dense<0.000000e+00> : vector<8x16xf32>
    %213 = tpu.matmul %211, %212, %cst_74 {dimension_numbers = #tpu.dot_dimension_numbers<[1], [0], [0], [1], [0, 0, 1, 1], [], []>} : vector<8x8xf32>, vector<8x16xf32>, vector<8x16xf32> -> vector<8x16xf32>
    %214 = vector.extract_strided_slice %150 {offsets = [32, 0], sizes = [16, 64], strides = [1, 1]} : vector<64x64xf32> to vector<16x64xf32>
    %cst_75 = arith.constant dense<0.000000e+00> : vector<8x64xf32>
    %215 = tpu.matmul %213, %214, %cst_75 {dimension_numbers = #tpu.dot_dimension_numbers<[1], [0], [0], [1], [0, 0, 1, 1], [], []>} : vector<8x16xf32>, vector<16x64xf32>, vector<8x64xf32> -> vector<8x64xf32>
    %216 = arith.addf %195, %215 : vector<8x64xf32>
    %217 = vector.extract_strided_slice %152 {offsets = [0, 48], sizes = [8, 16], strides = [1, 1]} : vector<8x64xf32> to vector<8x16xf32>
    %218 = vector.extract_strided_slice %153 {offsets = [0, 48], sizes = [8, 16], strides = [1, 1]} : vector<8x64xf32> to vector<8x16xf32>
    %cst_76 = arith.constant dense<0.000000e+00> : vector<8x8xf32>
    %219 = tpu.matmul %217, %218, %cst_76 {dimension_numbers = #tpu.dot_dimension_numbers<[1], [1], [0], [0], [0, 0, 1, 0], [], []>} : vector<8x16xf32>, vector<8x16xf32>, vector<8x8xf32> -> vector<8x8xf32>
    %220 = vector.extract_strided_slice %2 {offsets = [3, 0, 0], sizes = [1, 8, 8], strides = [1, 1, 1]} : vector<4x8x8xf32> to vector<1x8x8xf32>
    %221 = vector.shape_cast %220 : vector<1x8x8xf32> to vector<8x8xf32>
    %222 = arith.addf %219, %221 : vector<8x8xf32>
    %cst_77 = arith.constant dense<0xFF800000> : vector<8xf32>
    %223 = vector.multi_reduction <maximumf>, %222, %cst_77 [1] : vector<8x8xf32> to vector<8xf32>
    %224 = vector.shape_cast %223 : vector<8xf32> to vector<8x1xf32>
    %225 = vector.broadcast %224 : vector<8x1xf32> to vector<8x8xf32>
    %226 = arith.subf %222, %225 : vector<8x8xf32>
    %227 = math.exp %226 : vector<8x8xf32>
    %cst_78 = arith.constant dense<0.000000e+00> : vector<8xf32>
    %228 = vector.multi_reduction <add>, %227, %cst_78 [1] : vector<8x8xf32> to vector<8xf32>
    %229 = vector.shape_cast %228 : vector<8xf32> to vector<8x1xf32>
    %230 = tpu.reciprocal %229 {approx = true} : vector<8x1xf32> -> vector<8x1xf32>
    %231 = vector.broadcast %230 : vector<8x1xf32> to vector<8x8xf32>
    %232 = arith.mulf %227, %231 : vector<8x8xf32>
    %233 = vector.extract_strided_slice %154 {offsets = [0, 48], sizes = [8, 16], strides = [1, 1]} : vector<8x64xf32> to vector<8x16xf32>
    %cst_79 = arith.constant dense<0.000000e+00> : vector<8x16xf32>
    %234 = tpu.matmul %232, %233, %cst_79 {dimension_numbers = #tpu.dot_dimension_numbers<[1], [0], [0], [1], [0, 0, 1, 1], [], []>} : vector<8x8xf32>, vector<8x16xf32>, vector<8x16xf32> -> vector<8x16xf32>
    %235 = vector.extract_strided_slice %150 {offsets = [48, 0], sizes = [16, 64], strides = [1, 1]} : vector<64x64xf32> to vector<16x64xf32>
    %cst_80 = arith.constant dense<0.000000e+00> : vector<8x64xf32>
    %236 = tpu.matmul %234, %235, %cst_80 {dimension_numbers = #tpu.dot_dimension_numbers<[1], [0], [0], [1], [0, 0, 1, 1], [], []>} : vector<8x16xf32>, vector<16x64xf32>, vector<8x64xf32> -> vector<8x64xf32>
    %237 = arith.addf %216, %236 : vector<8x64xf32>
    %238 = arith.addf %131, %237 : vector<8x64xf32>
    %239 = vector.extract_strided_slice %133 {offsets = [1, 0], sizes = [1, 64], strides = [1, 1]} : vector<2x64xf32> to vector<1x64xf32>
    %240 = arith.mulf %238, %238 : vector<8x64xf32>
    %cst_81 = arith.constant dense<0.000000e+00> : vector<8xf32>
    %241 = vector.multi_reduction <add>, %240, %cst_81 [1] : vector<8x64xf32> to vector<8xf32>
    %242 = vector.shape_cast %241 : vector<8xf32> to vector<8x1xf32>
    %cst_82 = arith.constant 6.400000e+01 : f32
    %243 = vector.broadcast %cst_82 : f32 to vector<8x1xf32>
    %244 = arith.divf %242, %243 : vector<8x1xf32>
    %cst_83 = arith.constant 9.99999997E-7 : f32
    %245 = vector.broadcast %cst_83 : f32 to vector<8x1xf32>
    %246 = arith.addf %244, %245 : vector<8x1xf32>
    %247 = math.rsqrt %246 : vector<8x1xf32>
    %248 = vector.broadcast %247 : vector<8x1xf32> to vector<8x64xf32>
    %249 = arith.mulf %238, %248 : vector<8x64xf32>
    %250 = vector.broadcast %239 : vector<1x64xf32> to vector<8x64xf32>
    %251 = arith.mulf %249, %250 : vector<8x64xf32>
    %c1_84 = arith.constant 1 : index
    %c0_85 = arith.constant 0 : index
    %c0_86 = arith.constant 0 : index
    %252 = vector.load %arg6[%c1_84, %c0_85, %c0_86] : memref<2x64x128xf32, #tpu.memory_space<vmem>>, vector<1x64x128xf32>
    %253 = vector.shape_cast %252 : vector<1x64x128xf32> to vector<64x128xf32>
    %cst_87 = arith.constant dense<0.000000e+00> : vector<8x128xf32>
    %254 = tpu.matmul %251, %253, %cst_87 {dimension_numbers = #tpu.dot_dimension_numbers<[1], [0], [0], [1], [0, 0, 1, 1], [], []>} : vector<8x64xf32>, vector<64x128xf32>, vector<8x128xf32> -> vector<8x128xf32>
    %cst_88 = arith.constant 0.000000e+00 : f32
    %255 = vector.broadcast %cst_88 : f32 to vector<8x128xf32>
    %256 = arith.maximumf %254, %255 : vector<8x128xf32>
    %c1_89 = arith.constant 1 : index
    %c0_90 = arith.constant 0 : index
    %c0_91 = arith.constant 0 : index
    %257 = vector.load %arg7[%c1_89, %c0_90, %c0_91] : memref<2x128x64xf32, #tpu.memory_space<vmem>>, vector<1x128x64xf32>
    %258 = vector.shape_cast %257 : vector<1x128x64xf32> to vector<128x64xf32>
    %cst_92 = arith.constant dense<0.000000e+00> : vector<8x64xf32>
    %259 = tpu.matmul %256, %258, %cst_92 {dimension_numbers = #tpu.dot_dimension_numbers<[1], [0], [0], [1], [0, 0, 1, 1], [], []>} : vector<8x128xf32>, vector<128x64xf32>, vector<8x64xf32> -> vector<8x64xf32>
    %260 = arith.addf %238, %259 : vector<8x64xf32>
    %c0_93 = arith.constant 0 : index
    %c0_94 = arith.constant 0 : index
    %261 = vector.load %arg8[%c0_93, %c0_94] : memref<1x64xf32, #tpu.memory_space<vmem>>, vector<1x64xf32>
    %262 = arith.mulf %260, %260 : vector<8x64xf32>
    %cst_95 = arith.constant dense<0.000000e+00> : vector<8xf32>
    %263 = vector.multi_reduction <add>, %262, %cst_95 [1] : vector<8x64xf32> to vector<8xf32>
    %264 = vector.shape_cast %263 : vector<8xf32> to vector<8x1xf32>
    %cst_96 = arith.constant 6.400000e+01 : f32
    %265 = vector.broadcast %cst_96 : f32 to vector<8x1xf32>
    %266 = arith.divf %264, %265 : vector<8x1xf32>
    %cst_97 = arith.constant 9.99999997E-7 : f32
    %267 = vector.broadcast %cst_97 : f32 to vector<8x1xf32>
    %268 = arith.addf %266, %267 : vector<8x1xf32>
    %269 = math.rsqrt %268 : vector<8x1xf32>
    %270 = vector.broadcast %269 : vector<8x1xf32> to vector<8x64xf32>
    %271 = arith.mulf %260, %270 : vector<8x64xf32>
    %272 = vector.broadcast %261 : vector<1x64xf32> to vector<8x64xf32>
    %273 = arith.mulf %271, %272 : vector<8x64xf32>
    %c0_98 = arith.constant 0 : index
    %c0_99 = arith.constant 0 : index
    %c0_100 = arith.constant 0 : index
    %274 = vector.load %arg9[%c0_98, %c0_99, %c0_100] : memref<1x8x64xf32, #tpu.memory_space<vmem>>, vector<1x8x64xf32>
    %275 = vector.shape_cast %274 : vector<1x8x64xf32> to vector<8x64xf32>
    %276 = vector.shape_cast %273 : vector<8x64xf32> to vector<1x8x64xf32>
    tpu.vector_store %arg9[%c0_98, %c0_99, %c0_100], %276 {strides = array<i32>} : memref<1x8x64xf32, #tpu.memory_space<vmem>>, vector<1x8x64xf32>,
    return
  }
  func.func @transform_0(%arg0: i32) -> (i32, i32, i32) {
    %c0_i32 = arith.constant 0 : i32
    %c0_i32_0 = arith.constant 0 : i32
    %c0_i32_1 = arith.constant 0 : i32
    return %arg0, %c0_i32, %c0_i32_0 : i32, i32, i32
  }
  func.func @transform_1(%arg0: i32) -> (i32, i32, i32) {
    %c0_i32 = arith.constant 0 : i32
    %c0_i32_0 = arith.constant 0 : i32
    %c0_i32_1 = arith.constant 0 : i32
    %c0_i32_2 = arith.constant 0 : i32
    return %c0_i32, %c0_i32_0, %c0_i32_1 : i32, i32, i32
  }
  func.func @transform_2(%arg0: i32) -> (i32, i32, i32) {
    %c0_i32 = arith.constant 0 : i32
    %c0_i32_0 = arith.constant 0 : i32
    %c0_i32_1 = arith.constant 0 : i32
    %c0_i32_2 = arith.constant 0 : i32
    return %c0_i32, %c0_i32_0, %c0_i32_1 : i32, i32, i32
  }
  func.func @transform_3(%arg0: i32) -> (i32, i32, i32) {
    %c0_i32 = arith.constant 0 : i32
    %c0_i32_0 = arith.constant 0 : i32
    %c0_i32_1 = arith.constant 0 : i32
    %c0_i32_2 = arith.constant 0 : i32
    return %c0_i32, %c0_i32_0, %c0_i32_1 : i32, i32, i32
  }
  func.func @transform_4(%arg0: i32) -> (i32, i32, i32) {
    %c0_i32 = arith.constant 0 : i32
    %c0_i32_0 = arith.constant 0 : i32
    %c0_i32_1 = arith.constant 0 : i32
    %c0_i32_2 = arith.constant 0 : i32
    return %c0_i32, %c0_i32_0, %c0_i32_1 : i32, i32, i32
  }
  func.func @transform_5(%arg0: i32) -> (i32, i32, i32) {
    %c0_i32 = arith.constant 0 : i32
    %c0_i32_0 = arith.constant 0 : i32
    %c0_i32_1 = arith.constant 0 : i32
    %c0_i32_2 = arith.constant 0 : i32
    return %c0_i32, %c0_i32_0, %c0_i32_1 : i32, i32, i32
  }
  func.func @transform_6(%arg0: i32) -> (i32, i32, i32) {
    %c0_i32 = arith.constant 0 : i32
    %c0_i32_0 = arith.constant 0 : i32
    %c0_i32_1 = arith.constant 0 : i32
    %c0_i32_2 = arith.constant 0 : i32
    return %c0_i32, %c0_i32_0, %c0_i32_1 : i32, i32, i32
  }
  func.func @transform_7(%arg0: i32) -> (i32, i32) {
    %c0_i32 = arith.constant 0 : i32
    %c0_i32_0 = arith.constant 0 : i32
    %c0_i32_1 = arith.constant 0 : i32
    return %c0_i32, %c0_i32_0 : i32, i32
  }
  func.func @transform_8(%arg0: i32) -> (i32, i32, i32) {
    %c0_i32 = arith.constant 0 : i32
    %c0_i32_0 = arith.constant 0 : i32
    %c0_i32_1 = arith.constant 0 : i32
    return %arg0, %c0_i32, %c0_i32_0 : i32, i32, i32
  }
}

module attributes {stable_mosaic.version = 11 : i64} {
  func.func @_decoder_loss_kernel(%arg0: i32, %arg1: memref<1x8x64xf32, #tpu.memory_space<vmem>>, %arg2: memref<1x8x64xf32, #tpu.memory_space<vmem>>, %arg3: memref<1x8x8xf32, #tpu.memory_space<vmem>>, %arg4: memref<1x8x128xf32, #tpu.memory_space<vmem>>, %arg5: memref<4x8x8xf32, #tpu.memory_space<vmem>>, %arg6: memref<2x3x64xf32, #tpu.memory_space<vmem>>, %arg7: memref<2x64x192xf32, #tpu.memory_space<vmem>>, %arg8: memref<2x64x64xf32, #tpu.memory_space<vmem>>, %arg9: memref<2x64x192xf32, #tpu.memory_space<vmem>>, %arg10: memref<2x64x64xf32, #tpu.memory_space<vmem>>, %arg11: memref<2x64x128xf32, #tpu.memory_space<vmem>>, %arg12: memref<2x128x64xf32, #tpu.memory_space<vmem>>, %arg13: memref<1x64xf32, #tpu.memory_space<vmem>>, %arg14: memref<128x64xf32, #tpu.memory_space<vmem>>, %arg15: memref<1x1xf32, #tpu.memory_space<vmem>>, %arg16: memref<1x1xf32, #tpu.memory_space<vmem>>, %arg17: memref<1x1xf32, #tpu.memory_space<vmem>>) attributes {dimension_semantics = [#tpu.dimension_semantics<arbitrary>], iteration_bounds = array<i64: 2>, scalar_prefetch = 0 : i64, scratch_operands = 2 : i64, tpu.core_type = #tpu.core_type<tc>, window_params = [{transform_indices = @transform_0, window_bounds = array<i64: 1, 8, 64>}, {transform_indices = @transform_1, window_bounds = array<i64: 1, 8, 64>}, {transform_indices = @transform_2, window_bounds = array<i64: 1, 8, 8>}, {transform_indices = @transform_3, window_bounds = array<i64: 1, 8, 128>}, {pipeline_mode = #tpu.pipeline_mode<synchronous>, transform_indices = @transform_4, window_bounds = array<i64: 4, 8, 8>}, {pipeline_mode = #tpu.pipeline_mode<synchronous>, transform_indices = @transform_5, window_bounds = array<i64: 2, 3, 64>}, {pipeline_mode = #tpu.pipeline_mode<synchronous>, transform_indices = @transform_6, window_bounds = array<i64: 2, 64, 192>}, {pipeline_mode = #tpu.pipeline_mode<synchronous>, transform_indices = @transform_7, window_bounds = array<i64: 2, 64, 64>}, {pipeline_mode = #tpu.pipeline_mode<synchronous>, transform_indices = @transform_8, window_bounds = array<i64: 2, 64, 192>}, {pipeline_mode = #tpu.pipeline_mode<synchronous>, transform_indices = @transform_9, window_bounds = array<i64: 2, 64, 64>}, {pipeline_mode = #tpu.pipeline_mode<synchronous>, transform_indices = @transform_10, window_bounds = array<i64: 2, 64, 128>}, {pipeline_mode = #tpu.pipeline_mode<synchronous>, transform_indices = @transform_11, window_bounds = array<i64: 2, 128, 64>}, {pipeline_mode = #tpu.pipeline_mode<synchronous>, transform_indices = @transform_12, window_bounds = array<i64: 1, 64>}, {pipeline_mode = #tpu.pipeline_mode<synchronous>, transform_indices = @transform_13, window_bounds = array<i64: 128, 64>}, {pipeline_mode = #tpu.pipeline_mode<synchronous>, transform_indices = @transform_14, window_bounds = array<i64: 1, 1>}]} {
    %c0_i32 = arith.constant 0 : i32
    %0 = arith.cmpi eq, %arg0, %c0_i32 : i32
    %1 = arith.extui %0 : i1 to i32
    %c0_i32_0 = arith.constant 0 : i32
    %2 = arith.cmpi ne, %1, %c0_i32_0 : i32
    scf.if %2 {
      %cst_195 = arith.constant 0.000000e+00 : f32
      %517 = vector.broadcast %cst_195 : f32 to vector<1x1xf32>
      %c0_196 = arith.constant 0 : index
      %c0_197 = arith.constant 0 : index
      %518 = vector.load %arg16[%c0_196, %c0_197] : memref<1x1xf32, #tpu.memory_space<vmem>>, vector<1x1xf32>
      tpu.vector_store %arg16[%c0_196, %c0_197], %517 {strides = array<i32>} : memref<1x1xf32, #tpu.memory_space<vmem>>, vector<1x1xf32>,
      %cst_198 = arith.constant 0.000000e+00 : f32
      %519 = vector.broadcast %cst_198 : f32 to vector<1x1xf32>
      %c0_199 = arith.constant 0 : index
      %c0_200 = arith.constant 0 : index
      %520 = vector.load %arg17[%c0_199, %c0_200] : memref<1x1xf32, #tpu.memory_space<vmem>>, vector<1x1xf32>
      tpu.vector_store %arg17[%c0_199, %c0_200], %519 {strides = array<i32>} : memref<1x1xf32, #tpu.memory_space<vmem>>, vector<1x1xf32>,
    } else {
    }
    %c0 = arith.constant 0 : index
    %c0_1 = arith.constant 0 : index
    %c0_2 = arith.constant 0 : index
    %3 = vector.load %arg1[%c0, %c0_1, %c0_2] : memref<1x8x64xf32, #tpu.memory_space<vmem>>, vector<1x8x64xf32>
    %4 = vector.shape_cast %3 : vector<1x8x64xf32> to vector<8x64xf32>
    %c0_3 = arith.constant 0 : index
    %c0_4 = arith.constant 0 : index
    %c0_5 = arith.constant 0 : index
    %5 = vector.load %arg2[%c0_3, %c0_4, %c0_5] : memref<1x8x64xf32, #tpu.memory_space<vmem>>, vector<1x8x64xf32>
    %6 = vector.shape_cast %5 : vector<1x8x64xf32> to vector<8x64xf32>
    %c0_6 = arith.constant 0 : index
    %c0_7 = arith.constant 0 : index
    %c0_8 = arith.constant 0 : index
    %7 = vector.load %arg3[%c0_6, %c0_7, %c0_8] : memref<1x8x8xf32, #tpu.memory_space<vmem>>, vector<1x8x8xf32>
    %8 = vector.shape_cast %7 : vector<1x8x8xf32> to vector<8x8xf32>
    %c0_9 = arith.constant 0 : index
    %c0_10 = arith.constant 0 : index
    %c0_11 = arith.constant 0 : index
    %9 = vector.load %arg5[%c0_9, %c0_10, %c0_11] : memref<4x8x8xf32, #tpu.memory_space<vmem>>, vector<4x8x8xf32>
    %c0_12 = arith.constant 0 : index
    %c0_13 = arith.constant 0 : index
    %10 = vector.load %arg14[%c0_12, %c0_13] : memref<128x64xf32, #tpu.memory_space<vmem>>, vector<128x64xf32>
    %c0_14 = arith.constant 0 : index
    %c0_15 = arith.constant 0 : index
    %c0_16 = arith.constant 0 : index
    %11 = vector.load %arg6[%c0_14, %c0_15, %c0_16] : memref<2x3x64xf32, #tpu.memory_space<vmem>>, vector<1x3x64xf32>
    %12 = vector.shape_cast %11 : vector<1x3x64xf32> to vector<3x64xf32>
    %13 = vector.extract_strided_slice %12 {offsets = [0, 0], sizes = [1, 64], strides = [1, 1]} : vector<3x64xf32> to vector<1x64xf32>
    %14 = arith.mulf %4, %4 : vector<8x64xf32>
    %cst = arith.constant dense<0.000000e+00> : vector<8xf32>
    %15 = vector.multi_reduction <add>, %14, %cst [1] : vector<8x64xf32> to vector<8xf32>
    %16 = vector.shape_cast %15 : vector<8xf32> to vector<8x1xf32>
    %cst_17 = arith.constant 6.400000e+01 : f32
    %17 = vector.broadcast %cst_17 : f32 to vector<8x1xf32>
    %18 = arith.divf %16, %17 : vector<8x1xf32>
    %cst_18 = arith.constant 9.99999997E-7 : f32
    %19 = vector.broadcast %cst_18 : f32 to vector<8x1xf32>
    %20 = arith.addf %18, %19 : vector<8x1xf32>
    %21 = math.rsqrt %20 : vector<8x1xf32>
    %22 = vector.broadcast %21 : vector<8x1xf32> to vector<8x64xf32>
    %23 = arith.mulf %4, %22 : vector<8x64xf32>
    %24 = vector.broadcast %13 : vector<1x64xf32> to vector<8x64xf32>
    %25 = arith.mulf %23, %24 : vector<8x64xf32>
    %c0_19 = arith.constant 0 : index
    %c0_20 = arith.constant 0 : index
    %c0_21 = arith.constant 0 : index
    %26 = vector.load %arg7[%c0_19, %c0_20, %c0_21] : memref<2x64x192xf32, #tpu.memory_space<vmem>>, vector<1x64x192xf32>
    %27 = vector.shape_cast %26 : vector<1x64x192xf32> to vector<64x192xf32>
    %c0_22 = arith.constant 0 : index
    %c0_23 = arith.constant 0 : index
    %c0_24 = arith.constant 0 : index
    %28 = vector.load %arg8[%c0_22, %c0_23, %c0_24] : memref<2x64x64xf32, #tpu.memory_space<vmem>>, vector<1x64x64xf32>
    %29 = vector.shape_cast %28 : vector<1x64x64xf32> to vector<64x64xf32>
    %cst_25 = arith.constant dense<0.000000e+00> : vector<8x192xf32>
    %30 = tpu.matmul %25, %27, %cst_25 {dimension_numbers = #tpu.dot_dimension_numbers<[1], [0], [0], [1], [0, 0, 1, 1], [], []>} : vector<8x64xf32>, vector<64x192xf32>, vector<8x192xf32> -> vector<8x192xf32>
    %31 = vector.extract_strided_slice %30 {offsets = [0, 0], sizes = [8, 64], strides = [1, 1]} : vector<8x192xf32> to vector<8x64xf32>
    %32 = vector.extract_strided_slice %30 {offsets = [0, 64], sizes = [8, 64], strides = [1, 1]} : vector<8x192xf32> to vector<8x64xf32>
    %33 = vector.extract_strided_slice %30 {offsets = [0, 128], sizes = [8, 64], strides = [1, 1]} : vector<8x192xf32> to vector<8x64xf32>
    %34 = vector.extract_strided_slice %31 {offsets = [0, 0], sizes = [8, 16], strides = [1, 1]} : vector<8x64xf32> to vector<8x16xf32>
    %35 = vector.extract_strided_slice %32 {offsets = [0, 0], sizes = [8, 16], strides = [1, 1]} : vector<8x64xf32> to vector<8x16xf32>
    %cst_26 = arith.constant dense<0.000000e+00> : vector<8x8xf32>
    %36 = tpu.matmul %34, %35, %cst_26 {dimension_numbers = #tpu.dot_dimension_numbers<[1], [1], [0], [0], [0, 0, 1, 0], [], []>} : vector<8x16xf32>, vector<8x16xf32>, vector<8x8xf32> -> vector<8x8xf32>
    %37 = vector.extract_strided_slice %9 {offsets = [0, 0, 0], sizes = [1, 8, 8], strides = [1, 1, 1]} : vector<4x8x8xf32> to vector<1x8x8xf32>
    %38 = vector.shape_cast %37 : vector<1x8x8xf32> to vector<8x8xf32>
    %39 = arith.addf %36, %38 : vector<8x8xf32>
    %40 = arith.addf %39, %8 : vector<8x8xf32>
    %cst_27 = arith.constant dense<0xFF800000> : vector<8xf32>
    %41 = vector.multi_reduction <maximumf>, %40, %cst_27 [1] : vector<8x8xf32> to vector<8xf32>
    %42 = vector.shape_cast %41 : vector<8xf32> to vector<8x1xf32>
    %43 = vector.broadcast %42 : vector<8x1xf32> to vector<8x8xf32>
    %44 = arith.subf %40, %43 : vector<8x8xf32>
    %45 = math.exp %44 : vector<8x8xf32>
    %cst_28 = arith.constant dense<0.000000e+00> : vector<8xf32>
    %46 = vector.multi_reduction <add>, %45, %cst_28 [1] : vector<8x8xf32> to vector<8xf32>
    %47 = vector.shape_cast %46 : vector<8xf32> to vector<8x1xf32>
    %48 = tpu.reciprocal %47 {approx = true} : vector<8x1xf32> -> vector<8x1xf32>
    %49 = vector.broadcast %48 : vector<8x1xf32> to vector<8x8xf32>
    %50 = arith.mulf %45, %49 : vector<8x8xf32>
    %51 = vector.extract_strided_slice %33 {offsets = [0, 0], sizes = [8, 16], strides = [1, 1]} : vector<8x64xf32> to vector<8x16xf32>
    %cst_29 = arith.constant dense<0.000000e+00> : vector<8x16xf32>
    %52 = tpu.matmul %50, %51, %cst_29 {dimension_numbers = #tpu.dot_dimension_numbers<[1], [0], [0], [1], [0, 0, 1, 1], [], []>} : vector<8x8xf32>, vector<8x16xf32>, vector<8x16xf32> -> vector<8x16xf32>
    %53 = vector.extract_strided_slice %29 {offsets = [0, 0], sizes = [16, 64], strides = [1, 1]} : vector<64x64xf32> to vector<16x64xf32>
    %cst_30 = arith.constant dense<0.000000e+00> : vector<8x64xf32>
    %54 = tpu.matmul %52, %53, %cst_30 {dimension_numbers = #tpu.dot_dimension_numbers<[1], [0], [0], [1], [0, 0, 1, 1], [], []>} : vector<8x16xf32>, vector<16x64xf32>, vector<8x64xf32> -> vector<8x64xf32>
    %55 = vector.extract_strided_slice %31 {offsets = [0, 16], sizes = [8, 16], strides = [1, 1]} : vector<8x64xf32> to vector<8x16xf32>
    %56 = vector.extract_strided_slice %32 {offsets = [0, 16], sizes = [8, 16], strides = [1, 1]} : vector<8x64xf32> to vector<8x16xf32>
    %cst_31 = arith.constant dense<0.000000e+00> : vector<8x8xf32>
    %57 = tpu.matmul %55, %56, %cst_31 {dimension_numbers = #tpu.dot_dimension_numbers<[1], [1], [0], [0], [0, 0, 1, 0], [], []>} : vector<8x16xf32>, vector<8x16xf32>, vector<8x8xf32> -> vector<8x8xf32>
    %58 = vector.extract_strided_slice %9 {offsets = [1, 0, 0], sizes = [1, 8, 8], strides = [1, 1, 1]} : vector<4x8x8xf32> to vector<1x8x8xf32>
    %59 = vector.shape_cast %58 : vector<1x8x8xf32> to vector<8x8xf32>
    %60 = arith.addf %57, %59 : vector<8x8xf32>
    %61 = arith.addf %60, %8 : vector<8x8xf32>
    %cst_32 = arith.constant dense<0xFF800000> : vector<8xf32>
    %62 = vector.multi_reduction <maximumf>, %61, %cst_32 [1] : vector<8x8xf32> to vector<8xf32>
    %63 = vector.shape_cast %62 : vector<8xf32> to vector<8x1xf32>
    %64 = vector.broadcast %63 : vector<8x1xf32> to vector<8x8xf32>
    %65 = arith.subf %61, %64 : vector<8x8xf32>
    %66 = math.exp %65 : vector<8x8xf32>
    %cst_33 = arith.constant dense<0.000000e+00> : vector<8xf32>
    %67 = vector.multi_reduction <add>, %66, %cst_33 [1] : vector<8x8xf32> to vector<8xf32>
    %68 = vector.shape_cast %67 : vector<8xf32> to vector<8x1xf32>
    %69 = tpu.reciprocal %68 {approx = true} : vector<8x1xf32> -> vector<8x1xf32>
    %70 = vector.broadcast %69 : vector<8x1xf32> to vector<8x8xf32>
    %71 = arith.mulf %66, %70 : vector<8x8xf32>
    %72 = vector.extract_strided_slice %33 {offsets = [0, 16], sizes = [8, 16], strides = [1, 1]} : vector<8x64xf32> to vector<8x16xf32>
    %cst_34 = arith.constant dense<0.000000e+00> : vector<8x16xf32>
    %73 = tpu.matmul %71, %72, %cst_34 {dimension_numbers = #tpu.dot_dimension_numbers<[1], [0], [0], [1], [0, 0, 1, 1], [], []>} : vector<8x8xf32>, vector<8x16xf32>, vector<8x16xf32> -> vector<8x16xf32>
    %74 = vector.extract_strided_slice %29 {offsets = [16, 0], sizes = [16, 64], strides = [1, 1]} : vector<64x64xf32> to vector<16x64xf32>
    %cst_35 = arith.constant dense<0.000000e+00> : vector<8x64xf32>
    %75 = tpu.matmul %73, %74, %cst_35 {dimension_numbers = #tpu.dot_dimension_numbers<[1], [0], [0], [1], [0, 0, 1, 1], [], []>} : vector<8x16xf32>, vector<16x64xf32>, vector<8x64xf32> -> vector<8x64xf32>
    %76 = arith.addf %54, %75 : vector<8x64xf32>
    %77 = vector.extract_strided_slice %31 {offsets = [0, 32], sizes = [8, 16], strides = [1, 1]} : vector<8x64xf32> to vector<8x16xf32>
    %78 = vector.extract_strided_slice %32 {offsets = [0, 32], sizes = [8, 16], strides = [1, 1]} : vector<8x64xf32> to vector<8x16xf32>
    %cst_36 = arith.constant dense<0.000000e+00> : vector<8x8xf32>
    %79 = tpu.matmul %77, %78, %cst_36 {dimension_numbers = #tpu.dot_dimension_numbers<[1], [1], [0], [0], [0, 0, 1, 0], [], []>} : vector<8x16xf32>, vector<8x16xf32>, vector<8x8xf32> -> vector<8x8xf32>
    %80 = vector.extract_strided_slice %9 {offsets = [2, 0, 0], sizes = [1, 8, 8], strides = [1, 1, 1]} : vector<4x8x8xf32> to vector<1x8x8xf32>
    %81 = vector.shape_cast %80 : vector<1x8x8xf32> to vector<8x8xf32>
    %82 = arith.addf %79, %81 : vector<8x8xf32>
    %83 = arith.addf %82, %8 : vector<8x8xf32>
    %cst_37 = arith.constant dense<0xFF800000> : vector<8xf32>
    %84 = vector.multi_reduction <maximumf>, %83, %cst_37 [1] : vector<8x8xf32> to vector<8xf32>
    %85 = vector.shape_cast %84 : vector<8xf32> to vector<8x1xf32>
    %86 = vector.broadcast %85 : vector<8x1xf32> to vector<8x8xf32>
    %87 = arith.subf %83, %86 : vector<8x8xf32>
    %88 = math.exp %87 : vector<8x8xf32>
    %cst_38 = arith.constant dense<0.000000e+00> : vector<8xf32>
    %89 = vector.multi_reduction <add>, %88, %cst_38 [1] : vector<8x8xf32> to vector<8xf32>
    %90 = vector.shape_cast %89 : vector<8xf32> to vector<8x1xf32>
    %91 = tpu.reciprocal %90 {approx = true} : vector<8x1xf32> -> vector<8x1xf32>
    %92 = vector.broadcast %91 : vector<8x1xf32> to vector<8x8xf32>
    %93 = arith.mulf %88, %92 : vector<8x8xf32>
    %94 = vector.extract_strided_slice %33 {offsets = [0, 32], sizes = [8, 16], strides = [1, 1]} : vector<8x64xf32> to vector<8x16xf32>
    %cst_39 = arith.constant dense<0.000000e+00> : vector<8x16xf32>
    %95 = tpu.matmul %93, %94, %cst_39 {dimension_numbers = #tpu.dot_dimension_numbers<[1], [0], [0], [1], [0, 0, 1, 1], [], []>} : vector<8x8xf32>, vector<8x16xf32>, vector<8x16xf32> -> vector<8x16xf32>
    %96 = vector.extract_strided_slice %29 {offsets = [32, 0], sizes = [16, 64], strides = [1, 1]} : vector<64x64xf32> to vector<16x64xf32>
    %cst_40 = arith.constant dense<0.000000e+00> : vector<8x64xf32>
    %97 = tpu.matmul %95, %96, %cst_40 {dimension_numbers = #tpu.dot_dimension_numbers<[1], [0], [0], [1], [0, 0, 1, 1], [], []>} : vector<8x16xf32>, vector<16x64xf32>, vector<8x64xf32> -> vector<8x64xf32>
    %98 = arith.addf %76, %97 : vector<8x64xf32>
    %99 = vector.extract_strided_slice %31 {offsets = [0, 48], sizes = [8, 16], strides = [1, 1]} : vector<8x64xf32> to vector<8x16xf32>
    %100 = vector.extract_strided_slice %32 {offsets = [0, 48], sizes = [8, 16], strides = [1, 1]} : vector<8x64xf32> to vector<8x16xf32>
    %cst_41 = arith.constant dense<0.000000e+00> : vector<8x8xf32>
    %101 = tpu.matmul %99, %100, %cst_41 {dimension_numbers = #tpu.dot_dimension_numbers<[1], [1], [0], [0], [0, 0, 1, 0], [], []>} : vector<8x16xf32>, vector<8x16xf32>, vector<8x8xf32> -> vector<8x8xf32>
    %102 = vector.extract_strided_slice %9 {offsets = [3, 0, 0], sizes = [1, 8, 8], strides = [1, 1, 1]} : vector<4x8x8xf32> to vector<1x8x8xf32>
    %103 = vector.shape_cast %102 : vector<1x8x8xf32> to vector<8x8xf32>
    %104 = arith.addf %101, %103 : vector<8x8xf32>
    %105 = arith.addf %104, %8 : vector<8x8xf32>
    %cst_42 = arith.constant dense<0xFF800000> : vector<8xf32>
    %106 = vector.multi_reduction <maximumf>, %105, %cst_42 [1] : vector<8x8xf32> to vector<8xf32>
    %107 = vector.shape_cast %106 : vector<8xf32> to vector<8x1xf32>
    %108 = vector.broadcast %107 : vector<8x1xf32> to vector<8x8xf32>
    %109 = arith.subf %105, %108 : vector<8x8xf32>
    %110 = math.exp %109 : vector<8x8xf32>
    %cst_43 = arith.constant dense<0.000000e+00> : vector<8xf32>
    %111 = vector.multi_reduction <add>, %110, %cst_43 [1] : vector<8x8xf32> to vector<8xf32>
    %112 = vector.shape_cast %111 : vector<8xf32> to vector<8x1xf32>
    %113 = tpu.reciprocal %112 {approx = true} : vector<8x1xf32> -> vector<8x1xf32>
    %114 = vector.broadcast %113 : vector<8x1xf32> to vector<8x8xf32>
    %115 = arith.mulf %110, %114 : vector<8x8xf32>
    %116 = vector.extract_strided_slice %33 {offsets = [0, 48], sizes = [8, 16], strides = [1, 1]} : vector<8x64xf32> to vector<8x16xf32>
    %cst_44 = arith.constant dense<0.000000e+00> : vector<8x16xf32>
    %117 = tpu.matmul %115, %116, %cst_44 {dimension_numbers = #tpu.dot_dimension_numbers<[1], [0], [0], [1], [0, 0, 1, 1], [], []>} : vector<8x8xf32>, vector<8x16xf32>, vector<8x16xf32> -> vector<8x16xf32>
    %118 = vector.extract_strided_slice %29 {offsets = [48, 0], sizes = [16, 64], strides = [1, 1]} : vector<64x64xf32> to vector<16x64xf32>
    %cst_45 = arith.constant dense<0.000000e+00> : vector<8x64xf32>
    %119 = tpu.matmul %117, %118, %cst_45 {dimension_numbers = #tpu.dot_dimension_numbers<[1], [0], [0], [1], [0, 0, 1, 1], [], []>} : vector<8x16xf32>, vector<16x64xf32>, vector<8x64xf32> -> vector<8x64xf32>
    %120 = arith.addf %98, %119 : vector<8x64xf32>
    %121 = arith.addf %4, %120 : vector<8x64xf32>
    %122 = vector.extract_strided_slice %12 {offsets = [1, 0], sizes = [1, 64], strides = [1, 1]} : vector<3x64xf32> to vector<1x64xf32>
    %123 = arith.mulf %121, %121 : vector<8x64xf32>
    %cst_46 = arith.constant dense<0.000000e+00> : vector<8xf32>
    %124 = vector.multi_reduction <add>, %123, %cst_46 [1] : vector<8x64xf32> to vector<8xf32>
    %125 = vector.shape_cast %124 : vector<8xf32> to vector<8x1xf32>
    %cst_47 = arith.constant 6.400000e+01 : f32
    %126 = vector.broadcast %cst_47 : f32 to vector<8x1xf32>
    %127 = arith.divf %125, %126 : vector<8x1xf32>
    %cst_48 = arith.constant 9.99999997E-7 : f32
    %128 = vector.broadcast %cst_48 : f32 to vector<8x1xf32>
    %129 = arith.addf %127, %128 : vector<8x1xf32>
    %130 = math.rsqrt %129 : vector<8x1xf32>
    %131 = vector.broadcast %130 : vector<8x1xf32> to vector<8x64xf32>
    %132 = arith.mulf %121, %131 : vector<8x64xf32>
    %133 = vector.broadcast %122 : vector<1x64xf32> to vector<8x64xf32>
    %134 = arith.mulf %132, %133 : vector<8x64xf32>
    %c0_49 = arith.constant 0 : index
    %c0_50 = arith.constant 0 : index
    %c0_51 = arith.constant 0 : index
    %135 = vector.load %arg9[%c0_49, %c0_50, %c0_51] : memref<2x64x192xf32, #tpu.memory_space<vmem>>, vector<1x64x192xf32>
    %136 = vector.shape_cast %135 : vector<1x64x192xf32> to vector<64x192xf32>
    %c0_52 = arith.constant 0 : index
    %c0_53 = arith.constant 0 : index
    %c0_54 = arith.constant 0 : index
    %137 = vector.load %arg10[%c0_52, %c0_53, %c0_54] : memref<2x64x64xf32, #tpu.memory_space<vmem>>, vector<1x64x64xf32>
    %138 = vector.shape_cast %137 : vector<1x64x64xf32> to vector<64x64xf32>
    %139 = vector.extract_strided_slice %136 {offsets = [0, 0], sizes = [64, 64], strides = [1, 1]} : vector<64x192xf32> to vector<64x64xf32>
    %cst_55 = arith.constant dense<0.000000e+00> : vector<8x64xf32>
    %140 = tpu.matmul %134, %139, %cst_55 {dimension_numbers = #tpu.dot_dimension_numbers<[1], [0], [0], [1], [0, 0, 1, 1], [], []>} : vector<8x64xf32>, vector<64x64xf32>, vector<8x64xf32> -> vector<8x64xf32>
    %141 = vector.extract_strided_slice %136 {offsets = [0, 64], sizes = [64, 128], strides = [1, 1]} : vector<64x192xf32> to vector<64x128xf32>
    %cst_56 = arith.constant dense<0.000000e+00> : vector<8x128xf32>
    %142 = tpu.matmul %6, %141, %cst_56 {dimension_numbers = #tpu.dot_dimension_numbers<[1], [0], [0], [1], [0, 0, 1, 1], [], []>} : vector<8x64xf32>, vector<64x128xf32>, vector<8x128xf32> -> vector<8x128xf32>
    %143 = vector.extract_strided_slice %142 {offsets = [0, 0], sizes = [8, 64], strides = [1, 1]} : vector<8x128xf32> to vector<8x64xf32>
    %144 = vector.extract_strided_slice %142 {offsets = [0, 64], sizes = [8, 64], strides = [1, 1]} : vector<8x128xf32> to vector<8x64xf32>
    %145 = vector.extract_strided_slice %140 {offsets = [0, 0], sizes = [8, 16], strides = [1, 1]} : vector<8x64xf32> to vector<8x16xf32>
    %146 = vector.extract_strided_slice %143 {offsets = [0, 0], sizes = [8, 16], strides = [1, 1]} : vector<8x64xf32> to vector<8x16xf32>
    %cst_57 = arith.constant dense<0.000000e+00> : vector<8x8xf32>
    %147 = tpu.matmul %145, %146, %cst_57 {dimension_numbers = #tpu.dot_dimension_numbers<[1], [1], [0], [0], [0, 0, 1, 0], [], []>} : vector<8x16xf32>, vector<8x16xf32>, vector<8x8xf32> -> vector<8x8xf32>
    %cst_58 = arith.constant dense<0xFF800000> : vector<8xf32>
    %148 = vector.multi_reduction <maximumf>, %147, %cst_58 [1] : vector<8x8xf32> to vector<8xf32>
    %149 = vector.shape_cast %148 : vector<8xf32> to vector<8x1xf32>
    %150 = vector.broadcast %149 : vector<8x1xf32> to vector<8x8xf32>
    %151 = arith.subf %147, %150 : vector<8x8xf32>
    %152 = math.exp %151 : vector<8x8xf32>
    %cst_59 = arith.constant dense<0.000000e+00> : vector<8xf32>
    %153 = vector.multi_reduction <add>, %152, %cst_59 [1] : vector<8x8xf32> to vector<8xf32>
    %154 = vector.shape_cast %153 : vector<8xf32> to vector<8x1xf32>
    %155 = tpu.reciprocal %154 {approx = true} : vector<8x1xf32> -> vector<8x1xf32>
    %156 = vector.broadcast %155 : vector<8x1xf32> to vector<8x8xf32>
    %157 = arith.mulf %152, %156 : vector<8x8xf32>
    %158 = vector.extract_strided_slice %144 {offsets = [0, 0], sizes = [8, 16], strides = [1, 1]} : vector<8x64xf32> to vector<8x16xf32>
    %cst_60 = arith.constant dense<0.000000e+00> : vector<8x16xf32>
    %159 = tpu.matmul %157, %158, %cst_60 {dimension_numbers = #tpu.dot_dimension_numbers<[1], [0], [0], [1], [0, 0, 1, 1], [], []>} : vector<8x8xf32>, vector<8x16xf32>, vector<8x16xf32> -> vector<8x16xf32>
    %160 = vector.extract_strided_slice %138 {offsets = [0, 0], sizes = [16, 64], strides = [1, 1]} : vector<64x64xf32> to vector<16x64xf32>
    %cst_61 = arith.constant dense<0.000000e+00> : vector<8x64xf32>
    %161 = tpu.matmul %159, %160, %cst_61 {dimension_numbers = #tpu.dot_dimension_numbers<[1], [0], [0], [1], [0, 0, 1, 1], [], []>} : vector<8x16xf32>, vector<16x64xf32>, vector<8x64xf32> -> vector<8x64xf32>
    %162 = vector.extract_strided_slice %140 {offsets = [0, 16], sizes = [8, 16], strides = [1, 1]} : vector<8x64xf32> to vector<8x16xf32>
    %163 = vector.extract_strided_slice %143 {offsets = [0, 16], sizes = [8, 16], strides = [1, 1]} : vector<8x64xf32> to vector<8x16xf32>
    %cst_62 = arith.constant dense<0.000000e+00> : vector<8x8xf32>
    %164 = tpu.matmul %162, %163, %cst_62 {dimension_numbers = #tpu.dot_dimension_numbers<[1], [1], [0], [0], [0, 0, 1, 0], [], []>} : vector<8x16xf32>, vector<8x16xf32>, vector<8x8xf32> -> vector<8x8xf32>
    %cst_63 = arith.constant dense<0xFF800000> : vector<8xf32>
    %165 = vector.multi_reduction <maximumf>, %164, %cst_63 [1] : vector<8x8xf32> to vector<8xf32>
    %166 = vector.shape_cast %165 : vector<8xf32> to vector<8x1xf32>
    %167 = vector.broadcast %166 : vector<8x1xf32> to vector<8x8xf32>
    %168 = arith.subf %164, %167 : vector<8x8xf32>
    %169 = math.exp %168 : vector<8x8xf32>
    %cst_64 = arith.constant dense<0.000000e+00> : vector<8xf32>
    %170 = vector.multi_reduction <add>, %169, %cst_64 [1] : vector<8x8xf32> to vector<8xf32>
    %171 = vector.shape_cast %170 : vector<8xf32> to vector<8x1xf32>
    %172 = tpu.reciprocal %171 {approx = true} : vector<8x1xf32> -> vector<8x1xf32>
    %173 = vector.broadcast %172 : vector<8x1xf32> to vector<8x8xf32>
    %174 = arith.mulf %169, %173 : vector<8x8xf32>
    %175 = vector.extract_strided_slice %144 {offsets = [0, 16], sizes = [8, 16], strides = [1, 1]} : vector<8x64xf32> to vector<8x16xf32>
    %cst_65 = arith.constant dense<0.000000e+00> : vector<8x16xf32>
    %176 = tpu.matmul %174, %175, %cst_65 {dimension_numbers = #tpu.dot_dimension_numbers<[1], [0], [0], [1], [0, 0, 1, 1], [], []>} : vector<8x8xf32>, vector<8x16xf32>, vector<8x16xf32> -> vector<8x16xf32>
    %177 = vector.extract_strided_slice %138 {offsets = [16, 0], sizes = [16, 64], strides = [1, 1]} : vector<64x64xf32> to vector<16x64xf32>
    %cst_66 = arith.constant dense<0.000000e+00> : vector<8x64xf32>
    %178 = tpu.matmul %176, %177, %cst_66 {dimension_numbers = #tpu.dot_dimension_numbers<[1], [0], [0], [1], [0, 0, 1, 1], [], []>} : vector<8x16xf32>, vector<16x64xf32>, vector<8x64xf32> -> vector<8x64xf32>
    %179 = arith.addf %161, %178 : vector<8x64xf32>
    %180 = vector.extract_strided_slice %140 {offsets = [0, 32], sizes = [8, 16], strides = [1, 1]} : vector<8x64xf32> to vector<8x16xf32>
    %181 = vector.extract_strided_slice %143 {offsets = [0, 32], sizes = [8, 16], strides = [1, 1]} : vector<8x64xf32> to vector<8x16xf32>
    %cst_67 = arith.constant dense<0.000000e+00> : vector<8x8xf32>
    %182 = tpu.matmul %180, %181, %cst_67 {dimension_numbers = #tpu.dot_dimension_numbers<[1], [1], [0], [0], [0, 0, 1, 0], [], []>} : vector<8x16xf32>, vector<8x16xf32>, vector<8x8xf32> -> vector<8x8xf32>
    %cst_68 = arith.constant dense<0xFF800000> : vector<8xf32>
    %183 = vector.multi_reduction <maximumf>, %182, %cst_68 [1] : vector<8x8xf32> to vector<8xf32>
    %184 = vector.shape_cast %183 : vector<8xf32> to vector<8x1xf32>
    %185 = vector.broadcast %184 : vector<8x1xf32> to vector<8x8xf32>
    %186 = arith.subf %182, %185 : vector<8x8xf32>
    %187 = math.exp %186 : vector<8x8xf32>
    %cst_69 = arith.constant dense<0.000000e+00> : vector<8xf32>
    %188 = vector.multi_reduction <add>, %187, %cst_69 [1] : vector<8x8xf32> to vector<8xf32>
    %189 = vector.shape_cast %188 : vector<8xf32> to vector<8x1xf32>
    %190 = tpu.reciprocal %189 {approx = true} : vector<8x1xf32> -> vector<8x1xf32>
    %191 = vector.broadcast %190 : vector<8x1xf32> to vector<8x8xf32>
    %192 = arith.mulf %187, %191 : vector<8x8xf32>
    %193 = vector.extract_strided_slice %144 {offsets = [0, 32], sizes = [8, 16], strides = [1, 1]} : vector<8x64xf32> to vector<8x16xf32>
    %cst_70 = arith.constant dense<0.000000e+00> : vector<8x16xf32>
    %194 = tpu.matmul %192, %193, %cst_70 {dimension_numbers = #tpu.dot_dimension_numbers<[1], [0], [0], [1], [0, 0, 1, 1], [], []>} : vector<8x8xf32>, vector<8x16xf32>, vector<8x16xf32> -> vector<8x16xf32>
    %195 = vector.extract_strided_slice %138 {offsets = [32, 0], sizes = [16, 64], strides = [1, 1]} : vector<64x64xf32> to vector<16x64xf32>
    %cst_71 = arith.constant dense<0.000000e+00> : vector<8x64xf32>
    %196 = tpu.matmul %194, %195, %cst_71 {dimension_numbers = #tpu.dot_dimension_numbers<[1], [0], [0], [1], [0, 0, 1, 1], [], []>} : vector<8x16xf32>, vector<16x64xf32>, vector<8x64xf32> -> vector<8x64xf32>
    %197 = arith.addf %179, %196 : vector<8x64xf32>
    %198 = vector.extract_strided_slice %140 {offsets = [0, 48], sizes = [8, 16], strides = [1, 1]} : vector<8x64xf32> to vector<8x16xf32>
    %199 = vector.extract_strided_slice %143 {offsets = [0, 48], sizes = [8, 16], strides = [1, 1]} : vector<8x64xf32> to vector<8x16xf32>
    %cst_72 = arith.constant dense<0.000000e+00> : vector<8x8xf32>
    %200 = tpu.matmul %198, %199, %cst_72 {dimension_numbers = #tpu.dot_dimension_numbers<[1], [1], [0], [0], [0, 0, 1, 0], [], []>} : vector<8x16xf32>, vector<8x16xf32>, vector<8x8xf32> -> vector<8x8xf32>
    %cst_73 = arith.constant dense<0xFF800000> : vector<8xf32>
    %201 = vector.multi_reduction <maximumf>, %200, %cst_73 [1] : vector<8x8xf32> to vector<8xf32>
    %202 = vector.shape_cast %201 : vector<8xf32> to vector<8x1xf32>
    %203 = vector.broadcast %202 : vector<8x1xf32> to vector<8x8xf32>
    %204 = arith.subf %200, %203 : vector<8x8xf32>
    %205 = math.exp %204 : vector<8x8xf32>
    %cst_74 = arith.constant dense<0.000000e+00> : vector<8xf32>
    %206 = vector.multi_reduction <add>, %205, %cst_74 [1] : vector<8x8xf32> to vector<8xf32>
    %207 = vector.shape_cast %206 : vector<8xf32> to vector<8x1xf32>
    %208 = tpu.reciprocal %207 {approx = true} : vector<8x1xf32> -> vector<8x1xf32>
    %209 = vector.broadcast %208 : vector<8x1xf32> to vector<8x8xf32>
    %210 = arith.mulf %205, %209 : vector<8x8xf32>
    %211 = vector.extract_strided_slice %144 {offsets = [0, 48], sizes = [8, 16], strides = [1, 1]} : vector<8x64xf32> to vector<8x16xf32>
    %cst_75 = arith.constant dense<0.000000e+00> : vector<8x16xf32>
    %212 = tpu.matmul %210, %211, %cst_75 {dimension_numbers = #tpu.dot_dimension_numbers<[1], [0], [0], [1], [0, 0, 1, 1], [], []>} : vector<8x8xf32>, vector<8x16xf32>, vector<8x16xf32> -> vector<8x16xf32>
    %213 = vector.extract_strided_slice %138 {offsets = [48, 0], sizes = [16, 64], strides = [1, 1]} : vector<64x64xf32> to vector<16x64xf32>
    %cst_76 = arith.constant dense<0.000000e+00> : vector<8x64xf32>
    %214 = tpu.matmul %212, %213, %cst_76 {dimension_numbers = #tpu.dot_dimension_numbers<[1], [0], [0], [1], [0, 0, 1, 1], [], []>} : vector<8x16xf32>, vector<16x64xf32>, vector<8x64xf32> -> vector<8x64xf32>
    %215 = arith.addf %197, %214 : vector<8x64xf32>
    %216 = arith.addf %121, %215 : vector<8x64xf32>
    %217 = vector.extract_strided_slice %12 {offsets = [2, 0], sizes = [1, 64], strides = [1, 1]} : vector<3x64xf32> to vector<1x64xf32>
    %218 = arith.mulf %216, %216 : vector<8x64xf32>
    %cst_77 = arith.constant dense<0.000000e+00> : vector<8xf32>
    %219 = vector.multi_reduction <add>, %218, %cst_77 [1] : vector<8x64xf32> to vector<8xf32>
    %220 = vector.shape_cast %219 : vector<8xf32> to vector<8x1xf32>
    %cst_78 = arith.constant 6.400000e+01 : f32
    %221 = vector.broadcast %cst_78 : f32 to vector<8x1xf32>
    %222 = arith.divf %220, %221 : vector<8x1xf32>
    %cst_79 = arith.constant 9.99999997E-7 : f32
    %223 = vector.broadcast %cst_79 : f32 to vector<8x1xf32>
    %224 = arith.addf %222, %223 : vector<8x1xf32>
    %225 = math.rsqrt %224 : vector<8x1xf32>
    %226 = vector.broadcast %225 : vector<8x1xf32> to vector<8x64xf32>
    %227 = arith.mulf %216, %226 : vector<8x64xf32>
    %228 = vector.broadcast %217 : vector<1x64xf32> to vector<8x64xf32>
    %229 = arith.mulf %227, %228 : vector<8x64xf32>
    %c0_80 = arith.constant 0 : index
    %c0_81 = arith.constant 0 : index
    %c0_82 = arith.constant 0 : index
    %230 = vector.load %arg11[%c0_80, %c0_81, %c0_82] : memref<2x64x128xf32, #tpu.memory_space<vmem>>, vector<1x64x128xf32>
    %231 = vector.shape_cast %230 : vector<1x64x128xf32> to vector<64x128xf32>
    %cst_83 = arith.constant dense<0.000000e+00> : vector<8x128xf32>
    %232 = tpu.matmul %229, %231, %cst_83 {dimension_numbers = #tpu.dot_dimension_numbers<[1], [0], [0], [1], [0, 0, 1, 1], [], []>} : vector<8x64xf32>, vector<64x128xf32>, vector<8x128xf32> -> vector<8x128xf32>
    %cst_84 = arith.constant 0.000000e+00 : f32
    %233 = vector.broadcast %cst_84 : f32 to vector<8x128xf32>
    %234 = arith.maximumf %232, %233 : vector<8x128xf32>
    %c0_85 = arith.constant 0 : index
    %c0_86 = arith.constant 0 : index
    %c0_87 = arith.constant 0 : index
    %235 = vector.load %arg12[%c0_85, %c0_86, %c0_87] : memref<2x128x64xf32, #tpu.memory_space<vmem>>, vector<1x128x64xf32>
    %236 = vector.shape_cast %235 : vector<1x128x64xf32> to vector<128x64xf32>
    %cst_88 = arith.constant dense<0.000000e+00> : vector<8x64xf32>
    %237 = tpu.matmul %234, %236, %cst_88 {dimension_numbers = #tpu.dot_dimension_numbers<[1], [0], [0], [1], [0, 0, 1, 1], [], []>} : vector<8x128xf32>, vector<128x64xf32>, vector<8x64xf32> -> vector<8x64xf32>
    %238 = arith.addf %216, %237 : vector<8x64xf32>
    %c1 = arith.constant 1 : index
    %c0_89 = arith.constant 0 : index
    %c0_90 = arith.constant 0 : index
    %239 = vector.load %arg6[%c1, %c0_89, %c0_90] : memref<2x3x64xf32, #tpu.memory_space<vmem>>, vector<1x3x64xf32>
    %240 = vector.shape_cast %239 : vector<1x3x64xf32> to vector<3x64xf32>
    %241 = vector.extract_strided_slice %240 {offsets = [0, 0], sizes = [1, 64], strides = [1, 1]} : vector<3x64xf32> to vector<1x64xf32>
    %242 = arith.mulf %238, %238 : vector<8x64xf32>
    %cst_91 = arith.constant dense<0.000000e+00> : vector<8xf32>
    %243 = vector.multi_reduction <add>, %242, %cst_91 [1] : vector<8x64xf32> to vector<8xf32>
    %244 = vector.shape_cast %243 : vector<8xf32> to vector<8x1xf32>
    %cst_92 = arith.constant 6.400000e+01 : f32
    %245 = vector.broadcast %cst_92 : f32 to vector<8x1xf32>
    %246 = arith.divf %244, %245 : vector<8x1xf32>
    %cst_93 = arith.constant 9.99999997E-7 : f32
    %247 = vector.broadcast %cst_93 : f32 to vector<8x1xf32>
    %248 = arith.addf %246, %247 : vector<8x1xf32>
    %249 = math.rsqrt %248 : vector<8x1xf32>
    %250 = vector.broadcast %249 : vector<8x1xf32> to vector<8x64xf32>
    %251 = arith.mulf %238, %250 : vector<8x64xf32>
    %252 = vector.broadcast %241 : vector<1x64xf32> to vector<8x64xf32>
    %253 = arith.mulf %251, %252 : vector<8x64xf32>
    %c1_94 = arith.constant 1 : index
    %c0_95 = arith.constant 0 : index
    %c0_96 = arith.constant 0 : index
    %254 = vector.load %arg7[%c1_94, %c0_95, %c0_96] : memref<2x64x192xf32, #tpu.memory_space<vmem>>, vector<1x64x192xf32>
    %255 = vector.shape_cast %254 : vector<1x64x192xf32> to vector<64x192xf32>
    %c1_97 = arith.constant 1 : index
    %c0_98 = arith.constant 0 : index
    %c0_99 = arith.constant 0 : index
    %256 = vector.load %arg8[%c1_97, %c0_98, %c0_99] : memref<2x64x64xf32, #tpu.memory_space<vmem>>, vector<1x64x64xf32>
    %257 = vector.shape_cast %256 : vector<1x64x64xf32> to vector<64x64xf32>
    %cst_100 = arith.constant dense<0.000000e+00> : vector<8x192xf32>
    %258 = tpu.matmul %253, %255, %cst_100 {dimension_numbers = #tpu.dot_dimension_numbers<[1], [0], [0], [1], [0, 0, 1, 1], [], []>} : vector<8x64xf32>, vector<64x192xf32>, vector<8x192xf32> -> vector<8x192xf32>
    %259 = vector.extract_strided_slice %258 {offsets = [0, 0], sizes = [8, 64], strides = [1, 1]} : vector<8x192xf32> to vector<8x64xf32>
    %260 = vector.extract_strided_slice %258 {offsets = [0, 64], sizes = [8, 64], strides = [1, 1]} : vector<8x192xf32> to vector<8x64xf32>
    %261 = vector.extract_strided_slice %258 {offsets = [0, 128], sizes = [8, 64], strides = [1, 1]} : vector<8x192xf32> to vector<8x64xf32>
    %262 = vector.extract_strided_slice %259 {offsets = [0, 0], sizes = [8, 16], strides = [1, 1]} : vector<8x64xf32> to vector<8x16xf32>
    %263 = vector.extract_strided_slice %260 {offsets = [0, 0], sizes = [8, 16], strides = [1, 1]} : vector<8x64xf32> to vector<8x16xf32>
    %cst_101 = arith.constant dense<0.000000e+00> : vector<8x8xf32>
    %264 = tpu.matmul %262, %263, %cst_101 {dimension_numbers = #tpu.dot_dimension_numbers<[1], [1], [0], [0], [0, 0, 1, 0], [], []>} : vector<8x16xf32>, vector<8x16xf32>, vector<8x8xf32> -> vector<8x8xf32>
    %265 = vector.extract_strided_slice %9 {offsets = [0, 0, 0], sizes = [1, 8, 8], strides = [1, 1, 1]} : vector<4x8x8xf32> to vector<1x8x8xf32>
    %266 = vector.shape_cast %265 : vector<1x8x8xf32> to vector<8x8xf32>
    %267 = arith.addf %264, %266 : vector<8x8xf32>
    %268 = arith.addf %267, %8 : vector<8x8xf32>
    %cst_102 = arith.constant dense<0xFF800000> : vector<8xf32>
    %269 = vector.multi_reduction <maximumf>, %268, %cst_102 [1] : vector<8x8xf32> to vector<8xf32>
    %270 = vector.shape_cast %269 : vector<8xf32> to vector<8x1xf32>
    %271 = vector.broadcast %270 : vector<8x1xf32> to vector<8x8xf32>
    %272 = arith.subf %268, %271 : vector<8x8xf32>
    %273 = math.exp %272 : vector<8x8xf32>
    %cst_103 = arith.constant dense<0.000000e+00> : vector<8xf32>
    %274 = vector.multi_reduction <add>, %273, %cst_103 [1] : vector<8x8xf32> to vector<8xf32>
    %275 = vector.shape_cast %274 : vector<8xf32> to vector<8x1xf32>
    %276 = tpu.reciprocal %275 {approx = true} : vector<8x1xf32> -> vector<8x1xf32>
    %277 = vector.broadcast %276 : vector<8x1xf32> to vector<8x8xf32>
    %278 = arith.mulf %273, %277 : vector<8x8xf32>
    %279 = vector.extract_strided_slice %261 {offsets = [0, 0], sizes = [8, 16], strides = [1, 1]} : vector<8x64xf32> to vector<8x16xf32>
    %cst_104 = arith.constant dense<0.000000e+00> : vector<8x16xf32>
    %280 = tpu.matmul %278, %279, %cst_104 {dimension_numbers = #tpu.dot_dimension_numbers<[1], [0], [0], [1], [0, 0, 1, 1], [], []>} : vector<8x8xf32>, vector<8x16xf32>, vector<8x16xf32> -> vector<8x16xf32>
    %281 = vector.extract_strided_slice %257 {offsets = [0, 0], sizes = [16, 64], strides = [1, 1]} : vector<64x64xf32> to vector<16x64xf32>
    %cst_105 = arith.constant dense<0.000000e+00> : vector<8x64xf32>
    %282 = tpu.matmul %280, %281, %cst_105 {dimension_numbers = #tpu.dot_dimension_numbers<[1], [0], [0], [1], [0, 0, 1, 1], [], []>} : vector<8x16xf32>, vector<16x64xf32>, vector<8x64xf32> -> vector<8x64xf32>
    %283 = vector.extract_strided_slice %259 {offsets = [0, 16], sizes = [8, 16], strides = [1, 1]} : vector<8x64xf32> to vector<8x16xf32>
    %284 = vector.extract_strided_slice %260 {offsets = [0, 16], sizes = [8, 16], strides = [1, 1]} : vector<8x64xf32> to vector<8x16xf32>
    %cst_106 = arith.constant dense<0.000000e+00> : vector<8x8xf32>
    %285 = tpu.matmul %283, %284, %cst_106 {dimension_numbers = #tpu.dot_dimension_numbers<[1], [1], [0], [0], [0, 0, 1, 0], [], []>} : vector<8x16xf32>, vector<8x16xf32>, vector<8x8xf32> -> vector<8x8xf32>
    %286 = vector.extract_strided_slice %9 {offsets = [1, 0, 0], sizes = [1, 8, 8], strides = [1, 1, 1]} : vector<4x8x8xf32> to vector<1x8x8xf32>
    %287 = vector.shape_cast %286 : vector<1x8x8xf32> to vector<8x8xf32>
    %288 = arith.addf %285, %287 : vector<8x8xf32>
    %289 = arith.addf %288, %8 : vector<8x8xf32>
    %cst_107 = arith.constant dense<0xFF800000> : vector<8xf32>
    %290 = vector.multi_reduction <maximumf>, %289, %cst_107 [1] : vector<8x8xf32> to vector<8xf32>
    %291 = vector.shape_cast %290 : vector<8xf32> to vector<8x1xf32>
    %292 = vector.broadcast %291 : vector<8x1xf32> to vector<8x8xf32>
    %293 = arith.subf %289, %292 : vector<8x8xf32>
    %294 = math.exp %293 : vector<8x8xf32>
    %cst_108 = arith.constant dense<0.000000e+00> : vector<8xf32>
    %295 = vector.multi_reduction <add>, %294, %cst_108 [1] : vector<8x8xf32> to vector<8xf32>
    %296 = vector.shape_cast %295 : vector<8xf32> to vector<8x1xf32>
    %297 = tpu.reciprocal %296 {approx = true} : vector<8x1xf32> -> vector<8x1xf32>
    %298 = vector.broadcast %297 : vector<8x1xf32> to vector<8x8xf32>
    %299 = arith.mulf %294, %298 : vector<8x8xf32>
    %300 = vector.extract_strided_slice %261 {offsets = [0, 16], sizes = [8, 16], strides = [1, 1]} : vector<8x64xf32> to vector<8x16xf32>
    %cst_109 = arith.constant dense<0.000000e+00> : vector<8x16xf32>
    %301 = tpu.matmul %299, %300, %cst_109 {dimension_numbers = #tpu.dot_dimension_numbers<[1], [0], [0], [1], [0, 0, 1, 1], [], []>} : vector<8x8xf32>, vector<8x16xf32>, vector<8x16xf32> -> vector<8x16xf32>
    %302 = vector.extract_strided_slice %257 {offsets = [16, 0], sizes = [16, 64], strides = [1, 1]} : vector<64x64xf32> to vector<16x64xf32>
    %cst_110 = arith.constant dense<0.000000e+00> : vector<8x64xf32>
    %303 = tpu.matmul %301, %302, %cst_110 {dimension_numbers = #tpu.dot_dimension_numbers<[1], [0], [0], [1], [0, 0, 1, 1], [], []>} : vector<8x16xf32>, vector<16x64xf32>, vector<8x64xf32> -> vector<8x64xf32>
    %304 = arith.addf %282, %303 : vector<8x64xf32>
    %305 = vector.extract_strided_slice %259 {offsets = [0, 32], sizes = [8, 16], strides = [1, 1]} : vector<8x64xf32> to vector<8x16xf32>
    %306 = vector.extract_strided_slice %260 {offsets = [0, 32], sizes = [8, 16], strides = [1, 1]} : vector<8x64xf32> to vector<8x16xf32>
    %cst_111 = arith.constant dense<0.000000e+00> : vector<8x8xf32>
    %307 = tpu.matmul %305, %306, %cst_111 {dimension_numbers = #tpu.dot_dimension_numbers<[1], [1], [0], [0], [0, 0, 1, 0], [], []>} : vector<8x16xf32>, vector<8x16xf32>, vector<8x8xf32> -> vector<8x8xf32>
    %308 = vector.extract_strided_slice %9 {offsets = [2, 0, 0], sizes = [1, 8, 8], strides = [1, 1, 1]} : vector<4x8x8xf32> to vector<1x8x8xf32>
    %309 = vector.shape_cast %308 : vector<1x8x8xf32> to vector<8x8xf32>
    %310 = arith.addf %307, %309 : vector<8x8xf32>
    %311 = arith.addf %310, %8 : vector<8x8xf32>
    %cst_112 = arith.constant dense<0xFF800000> : vector<8xf32>
    %312 = vector.multi_reduction <maximumf>, %311, %cst_112 [1] : vector<8x8xf32> to vector<8xf32>
    %313 = vector.shape_cast %312 : vector<8xf32> to vector<8x1xf32>
    %314 = vector.broadcast %313 : vector<8x1xf32> to vector<8x8xf32>
    %315 = arith.subf %311, %314 : vector<8x8xf32>
    %316 = math.exp %315 : vector<8x8xf32>
    %cst_113 = arith.constant dense<0.000000e+00> : vector<8xf32>
    %317 = vector.multi_reduction <add>, %316, %cst_113 [1] : vector<8x8xf32> to vector<8xf32>
    %318 = vector.shape_cast %317 : vector<8xf32> to vector<8x1xf32>
    %319 = tpu.reciprocal %318 {approx = true} : vector<8x1xf32> -> vector<8x1xf32>
    %320 = vector.broadcast %319 : vector<8x1xf32> to vector<8x8xf32>
    %321 = arith.mulf %316, %320 : vector<8x8xf32>
    %322 = vector.extract_strided_slice %261 {offsets = [0, 32], sizes = [8, 16], strides = [1, 1]} : vector<8x64xf32> to vector<8x16xf32>
    %cst_114 = arith.constant dense<0.000000e+00> : vector<8x16xf32>
    %323 = tpu.matmul %321, %322, %cst_114 {dimension_numbers = #tpu.dot_dimension_numbers<[1], [0], [0], [1], [0, 0, 1, 1], [], []>} : vector<8x8xf32>, vector<8x16xf32>, vector<8x16xf32> -> vector<8x16xf32>
    %324 = vector.extract_strided_slice %257 {offsets = [32, 0], sizes = [16, 64], strides = [1, 1]} : vector<64x64xf32> to vector<16x64xf32>
    %cst_115 = arith.constant dense<0.000000e+00> : vector<8x64xf32>
    %325 = tpu.matmul %323, %324, %cst_115 {dimension_numbers = #tpu.dot_dimension_numbers<[1], [0], [0], [1], [0, 0, 1, 1], [], []>} : vector<8x16xf32>, vector<16x64xf32>, vector<8x64xf32> -> vector<8x64xf32>
    %326 = arith.addf %304, %325 : vector<8x64xf32>
    %327 = vector.extract_strided_slice %259 {offsets = [0, 48], sizes = [8, 16], strides = [1, 1]} : vector<8x64xf32> to vector<8x16xf32>
    %328 = vector.extract_strided_slice %260 {offsets = [0, 48], sizes = [8, 16], strides = [1, 1]} : vector<8x64xf32> to vector<8x16xf32>
    %cst_116 = arith.constant dense<0.000000e+00> : vector<8x8xf32>
    %329 = tpu.matmul %327, %328, %cst_116 {dimension_numbers = #tpu.dot_dimension_numbers<[1], [1], [0], [0], [0, 0, 1, 0], [], []>} : vector<8x16xf32>, vector<8x16xf32>, vector<8x8xf32> -> vector<8x8xf32>
    %330 = vector.extract_strided_slice %9 {offsets = [3, 0, 0], sizes = [1, 8, 8], strides = [1, 1, 1]} : vector<4x8x8xf32> to vector<1x8x8xf32>
    %331 = vector.shape_cast %330 : vector<1x8x8xf32> to vector<8x8xf32>
    %332 = arith.addf %329, %331 : vector<8x8xf32>
    %333 = arith.addf %332, %8 : vector<8x8xf32>
    %cst_117 = arith.constant dense<0xFF800000> : vector<8xf32>
    %334 = vector.multi_reduction <maximumf>, %333, %cst_117 [1] : vector<8x8xf32> to vector<8xf32>
    %335 = vector.shape_cast %334 : vector<8xf32> to vector<8x1xf32>
    %336 = vector.broadcast %335 : vector<8x1xf32> to vector<8x8xf32>
    %337 = arith.subf %333, %336 : vector<8x8xf32>
    %338 = math.exp %337 : vector<8x8xf32>
    %cst_118 = arith.constant dense<0.000000e+00> : vector<8xf32>
    %339 = vector.multi_reduction <add>, %338, %cst_118 [1] : vector<8x8xf32> to vector<8xf32>
    %340 = vector.shape_cast %339 : vector<8xf32> to vector<8x1xf32>
    %341 = tpu.reciprocal %340 {approx = true} : vector<8x1xf32> -> vector<8x1xf32>
    %342 = vector.broadcast %341 : vector<8x1xf32> to vector<8x8xf32>
    %343 = arith.mulf %338, %342 : vector<8x8xf32>
    %344 = vector.extract_strided_slice %261 {offsets = [0, 48], sizes = [8, 16], strides = [1, 1]} : vector<8x64xf32> to vector<8x16xf32>
    %cst_119 = arith.constant dense<0.000000e+00> : vector<8x16xf32>
    %345 = tpu.matmul %343, %344, %cst_119 {dimension_numbers = #tpu.dot_dimension_numbers<[1], [0], [0], [1], [0, 0, 1, 1], [], []>} : vector<8x8xf32>, vector<8x16xf32>, vector<8x16xf32> -> vector<8x16xf32>
    %346 = vector.extract_strided_slice %257 {offsets = [48, 0], sizes = [16, 64], strides = [1, 1]} : vector<64x64xf32> to vector<16x64xf32>
    %cst_120 = arith.constant dense<0.000000e+00> : vector<8x64xf32>
    %347 = tpu.matmul %345, %346, %cst_120 {dimension_numbers = #tpu.dot_dimension_numbers<[1], [0], [0], [1], [0, 0, 1, 1], [], []>} : vector<8x16xf32>, vector<16x64xf32>, vector<8x64xf32> -> vector<8x64xf32>
    %348 = arith.addf %326, %347 : vector<8x64xf32>
    %349 = arith.addf %238, %348 : vector<8x64xf32>
    %350 = vector.extract_strided_slice %240 {offsets = [1, 0], sizes = [1, 64], strides = [1, 1]} : vector<3x64xf32> to vector<1x64xf32>
    %351 = arith.mulf %349, %349 : vector<8x64xf32>
    %cst_121 = arith.constant dense<0.000000e+00> : vector<8xf32>
    %352 = vector.multi_reduction <add>, %351, %cst_121 [1] : vector<8x64xf32> to vector<8xf32>
    %353 = vector.shape_cast %352 : vector<8xf32> to vector<8x1xf32>
    %cst_122 = arith.constant 6.400000e+01 : f32
    %354 = vector.broadcast %cst_122 : f32 to vector<8x1xf32>
    %355 = arith.divf %353, %354 : vector<8x1xf32>
    %cst_123 = arith.constant 9.99999997E-7 : f32
    %356 = vector.broadcast %cst_123 : f32 to vector<8x1xf32>
    %357 = arith.addf %355, %356 : vector<8x1xf32>
    %358 = math.rsqrt %357 : vector<8x1xf32>
    %359 = vector.broadcast %358 : vector<8x1xf32> to vector<8x64xf32>
    %360 = arith.mulf %349, %359 : vector<8x64xf32>
    %361 = vector.broadcast %350 : vector<1x64xf32> to vector<8x64xf32>
    %362 = arith.mulf %360, %361 : vector<8x64xf32>
    %c1_124 = arith.constant 1 : index
    %c0_125 = arith.constant 0 : index
    %c0_126 = arith.constant 0 : index
    %363 = vector.load %arg9[%c1_124, %c0_125, %c0_126] : memref<2x64x192xf32, #tpu.memory_space<vmem>>, vector<1x64x192xf32>
    %364 = vector.shape_cast %363 : vector<1x64x192xf32> to vector<64x192xf32>
    %c1_127 = arith.constant 1 : index
    %c0_128 = arith.constant 0 : index
    %c0_129 = arith.constant 0 : index
    %365 = vector.load %arg10[%c1_127, %c0_128, %c0_129] : memref<2x64x64xf32, #tpu.memory_space<vmem>>, vector<1x64x64xf32>
    %366 = vector.shape_cast %365 : vector<1x64x64xf32> to vector<64x64xf32>
    %367 = vector.extract_strided_slice %364 {offsets = [0, 0], sizes = [64, 64], strides = [1, 1]} : vector<64x192xf32> to vector<64x64xf32>
    %cst_130 = arith.constant dense<0.000000e+00> : vector<8x64xf32>
    %368 = tpu.matmul %362, %367, %cst_130 {dimension_numbers = #tpu.dot_dimension_numbers<[1], [0], [0], [1], [0, 0, 1, 1], [], []>} : vector<8x64xf32>, vector<64x64xf32>, vector<8x64xf32> -> vector<8x64xf32>
    %369 = vector.extract_strided_slice %364 {offsets = [0, 64], sizes = [64, 128], strides = [1, 1]} : vector<64x192xf32> to vector<64x128xf32>
    %cst_131 = arith.constant dense<0.000000e+00> : vector<8x128xf32>
    %370 = tpu.matmul %6, %369, %cst_131 {dimension_numbers = #tpu.dot_dimension_numbers<[1], [0], [0], [1], [0, 0, 1, 1], [], []>} : vector<8x64xf32>, vector<64x128xf32>, vector<8x128xf32> -> vector<8x128xf32>
    %371 = vector.extract_strided_slice %370 {offsets = [0, 0], sizes = [8, 64], strides = [1, 1]} : vector<8x128xf32> to vector<8x64xf32>
    %372 = vector.extract_strided_slice %370 {offsets = [0, 64], sizes = [8, 64], strides = [1, 1]} : vector<8x128xf32> to vector<8x64xf32>
    %373 = vector.extract_strided_slice %368 {offsets = [0, 0], sizes = [8, 16], strides = [1, 1]} : vector<8x64xf32> to vector<8x16xf32>
    %374 = vector.extract_strided_slice %371 {offsets = [0, 0], sizes = [8, 16], strides = [1, 1]} : vector<8x64xf32> to vector<8x16xf32>
    %cst_132 = arith.constant dense<0.000000e+00> : vector<8x8xf32>
    %375 = tpu.matmul %373, %374, %cst_132 {dimension_numbers = #tpu.dot_dimension_numbers<[1], [1], [0], [0], [0, 0, 1, 0], [], []>} : vector<8x16xf32>, vector<8x16xf32>, vector<8x8xf32> -> vector<8x8xf32>
    %cst_133 = arith.constant dense<0xFF800000> : vector<8xf32>
    %376 = vector.multi_reduction <maximumf>, %375, %cst_133 [1] : vector<8x8xf32> to vector<8xf32>
    %377 = vector.shape_cast %376 : vector<8xf32> to vector<8x1xf32>
    %378 = vector.broadcast %377 : vector<8x1xf32> to vector<8x8xf32>
    %379 = arith.subf %375, %378 : vector<8x8xf32>
    %380 = math.exp %379 : vector<8x8xf32>
    %cst_134 = arith.constant dense<0.000000e+00> : vector<8xf32>
    %381 = vector.multi_reduction <add>, %380, %cst_134 [1] : vector<8x8xf32> to vector<8xf32>
    %382 = vector.shape_cast %381 : vector<8xf32> to vector<8x1xf32>
    %383 = tpu.reciprocal %382 {approx = true} : vector<8x1xf32> -> vector<8x1xf32>
    %384 = vector.broadcast %383 : vector<8x1xf32> to vector<8x8xf32>
    %385 = arith.mulf %380, %384 : vector<8x8xf32>
    %386 = vector.extract_strided_slice %372 {offsets = [0, 0], sizes = [8, 16], strides = [1, 1]} : vector<8x64xf32> to vector<8x16xf32>
    %cst_135 = arith.constant dense<0.000000e+00> : vector<8x16xf32>
    %387 = tpu.matmul %385, %386, %cst_135 {dimension_numbers = #tpu.dot_dimension_numbers<[1], [0], [0], [1], [0, 0, 1, 1], [], []>} : vector<8x8xf32>, vector<8x16xf32>, vector<8x16xf32> -> vector<8x16xf32>
    %388 = vector.extract_strided_slice %366 {offsets = [0, 0], sizes = [16, 64], strides = [1, 1]} : vector<64x64xf32> to vector<16x64xf32>
    %cst_136 = arith.constant dense<0.000000e+00> : vector<8x64xf32>
    %389 = tpu.matmul %387, %388, %cst_136 {dimension_numbers = #tpu.dot_dimension_numbers<[1], [0], [0], [1], [0, 0, 1, 1], [], []>} : vector<8x16xf32>, vector<16x64xf32>, vector<8x64xf32> -> vector<8x64xf32>
    %390 = vector.extract_strided_slice %368 {offsets = [0, 16], sizes = [8, 16], strides = [1, 1]} : vector<8x64xf32> to vector<8x16xf32>
    %391 = vector.extract_strided_slice %371 {offsets = [0, 16], sizes = [8, 16], strides = [1, 1]} : vector<8x64xf32> to vector<8x16xf32>
    %cst_137 = arith.constant dense<0.000000e+00> : vector<8x8xf32>
    %392 = tpu.matmul %390, %391, %cst_137 {dimension_numbers = #tpu.dot_dimension_numbers<[1], [1], [0], [0], [0, 0, 1, 0], [], []>} : vector<8x16xf32>, vector<8x16xf32>, vector<8x8xf32> -> vector<8x8xf32>
    %cst_138 = arith.constant dense<0xFF800000> : vector<8xf32>
    %393 = vector.multi_reduction <maximumf>, %392, %cst_138 [1] : vector<8x8xf32> to vector<8xf32>
    %394 = vector.shape_cast %393 : vector<8xf32> to vector<8x1xf32>
    %395 = vector.broadcast %394 : vector<8x1xf32> to vector<8x8xf32>
    %396 = arith.subf %392, %395 : vector<8x8xf32>
    %397 = math.exp %396 : vector<8x8xf32>
    %cst_139 = arith.constant dense<0.000000e+00> : vector<8xf32>
    %398 = vector.multi_reduction <add>, %397, %cst_139 [1] : vector<8x8xf32> to vector<8xf32>
    %399 = vector.shape_cast %398 : vector<8xf32> to vector<8x1xf32>
    %400 = tpu.reciprocal %399 {approx = true} : vector<8x1xf32> -> vector<8x1xf32>
    %401 = vector.broadcast %400 : vector<8x1xf32> to vector<8x8xf32>
    %402 = arith.mulf %397, %401 : vector<8x8xf32>
    %403 = vector.extract_strided_slice %372 {offsets = [0, 16], sizes = [8, 16], strides = [1, 1]} : vector<8x64xf32> to vector<8x16xf32>
    %cst_140 = arith.constant dense<0.000000e+00> : vector<8x16xf32>
    %404 = tpu.matmul %402, %403, %cst_140 {dimension_numbers = #tpu.dot_dimension_numbers<[1], [0], [0], [1], [0, 0, 1, 1], [], []>} : vector<8x8xf32>, vector<8x16xf32>, vector<8x16xf32> -> vector<8x16xf32>
    %405 = vector.extract_strided_slice %366 {offsets = [16, 0], sizes = [16, 64], strides = [1, 1]} : vector<64x64xf32> to vector<16x64xf32>
    %cst_141 = arith.constant dense<0.000000e+00> : vector<8x64xf32>
    %406 = tpu.matmul %404, %405, %cst_141 {dimension_numbers = #tpu.dot_dimension_numbers<[1], [0], [0], [1], [0, 0, 1, 1], [], []>} : vector<8x16xf32>, vector<16x64xf32>, vector<8x64xf32> -> vector<8x64xf32>
    %407 = arith.addf %389, %406 : vector<8x64xf32>
    %408 = vector.extract_strided_slice %368 {offsets = [0, 32], sizes = [8, 16], strides = [1, 1]} : vector<8x64xf32> to vector<8x16xf32>
    %409 = vector.extract_strided_slice %371 {offsets = [0, 32], sizes = [8, 16], strides = [1, 1]} : vector<8x64xf32> to vector<8x16xf32>
    %cst_142 = arith.constant dense<0.000000e+00> : vector<8x8xf32>
    %410 = tpu.matmul %408, %409, %cst_142 {dimension_numbers = #tpu.dot_dimension_numbers<[1], [1], [0], [0], [0, 0, 1, 0], [], []>} : vector<8x16xf32>, vector<8x16xf32>, vector<8x8xf32> -> vector<8x8xf32>
    %cst_143 = arith.constant dense<0xFF800000> : vector<8xf32>
    %411 = vector.multi_reduction <maximumf>, %410, %cst_143 [1] : vector<8x8xf32> to vector<8xf32>
    %412 = vector.shape_cast %411 : vector<8xf32> to vector<8x1xf32>
    %413 = vector.broadcast %412 : vector<8x1xf32> to vector<8x8xf32>
    %414 = arith.subf %410, %413 : vector<8x8xf32>
    %415 = math.exp %414 : vector<8x8xf32>
    %cst_144 = arith.constant dense<0.000000e+00> : vector<8xf32>
    %416 = vector.multi_reduction <add>, %415, %cst_144 [1] : vector<8x8xf32> to vector<8xf32>
    %417 = vector.shape_cast %416 : vector<8xf32> to vector<8x1xf32>
    %418 = tpu.reciprocal %417 {approx = true} : vector<8x1xf32> -> vector<8x1xf32>
    %419 = vector.broadcast %418 : vector<8x1xf32> to vector<8x8xf32>
    %420 = arith.mulf %415, %419 : vector<8x8xf32>
    %421 = vector.extract_strided_slice %372 {offsets = [0, 32], sizes = [8, 16], strides = [1, 1]} : vector<8x64xf32> to vector<8x16xf32>
    %cst_145 = arith.constant dense<0.000000e+00> : vector<8x16xf32>
    %422 = tpu.matmul %420, %421, %cst_145 {dimension_numbers = #tpu.dot_dimension_numbers<[1], [0], [0], [1], [0, 0, 1, 1], [], []>} : vector<8x8xf32>, vector<8x16xf32>, vector<8x16xf32> -> vector<8x16xf32>
    %423 = vector.extract_strided_slice %366 {offsets = [32, 0], sizes = [16, 64], strides = [1, 1]} : vector<64x64xf32> to vector<16x64xf32>
    %cst_146 = arith.constant dense<0.000000e+00> : vector<8x64xf32>
    %424 = tpu.matmul %422, %423, %cst_146 {dimension_numbers = #tpu.dot_dimension_numbers<[1], [0], [0], [1], [0, 0, 1, 1], [], []>} : vector<8x16xf32>, vector<16x64xf32>, vector<8x64xf32> -> vector<8x64xf32>
    %425 = arith.addf %407, %424 : vector<8x64xf32>
    %426 = vector.extract_strided_slice %368 {offsets = [0, 48], sizes = [8, 16], strides = [1, 1]} : vector<8x64xf32> to vector<8x16xf32>
    %427 = vector.extract_strided_slice %371 {offsets = [0, 48], sizes = [8, 16], strides = [1, 1]} : vector<8x64xf32> to vector<8x16xf32>
    %cst_147 = arith.constant dense<0.000000e+00> : vector<8x8xf32>
    %428 = tpu.matmul %426, %427, %cst_147 {dimension_numbers = #tpu.dot_dimension_numbers<[1], [1], [0], [0], [0, 0, 1, 0], [], []>} : vector<8x16xf32>, vector<8x16xf32>, vector<8x8xf32> -> vector<8x8xf32>
    %cst_148 = arith.constant dense<0xFF800000> : vector<8xf32>
    %429 = vector.multi_reduction <maximumf>, %428, %cst_148 [1] : vector<8x8xf32> to vector<8xf32>
    %430 = vector.shape_cast %429 : vector<8xf32> to vector<8x1xf32>
    %431 = vector.broadcast %430 : vector<8x1xf32> to vector<8x8xf32>
    %432 = arith.subf %428, %431 : vector<8x8xf32>
    %433 = math.exp %432 : vector<8x8xf32>
    %cst_149 = arith.constant dense<0.000000e+00> : vector<8xf32>
    %434 = vector.multi_reduction <add>, %433, %cst_149 [1] : vector<8x8xf32> to vector<8xf32>
    %435 = vector.shape_cast %434 : vector<8xf32> to vector<8x1xf32>
    %436 = tpu.reciprocal %435 {approx = true} : vector<8x1xf32> -> vector<8x1xf32>
    %437 = vector.broadcast %436 : vector<8x1xf32> to vector<8x8xf32>
    %438 = arith.mulf %433, %437 : vector<8x8xf32>
    %439 = vector.extract_strided_slice %372 {offsets = [0, 48], sizes = [8, 16], strides = [1, 1]} : vector<8x64xf32> to vector<8x16xf32>
    %cst_150 = arith.constant dense<0.000000e+00> : vector<8x16xf32>
    %440 = tpu.matmul %438, %439, %cst_150 {dimension_numbers = #tpu.dot_dimension_numbers<[1], [0], [0], [1], [0, 0, 1, 1], [], []>} : vector<8x8xf32>, vector<8x16xf32>, vector<8x16xf32> -> vector<8x16xf32>
    %441 = vector.extract_strided_slice %366 {offsets = [48, 0], sizes = [16, 64], strides = [1, 1]} : vector<64x64xf32> to vector<16x64xf32>
    %cst_151 = arith.constant dense<0.000000e+00> : vector<8x64xf32>
    %442 = tpu.matmul %440, %441, %cst_151 {dimension_numbers = #tpu.dot_dimension_numbers<[1], [0], [0], [1], [0, 0, 1, 1], [], []>} : vector<8x16xf32>, vector<16x64xf32>, vector<8x64xf32> -> vector<8x64xf32>
    %443 = arith.addf %425, %442 : vector<8x64xf32>
    %444 = arith.addf %349, %443 : vector<8x64xf32>
    %445 = vector.extract_strided_slice %240 {offsets = [2, 0], sizes = [1, 64], strides = [1, 1]} : vector<3x64xf32> to vector<1x64xf32>
    %446 = arith.mulf %444, %444 : vector<8x64xf32>
    %cst_152 = arith.constant dense<0.000000e+00> : vector<8xf32>
    %447 = vector.multi_reduction <add>, %446, %cst_152 [1] : vector<8x64xf32> to vector<8xf32>
    %448 = vector.shape_cast %447 : vector<8xf32> to vector<8x1xf32>
    %cst_153 = arith.constant 6.400000e+01 : f32
    %449 = vector.broadcast %cst_153 : f32 to vector<8x1xf32>
    %450 = arith.divf %448, %449 : vector<8x1xf32>
    %cst_154 = arith.constant 9.99999997E-7 : f32
    %451 = vector.broadcast %cst_154 : f32 to vector<8x1xf32>
    %452 = arith.addf %450, %451 : vector<8x1xf32>
    %453 = math.rsqrt %452 : vector<8x1xf32>
    %454 = vector.broadcast %453 : vector<8x1xf32> to vector<8x64xf32>
    %455 = arith.mulf %444, %454 : vector<8x64xf32>
    %456 = vector.broadcast %445 : vector<1x64xf32> to vector<8x64xf32>
    %457 = arith.mulf %455, %456 : vector<8x64xf32>
    %c1_155 = arith.constant 1 : index
    %c0_156 = arith.constant 0 : index
    %c0_157 = arith.constant 0 : index
    %458 = vector.load %arg11[%c1_155, %c0_156, %c0_157] : memref<2x64x128xf32, #tpu.memory_space<vmem>>, vector<1x64x128xf32>
    %459 = vector.shape_cast %458 : vector<1x64x128xf32> to vector<64x128xf32>
    %cst_158 = arith.constant dense<0.000000e+00> : vector<8x128xf32>
    %460 = tpu.matmul %457, %459, %cst_158 {dimension_numbers = #tpu.dot_dimension_numbers<[1], [0], [0], [1], [0, 0, 1, 1], [], []>} : vector<8x64xf32>, vector<64x128xf32>, vector<8x128xf32> -> vector<8x128xf32>
    %cst_159 = arith.constant 0.000000e+00 : f32
    %461 = vector.broadcast %cst_159 : f32 to vector<8x128xf32>
    %462 = arith.maximumf %460, %461 : vector<8x128xf32>
    %c1_160 = arith.constant 1 : index
    %c0_161 = arith.constant 0 : index
    %c0_162 = arith.constant 0 : index
    %463 = vector.load %arg12[%c1_160, %c0_161, %c0_162] : memref<2x128x64xf32, #tpu.memory_space<vmem>>, vector<1x128x64xf32>
    %464 = vector.shape_cast %463 : vector<1x128x64xf32> to vector<128x64xf32>
    %cst_163 = arith.constant dense<0.000000e+00> : vector<8x64xf32>
    %465 = tpu.matmul %462, %464, %cst_163 {dimension_numbers = #tpu.dot_dimension_numbers<[1], [0], [0], [1], [0, 0, 1, 1], [], []>} : vector<8x128xf32>, vector<128x64xf32>, vector<8x64xf32> -> vector<8x64xf32>
    %466 = arith.addf %444, %465 : vector<8x64xf32>
    %c0_164 = arith.constant 0 : index
    %c0_165 = arith.constant 0 : index
    %467 = vector.load %arg13[%c0_164, %c0_165] : memref<1x64xf32, #tpu.memory_space<vmem>>, vector<1x64xf32>
    %468 = arith.mulf %466, %466 : vector<8x64xf32>
    %cst_166 = arith.constant dense<0.000000e+00> : vector<8xf32>
    %469 = vector.multi_reduction <add>, %468, %cst_166 [1] : vector<8x64xf32> to vector<8xf32>
    %470 = vector.shape_cast %469 : vector<8xf32> to vector<8x1xf32>
    %cst_167 = arith.constant 6.400000e+01 : f32
    %471 = vector.broadcast %cst_167 : f32 to vector<8x1xf32>
    %472 = arith.divf %470, %471 : vector<8x1xf32>
    %cst_168 = arith.constant 9.99999997E-7 : f32
    %473 = vector.broadcast %cst_168 : f32 to vector<8x1xf32>
    %474 = arith.addf %472, %473 : vector<8x1xf32>
    %475 = math.rsqrt %474 : vector<8x1xf32>
    %476 = vector.broadcast %475 : vector<8x1xf32> to vector<8x64xf32>
    %477 = arith.mulf %466, %476 : vector<8x64xf32>
    %478 = vector.broadcast %467 : vector<1x64xf32> to vector<8x64xf32>
    %479 = arith.mulf %477, %478 : vector<8x64xf32>
    %cst_169 = arith.constant 1.250000e-01 : f32
    %480 = vector.broadcast %cst_169 : f32 to vector<8x64xf32>
    %481 = arith.mulf %479, %480 : vector<8x64xf32>
    %cst_170 = arith.constant dense<0.000000e+00> : vector<8x128xf32>
    %482 = tpu.matmul %481, %10, %cst_170 {dimension_numbers = #tpu.dot_dimension_numbers<[1], [1], [0], [0], [0, 0, 1, 0], [], []>} : vector<8x64xf32>, vector<128x64xf32>, vector<8x128xf32> -> vector<8x128xf32>
    %c0_171 = arith.constant 0 : index
    %c0_172 = arith.constant 0 : index
    %c0_173 = arith.constant 0 : index
    %483 = vector.load %arg4[%c0_171, %c0_172, %c0_173] : memref<1x8x128xf32, #tpu.memory_space<vmem>>, vector<1x8x128xf32>
    %484 = vector.shape_cast %483 : vector<1x8x128xf32> to vector<8x128xf32>
    %cst_174 = arith.constant dense<0xFF800000> : vector<8xf32>
    %485 = vector.multi_reduction <maximumf>, %482, %cst_174 [1] : vector<8x128xf32> to vector<8xf32>
    %486 = vector.shape_cast %485 : vector<8xf32> to vector<8x1xf32>
    %487 = vector.broadcast %486 : vector<8x1xf32> to vector<8x128xf32>
    %488 = arith.subf %482, %487 : vector<8x128xf32>
    %489 = math.exp %488 : vector<8x128xf32>
    %cst_175 = arith.constant dense<0.000000e+00> : vector<8xf32>
    %490 = vector.multi_reduction <add>, %489, %cst_175 [1] : vector<8x128xf32> to vector<8xf32>
    %491 = vector.shape_cast %490 : vector<8xf32> to vector<8x1xf32>
    %492 = math.log %491 : vector<8x1xf32>
    %493 = arith.addf %486, %492 : vector<8x1xf32>
    %494 = arith.mulf %484, %482 : vector<8x128xf32>
    %cst_176 = arith.constant dense<0.000000e+00> : vector<8xf32>
    %495 = vector.multi_reduction <add>, %494, %cst_176 [1] : vector<8x128xf32> to vector<8xf32>
    %496 = vector.shape_cast %495 : vector<8xf32> to vector<8x1xf32>
    %cst_177 = arith.constant dense<0.000000e+00> : vector<8xf32>
    %497 = vector.multi_reduction <add>, %484, %cst_177 [1] : vector<8x128xf32> to vector<8xf32>
    %498 = vector.shape_cast %497 : vector<8xf32> to vector<8x1xf32>
    %c0_178 = arith.constant 0 : index
    %c0_179 = arith.constant 0 : index
    %499 = vector.load %arg16[%c0_178, %c0_179] : memref<1x1xf32, #tpu.memory_space<vmem>>, vector<1x1xf32>
    %500 = arith.subf %493, %496 : vector<8x1xf32>
    %501 = arith.mulf %498, %500 : vector<8x1xf32>
    %cst_180 = arith.constant dense<0.000000e+00> : vector<1xf32>
    %502 = vector.multi_reduction <add>, %501, %cst_180 [0] : vector<8x1xf32> to vector<1xf32>
    %503 = vector.shape_cast %502 : vector<1xf32> to vector<1x1xf32>
    %504 = arith.addf %499, %503 : vector<1x1xf32>
    %c0_181 = arith.constant 0 : index
    %c0_182 = arith.constant 0 : index
    %505 = vector.load %arg16[%c0_181, %c0_182] : memref<1x1xf32, #tpu.memory_space<vmem>>, vector<1x1xf32>
    tpu.vector_store %arg16[%c0_181, %c0_182], %504 {strides = array<i32>} : memref<1x1xf32, #tpu.memory_space<vmem>>, vector<1x1xf32>,
    %c0_183 = arith.constant 0 : index
    %c0_184 = arith.constant 0 : index
    %506 = vector.load %arg17[%c0_183, %c0_184] : memref<1x1xf32, #tpu.memory_space<vmem>>, vector<1x1xf32>
    %cst_185 = arith.constant dense<0.000000e+00> : vector<1xf32>
    %507 = vector.multi_reduction <add>, %498, %cst_185 [0] : vector<8x1xf32> to vector<1xf32>
    %508 = vector.shape_cast %507 : vector<1xf32> to vector<1x1xf32>
    %509 = arith.addf %506, %508 : vector<1x1xf32>
    %c0_186 = arith.constant 0 : index
    %c0_187 = arith.constant 0 : index
    %510 = vector.load %arg17[%c0_186, %c0_187] : memref<1x1xf32, #tpu.memory_space<vmem>>, vector<1x1xf32>
    tpu.vector_store %arg17[%c0_186, %c0_187], %509 {strides = array<i32>} : memref<1x1xf32, #tpu.memory_space<vmem>>, vector<1x1xf32>,
    %c0_188 = arith.constant 0 : index
    %c0_189 = arith.constant 0 : index
    %511 = vector.load %arg16[%c0_188, %c0_189] : memref<1x1xf32, #tpu.memory_space<vmem>>, vector<1x1xf32>
    %c0_190 = arith.constant 0 : index
    %c0_191 = arith.constant 0 : index
    %512 = vector.load %arg17[%c0_190, %c0_191] : memref<1x1xf32, #tpu.memory_space<vmem>>, vector<1x1xf32>
    %cst_192 = arith.constant 1.000000e+00 : f32
    %513 = vector.broadcast %cst_192 : f32 to vector<1x1xf32>
    %514 = arith.maximumf %512, %513 : vector<1x1xf32>
    %515 = arith.divf %511, %514 : vector<1x1xf32>
    %c0_193 = arith.constant 0 : index
    %c0_194 = arith.constant 0 : index
    %516 = vector.load %arg15[%c0_193, %c0_194] : memref<1x1xf32, #tpu.memory_space<vmem>>, vector<1x1xf32>
    tpu.vector_store %arg15[%c0_193, %c0_194], %515 {strides = array<i32>} : memref<1x1xf32, #tpu.memory_space<vmem>>, vector<1x1xf32>,
    return
  }
  func.func @transform_0(%arg0: i32) -> (i32, i32, i32) {
    %c0_i32 = arith.constant 0 : i32
    %c0_i32_0 = arith.constant 0 : i32
    %c0_i32_1 = arith.constant 0 : i32
    return %arg0, %c0_i32, %c0_i32_0 : i32, i32, i32
  }
  func.func @transform_1(%arg0: i32) -> (i32, i32, i32) {
    %c0_i32 = arith.constant 0 : i32
    %c0_i32_0 = arith.constant 0 : i32
    %c0_i32_1 = arith.constant 0 : i32
    return %arg0, %c0_i32, %c0_i32_0 : i32, i32, i32
  }
  func.func @transform_2(%arg0: i32) -> (i32, i32, i32) {
    %c0_i32 = arith.constant 0 : i32
    %c0_i32_0 = arith.constant 0 : i32
    %c0_i32_1 = arith.constant 0 : i32
    return %arg0, %c0_i32, %c0_i32_0 : i32, i32, i32
  }
  func.func @transform_3(%arg0: i32) -> (i32, i32, i32) {
    %c0_i32 = arith.constant 0 : i32
    %c0_i32_0 = arith.constant 0 : i32
    %c0_i32_1 = arith.constant 0 : i32
    return %arg0, %c0_i32, %c0_i32_0 : i32, i32, i32
  }
  func.func @transform_4(%arg0: i32) -> (i32, i32, i32) {
    %c0_i32 = arith.constant 0 : i32
    %c0_i32_0 = arith.constant 0 : i32
    %c0_i32_1 = arith.constant 0 : i32
    %c0_i32_2 = arith.constant 0 : i32
    return %c0_i32, %c0_i32_0, %c0_i32_1 : i32, i32, i32
  }
  func.func @transform_5(%arg0: i32) -> (i32, i32, i32) {
    %c0_i32 = arith.constant 0 : i32
    %c0_i32_0 = arith.constant 0 : i32
    %c0_i32_1 = arith.constant 0 : i32
    %c0_i32_2 = arith.constant 0 : i32
    return %c0_i32, %c0_i32_0, %c0_i32_1 : i32, i32, i32
  }
  func.func @transform_6(%arg0: i32) -> (i32, i32, i32) {
    %c0_i32 = arith.constant 0 : i32
    %c0_i32_0 = arith.constant 0 : i32
    %c0_i32_1 = arith.constant 0 : i32
    %c0_i32_2 = arith.constant 0 : i32
    return %c0_i32, %c0_i32_0, %c0_i32_1 : i32, i32, i32
  }
  func.func @transform_7(%arg0: i32) -> (i32, i32, i32) {
    %c0_i32 = arith.constant 0 : i32
    %c0_i32_0 = arith.constant 0 : i32
    %c0_i32_1 = arith.constant 0 : i32
    %c0_i32_2 = arith.constant 0 : i32
    return %c0_i32, %c0_i32_0, %c0_i32_1 : i32, i32, i32
  }
  func.func @transform_8(%arg0: i32) -> (i32, i32, i32) {
    %c0_i32 = arith.constant 0 : i32
    %c0_i32_0 = arith.constant 0 : i32
    %c0_i32_1 = arith.constant 0 : i32
    %c0_i32_2 = arith.constant 0 : i32
    return %c0_i32, %c0_i32_0, %c0_i32_1 : i32, i32, i32
  }
  func.func @transform_9(%arg0: i32) -> (i32, i32, i32) {
    %c0_i32 = arith.constant 0 : i32
    %c0_i32_0 = arith.constant 0 : i32
    %c0_i32_1 = arith.constant 0 : i32
    %c0_i32_2 = arith.constant 0 : i32
    return %c0_i32, %c0_i32_0, %c0_i32_1 : i32, i32, i32
  }
  func.func @transform_10(%arg0: i32) -> (i32, i32, i32) {
    %c0_i32 = arith.constant 0 : i32
    %c0_i32_0 = arith.constant 0 : i32
    %c0_i32_1 = arith.constant 0 : i32
    %c0_i32_2 = arith.constant 0 : i32
    return %c0_i32, %c0_i32_0, %c0_i32_1 : i32, i32, i32
  }
  func.func @transform_11(%arg0: i32) -> (i32, i32, i32) {
    %c0_i32 = arith.constant 0 : i32
    %c0_i32_0 = arith.constant 0 : i32
    %c0_i32_1 = arith.constant 0 : i32
    %c0_i32_2 = arith.constant 0 : i32
    return %c0_i32, %c0_i32_0, %c0_i32_1 : i32, i32, i32
  }
  func.func @transform_12(%arg0: i32) -> (i32, i32) {
    %c0_i32 = arith.constant 0 : i32
    %c0_i32_0 = arith.constant 0 : i32
    %c0_i32_1 = arith.constant 0 : i32
    return %c0_i32, %c0_i32_0 : i32, i32
  }
  func.func @transform_13(%arg0: i32) -> (i32, i32) {
    %c0_i32 = arith.constant 0 : i32
    %c0_i32_0 = arith.constant 0 : i32
    %c0_i32_1 = arith.constant 0 : i32
    return %c0_i32, %c0_i32_0 : i32, i32
  }
  func.func @transform_14(%arg0: i32) -> (i32, i32) {
    %c0_i32 = arith.constant 0 : i32
    %c0_i32_0 = arith.constant 0 : i32
    %c0_i32_1 = arith.constant 0 : i32
    return %c0_i32, %c0_i32_0 : i32, i32
  }
}

</mosaic_0001>

<bundles_post_ra>
// kernel: t5_loss.2
= control target key start
LH: loop header
LB: loop body
LE: loop exit
PB: predicated region body
PF: predicated region fallthrough
CT: control target
= control target key end

     0   :  { %s3575_s27 = smov 0   ;;  %s4184_s0 = inlined_call_operand.vmem [shape: f32[2,8,64], index: 0, kind: input, shape index: {}]   ;;  %s4185_s1 = inlined_call_operand.vmem [shape: f32[4,8,8], index: 1, kind: input, shape index: {}]   ;;  %s4186_s2 = inlined_call_operand.vmem [shape: f32[2,2,64], index: 2, kind: input, shape index: {}]   ;;  %s4187_s3 = inlined_call_operand.vmem [shape: f32[2,64,192], index: 3, kind: input, shape index: {}]   ;;  %s4188_s4 = inlined_call_operand.vmem [shape: f32[2,64,64], index: 4, kind: input, shape index: {}]   ;;  %s4189_s5 = inlined_call_operand.vmem [shape: f32[2,64,128], index: 5, kind: input, shape index: {}]   ;;  %s4190_s6 = inlined_call_operand.vmem [shape: f32[2,128,64], index: 6, kind: input, shape index: {}]   ;;  %s4191_s7 = inlined_call_operand.vmem [shape: f32[1,64], index: 7, kind: input, shape index: {}]   ;;  %s4192_s8 = inlined_call_operand.vmem [shape: f32[2,8,64], index: 8, kind: output, shape index: {}]  }
   0x1 LB: > { %s2877_s28 = sadd.s32 4294967295, %s3518_s27   ;;  %p2881_p0 = scmp.ge.s32.totalorder %s3518_s27, 1  ;;  %s3518_s27 = sphi %s3575_s27, %s18_s27  }
   0x2   : > { %p261_p1 = scmp.lt.s32.totalorder %s3518_s27, 3 }
   0x4   : > { %p262_p2 = pnand %p2881_p0, %p261_p1 }
   0x5   : > { %p293_p3 = scmp.lt.s32.totalorder (!%p262_p2), %s2877_s28, 1  ;;  %vm308_vm0 = vcmask (!%p262_p2), 523264   ;;  %v323_v3 = vld [vmem:[%s4187_s3 + $0x8] sm:$0xff] (!%p262_p2)  ;;  %v325_v4 = vld [vmem:[%s4187_s3 + $0x18] sm:$0xff] (!%p262_p2)  ;;  %v322_v6 = vld [vmem:[%s4187_s3] sm:$0xff] (!%p262_p2)  ;;  %v3520_v16 = vmov (!%p262_p2), 0.0   ;;  %v317_v30 = vlaneseq (!%p262_p2) }
   0x6   : > { %265 = sbr.rel (%p262_p2) target bundleno = 6822 (0x1aa6), region = 52  ;;  %v3324_v5 = vpack.c.bf16 (!%p262_p2), %v325_v4, %v323_v3  ;;  %v324_v7 = vld [vmem:[%s4187_s3 + $0x10] sm:$0xff] (!%p262_p2)  ;;  %v327_v9 = vld [vmem:[%s4187_s3 + $0x28] sm:$0xff] (!%p262_p2)  ;;  %v329_v10 = vld [vmem:[%s4187_s3 + $0x38] sm:$0xff] (!%p262_p2)  ;;  %413 = vmatprep.mubr.f32.mxu0 (!%p262_p2), %v3520_v16  ;;  %3090 = vmatprep.subr.mxu1 (!%p262_p2), %v3520_v16  ;;  %vm3521_vm1 = vmmov (!%p262_p2), 0   ;;  %s3522_s26 = smov (!%p262_p2), 112  }
   0x7   : > { %v3326_v8 = vpack.c.bf16 (!%p262_p2), %v324_v7, %v322_v6  ;;  %v326_v11 = vld [vmem:[%s4187_s3 + $0x20] sm:$0xff] (!%p262_p2)  ;;  %v3328_v12 = vpack.c.bf16 (!%p262_p2), %v329_v10, %v327_v9  ;;  %v328_v13 = vld [vmem:[%s4187_s3 + $0x30] sm:$0xff] (!%p262_p2)  ;;  %v331_v14 = vld [vmem:[%s4187_s3 + $0x48] sm:$0xff] (!%p262_p2)  ;;  %v3647_v32 = vshrl.u32 (!%p262_p2), %v317_v30, 7  ;;  %3092 = vmatprep.mubr.msk.f32.mxu1 (!%p262_p2), %vm3521_vm1, %v3520_v16  ;;  %s3523_s30 = smov (!%p262_p2), 48   ;;  %s3524_s9 = smov (!%p262_p2), 64  }
   0x8   : > { %3325 = vmatprep.subr.bf16.mxu0 (!%p262_p2), %v3324_v5  ;;  %v333_v15 = vld [vmem:[%s4187_s3 + $0x58] sm:$0xff] (!%p262_p2)  ;;  %v3330_v17 = vpack.c.bf16 (!%p262_p2), %v328_v13, %v326_v11  ;;  %v330_v19 = vld [vmem:[%s4187_s3 + $0x40] sm:$0xff] (!%p262_p2)  ;;  %v332_v20 = vld [vmem:[%s4187_s3 + $0x50] sm:$0xff] (!%p262_p2)  ;;  %vm423_vm2 = vcmask (!%p262_p2), 130048   ;;  %vm498_vm3 = vcmask (!%p262_p2), 64512   ;;  %s3525_s12 = smov (!%p262_p2), 32  }
   0x9   : > { %3327 = vmatpush1.bf16.msra.mxu0 (!%p262_p2), %v3326_v8  ;;  %v3332_v18 = vpack.c.bf16 (!%p262_p2), %v333_v15, %v331_v14  ;;  %v335_v21 = vld [vmem:[%s4187_s3 + $0x68] sm:$0xff] (!%p262_p2)  ;;  %v337_v22 = vld [vmem:[%s4187_s3 + $0x78] sm:$0xff] (!%p262_p2)  ;;  %v3334_v23 = vpack.c.bf16 (!%p262_p2), %v332_v20, %v330_v19  ;;  %v334_v25 = vld [vmem:[%s4187_s3 + $0x60] sm:$0xff] (!%p262_p2)  ;;  %v319_v33 = vsub.s32 (!%p262_p2), 0, %v3647_v32  ;;  %s3526_s15 = smov (!%p262_p2), 96   ;;  %v3527_v5 = vmov (!%p262_p2), 0.0|0.0  }
   0xa   : > { %3329 = vmatprep.subr.bf16.mxu0 (!%p262_p2), %v3328_v12  ;;  %v3336_v24 = vpack.c.bf16 (!%p262_p2), %v337_v22, %v335_v21  ;;  %v336_v26 = vld [vmem:[%s4187_s3 + $0x70] sm:$0xff] (!%p262_p2)  ;;  %v3653_v34 = vld [vmem:[%s4186_s2] sm:$0x3] (!%p262_p2)  ;;  %v3689_v44 = vld [vmem:[%s4185_s1 + $0x8] sm:$0xff] (!%p262_p2)  ;;  %s3529_s11 = smov (!%p262_p2), 16  }
   0xb   : > { %v3338_v27 = vpack.c.bf16 (!%p262_p2), %v336_v26, %v334_v25  ;;  %v320_v35 = vrot.slane (!%p262_p2), %v3653_v34, %v319_v33  ;;  %v3700_v55 = vld [vmem:[%s4185_s1] sm:$0xff] (!%p262_p2)  ;;  %v339_v7 = vld [vmem:[%s4188_s4 + $0x8] sm:$0xff] (!%p262_p2)  ;;  %v340_v10 = vld [vmem:[%s4188_s4 + $0x10] sm:$0xff] (!%p262_p2) }
   0xc   : > { %v338_v6 = vld [vmem:[%s4188_s4] sm:$0xff] (!%p262_p2)  ;;  %v341_v11 = vld [vmem:[%s4188_s4 + $0x18] sm:$0xff] (!%p262_p2) }
   0xd   : > { %s4194_s28 = smov (!%p293_p3, %s2877_s28), 1  ;;  %3331 = vmatpush1.bf16.msra.mxu0 %v3330_v17  ;;  %v3344_v8 = vpack.c.bf16 %v339_v7, %v338_v6  ;;  %v3341_v13 = vpack.c.bf16 %v341_v11, %v340_v10 }
   0xe   : > { %s2882_s29 = sshll.u32 %s4194_s28, 3  ;;  %3333 = vmatprep.subr.bf16.mxu0 %v3332_v18 }
   0xf   : > { %s296_s10 = scalar_lea.vmem %s4184_s0, %s2882_s29  ;;  %s300_s16 = scalar_lea.vmem %s4192_s8, %s2882_s29 }
  0x10   : > { %v3591_v0 = vld [vmem:[%s296_s10] sm:$0xff]  ;;  %s3528_s10 = smov 80  }
  0x11   : > { %v307_v1 = vmul.f32 %v3591_v0, %v3591_v0  ;;  %3335 = vmatpush1.bf16.msra.mxu0 %v3334_v23 }
  0x12   : > { %3337 = vmatprep.subr.bf16.mxu0 %v3336_v24  ;;  %v3744_v24 = vld [vmem:[%s4185_s1 + $0x10] sm:$0xff] }
  0x13   : > { %v309_v2 = vsel %vm308_vm0, %v307_v1, 0.0 }
  0x14   : > { %310 = vadd.xlane.f32.xlu0 %v309_v2 }
  0x15   : > { %3339 = vmatpush1.bf16.msra.mxu0 %v3338_v27 }
  0x16   : > { %3080 = vmatprep.subr.mxu0 %v3520_v16 }
  0xa1   : > { %v311_v28 = vpop.xlane.xlu0 %310 }
  0xa2   : > { %v313_v29 = vmul.f32 0.015625, %v311_v28 }
  0xa4   : > { %v314_v31 = vadd.f32 1e-06, %v313_v29 }
  0xa6   : > { %3470 = vrsqrt.f32 %v314_v31 }
  0xb0   : > { %v3471_v36 = vpop.eup %3470 }
  0xb1   : > { %v316_v37 = vmul.f32 %v3471_v36, %v3591_v0 }
  0xb3   : > { %v321_v38 = vmul.f32 %v320_v35, %v316_v37 }
  0xb5   : > { %2884 = vmatmul.mubr.msk.f32.vlgmr.msra.gmra.mrb[0].mxu0 %vm308_vm0, %v321_v38 }
  0xb6   : > { %3082 = vmatprep.mubr.msk.f32.mxu0 %vm3521_vm1, %v3520_v16 }
 0x188   : > { %v3664_v39 = vpop.f32.mrb[0].mxu0 }
 0x189   : > { %583 = vrot.lane.b32.xlu1 %v3664_v39, %s3522_s26  ;;  %585 = vrot.lane.b32.xlu0 %v3664_v39, %s3523_s30  ;;  %v3670_v40 = vpop.f32.mrb[1].mxu0 }
 0x18d   : > { %421 = vrot.lane.b32.xlu1 %v3664_v39, %s3524_s9 }
 0x1fb   : > { %v584_v41 = vpop.permute.xlu1 %583  ;;  %v586_v42 = vpop.permute.xlu0 %585 }
 0x1fc   : > { %3091 = vmatpush3.xpose.msk.msra.mxu1 %vm423_vm2, %v586_v42 }
 0x1fd   : > { %3095 = vmatprep.subr.mxu1 %v3520_v16 }
 0x1ff   : > { %v422_v43 = vpop.permute.xlu1 %421  ;;  %3093 = vmatmul.mubr.msk.f32.vlgmr.msra.gmra.mrb[0].mxu1 %vm423_vm2, %v584_v41 }
 0x200   : > { %3081 = vmatpush3.xpose.msk.msra.mxu0 %vm423_vm2, %v422_v43  ;;  %3097 = vmatprep.mubr.msk.f32.mxu1 %vm3521_vm1, %v3520_v16  ;;  %v342_v43 = vld [vmem:[%s4188_s4 + $0x20] sm:$0xff] }
 0x201   : > { %3085 = vmatprep.subr.mxu0 %v3520_v16 }
 0x203   : > { %3083 = vmatmul.mubr.msk.f32.vlgmr.msra.gmra.mrb[2].mxu0 %vm423_vm2, %v3664_v39 }
 0x204   : > { %3086 = vmatpush3.msra.mxu0 %v3670_v40  ;;  %3087 = vmatprep.mubr.msk.f32.mxu0 %vm3521_vm1, %v3520_v16 }
 0x205   : > { %3340 = vmatprep.subr.bf16.mxu0 %v3527_v5 }
 0x2d2   : > { %v657_v45 = vpop.f32.mrb[0].mxu1 }
 0x2d3   : > { %v658_v46 = vadd.f32 %v657_v45, %v3689_v44  ;;  %v3094_v47 = vpop.f32.mrb[1].mxu1  ;;  %v343_v45 = vld [vmem:[%s4188_s4 + $0x28] sm:$0xff] }
 0x2d5   : > { %v661_v48 = vsel %vm498_vm3, %v658_v46, -inf }
 0x2d6   : > { %662 = vmax.xlane.f32.xlu1 %v661_v48  ;;  %v494_v49 = vpop.f32.mrb[2].mxu0 }
 0x2d7   : > { %v3084_v50 = vpop.f32.mrb[3].mxu0  ;;  %v495_v57 = vadd.f32 %v494_v49, %v3700_v55 }
 0x2d9   : > { %v499_v59 = vsel %vm498_vm3, %v495_v57, -inf }
 0x2e7   : > { %673 = vrot.lane.b32.xlu1 %v3670_v40, %s3522_s26 }
 0x2eb   : > { %897 = vrot.lane.b32.xlu1 %v3664_v39, %s3525_s12 }
 0x363   : > { %v663_v51 = vpop.xlane.xlu1 %662 }
 0x364   : > { %v664_v52 = vsub.f32 %v658_v46, %v663_v51  ;;  %v3347_v46 = vpack.c.bf16 %v343_v45, %v342_v43  ;;  %v1473_v43 = vld [vmem:[%s4190_s6 + $0x20] sm:$0xff]  ;;  %v1474_v45 = vld [vmem:[%s4190_s6 + $0x28] sm:$0xff] }
 0x366   : > { %v665_v53 = vmul.f32 1.442695, %v664_v52 }
 0x367   : > { %v674_v54 = vpop.permute.xlu1 %673 }
 0x368   : > { %3472 = vpow2.f32 %v665_v53  ;;  %3096 = vmatpush3.msra.mxu1 %v674_v54  ;;  %v3775_v53 = vld [vmem:[%s4185_s1 + $0x18] sm:$0xff] }
 0x369   : > { %3343 = vmatprep.subr.bf16.mxu1 %v3527_v5 }
 0x36b   : > { %v898_v17 = vpop.permute.xlu1 %897 }
 0x372   : > { %v3473_v56 = vpop.eup %3472 }
 0x373   : > { %v667_v58 = vsel %vm498_vm3, %v3473_v56, 0.0 }
 0x374   : > { %668 = vadd.xlane.f32.xlu0 %v667_v58 }
 0x378   : > { %500 = vmax.xlane.f32.xlu0 %v499_v59 }
 0x401   : > { %v669_v60 = vpop.xlane.xlu0 %668 }
 0x402   : > { %3474 = vrcp.f32 %v669_v60 }
 0x405   : > { %v501_v61 = vpop.xlane.xlu0 %500 }
 0x406   : > { %v502_v62 = vsub.f32 %v495_v57, %v501_v61 }
 0x408   : > { %v503_v63 = vmul.f32 1.442695, %v502_v62 }
 0x40a   : > { %3476 = vpow2.f32 %v503_v63 }
 0x40c   : > { %v3475_v1 = vpop.eup %3474 }
 0x40d   : > { %v671_v2 = vmul.f32 %v3475_v1, %v3473_v56 }
 0x40f   : > { %3098 = vmatmul.mubr.msk.f32.vlgmr.msra.gmra.mrb[2].mxu1 %vm498_vm3, %v671_v2  ;;  %v344_v2 = vld [vmem:[%s4188_s4 + $0x30] sm:$0xff] }
 0x410   : > { %3111 = vmatprep.mubr.msk.f32.mxu1 %vm3521_vm1, %v3520_v16  ;;  %3345 = vmatpush3.bf16.msra.mxu1 %v3344_v8 }
 0x411   : > { %3119 = vmatprep.subr.mxu1 %v3520_v16 }
 0x414   : > { %v3477_v3 = vpop.eup %3476 }
 0x415   : > { %v505_v4 = vsel %vm498_vm3, %v3477_v3, 0.0 }
 0x416   : > { %506 = vadd.xlane.f32.xlu0 %v505_v4 }
 0x42c   : > { %895 = vrot.lane.b32.xlu0 %v3664_v39, %s3526_s15 }
 0x4a3   : > { %v507_v9 = vpop.xlane.xlu0 %506 }
 0x4a4   : > { %3478 = vrcp.f32 %v507_v9 }
 0x4a7   : > { %v896_v19 = vpop.permute.xlu0 %895 }
 0x4ae   : > { %v3479_v12 = vpop.eup %3478 }
 0x4af   : > { %v509_v14 = vmul.f32 %v3479_v12, %v3477_v3 }
 0x4b1   : > { %3088 = vmatmul.mubr.msk.f32.vlgmr.msra.gmra.mrb[4].mxu0 %vm498_vm3, %v509_v14 }
 0x4b2   : > { %3342 = vmatpush3.bf16.msra.mxu0 %v3341_v13  ;;  %3104 = vmatprep.mubr.msk.f32.mxu0 %vm3521_vm1, %v3520_v16 }
 0x4b3   : > { %3114 = vmatprep.subr.mxu0 %v3520_v16 }
 0x4e2   : > { %v745_v15 = vpop.f32.mrb[2].mxu1 }
 0x4e3   : > { %v3099_v18 = vpop.f32.mrb[3].mxu1  ;;  %3105 = vmatmul.mubr.msk.f32.vlgmr.msra.gmra.mrb[6].mxu0 %vm423_vm2, %v745_v15 }
 0x4e4   : > { %3115 = vmatpush3.xpose.msk.msra.mxu0 %vm423_vm2, %v898_v17  ;;  %3116 = vmatprep.mubr.msk.f32.mxu0 %vm3521_vm1, %v3520_v16 }
 0x4e5   : > { %3346 = vmatprep.subr.bf16.mxu0 %v3527_v5 }
 0x4e7   : > { %3117 = vmatmul.mubr.msk.f32.vlgmr.msra.gmra.mrb[8].mxu0 %vm423_vm2, %v896_v19 }
 0x4e8   : > { %3128 = vmatprep.mubr.msk.f32.mxu0 %vm3521_vm1, %v3520_v16  ;;  %3348 = vmatpush3.bf16.msra.mxu0 %v3347_v46  ;;  %v3371_v46 = vpack.c.bf16 %v1474_v45, %v1473_v43  ;;  %v2917_v43 = vld [vmem:[%s4187_s3 + $0xf0] sm:$0xff] }
 0x4e9   : > { %3136 = vmatprep.subr.mxu0 %v3520_v16 }
 0x584   : > { %v579_v20 = vpop.f32.mrb[4].mxu0 }
 0x585   : > { %v3089_v21 = vpop.f32.mrb[5].mxu0  ;;  %3112 = vmatmul.mubr.msk.f32.vlgmr.msra.gmra.mrb[4].mxu1 %vm423_vm2, %v579_v20  ;;  %v1387_v20 = vld [vmem:[%s4189_s5] sm:$0xff] }
 0x586   : > { %3121 = vmatprep.mubr.msk.f32.mxu1 %vm3521_vm1, %v3520_v16  ;;  %v1388_v21 = vld [vmem:[%s4189_s5 + $0x8] sm:$0xff] }
 0x5b6   : > { %v818_v22 = vpop.f32.mrb[6].mxu0 }
 0x5b7   : > { %v3106_v23 = vpop.f32.mrb[7].mxu0 }
 0x5b8   : > { %v1390_v23 = vld [vmem:[%s4189_s5 + $0x18] sm:$0xff] }
 0x5ba   : > { %v969_v25 = vpop.f32.mrb[8].mxu0 }
 0x5bb   : > { %v970_v26 = vadd.f32 %v969_v25, %v3744_v24  ;;  %v3118_v27 = vpop.f32.mrb[9].mxu0 }
 0x5bc   : > { %v1392_v27 = vld [vmem:[%s4189_s5 + $0x28] sm:$0xff] }
 0x5bd   : > { %v973_v28 = vsel %vm498_vm3, %v970_v26, -inf }
 0x5be   : > { %974 = vmax.xlane.f32.xlu1 %v973_v28 }
 0x5cf   : > { %984 = vrot.lane.b32.xlu1 %v3670_v40, %s3526_s15 }
 0x5d3   : > { %1134 = vrot.lane.b32.xlu1 %v3664_v39, %s3528_s10 }
 0x64b   : > { %v975_v29 = vpop.xlane.xlu1 %974 }
 0x64c   : > { %v976_v30 = vsub.f32 %v970_v26, %v975_v29  ;;  %v1391_v26 = vld [vmem:[%s4189_s5 + $0x20] sm:$0xff]  ;;  %v1393_v29 = vld [vmem:[%s4189_s5 + $0x30] sm:$0xff] }
 0x64d   : > { %v3359_v28 = vpack.c.bf16 %v1392_v27, %v1391_v26  ;;  %v2909_v26 = vld [vmem:[%s4187_s3 + $0xb0] sm:$0xff] }
 0x64e   : > { %v977_v31 = vmul.f32 1.442695, %v976_v30  ;;  %v1394_v30 = vld [vmem:[%s4189_s5 + $0x38] sm:$0xff] }
 0x64f   : > { %v985_v35 = vpop.permute.xlu1 %984 }
 0x650   : > { %3480 = vpow2.f32 %v977_v31  ;;  %3120 = vmatpush3.msra.mxu1 %v985_v35  ;;  %v3362_v31 = vpack.c.bf16 %v1394_v30, %v1393_v29  ;;  %v1469_v35 = vld [vmem:[%s4190_s6] sm:$0xff]  ;;  %v2914_v29 = vld [vmem:[%s4187_s3 + $0xd8] sm:$0xff] }
 0x651   : > { %3131 = vmatprep.subr.mxu1 %v3520_v16 }
 0x658   : > { %v891_v36 = vpop.f32.mrb[4].mxu1 }
 0x659   : > { %v892_v37 = vadd.f32 %v891_v36, %v818_v22  ;;  %v3113_v38 = vpop.f32.mrb[5].mxu1  ;;  %v3353_v22 = vpack.c.bf16 %v1388_v21, %v1387_v20  ;;  %v1470_v36 = vld [vmem:[%s4190_s6 + $0x8] sm:$0xff]  ;;  %v2905_v20 = vld [vmem:[%s4187_s3 + $0x90] sm:$0xff] }
 0x65a   : > { %v3481_v41 = vpop.eup %3480  ;;  %v3365_v38 = vpack.c.bf16 %v1470_v36, %v1469_v35  ;;  %v2913_v35 = vld [vmem:[%s4187_s3 + $0xd0] sm:$0xff] }
 0x65b   : > { %v979_v42 = vsel %vm498_vm3, %v3481_v41, 0.0 }
 0x65c   : > { %980 = vadd.xlane.f32.xlu0 %v979_v42 }
 0x672   : > { %1136 = vrot.lane.b32.xlu0 %v3664_v39, %s3529_s11  ;;  %v1135_v39 = vpop.permute.xlu1 %1134 }
 0x6e9   : > { %v981_v47 = vpop.xlane.xlu0 %980 }
 0x6ea   : > { %3482 = vrcp.f32 %v981_v47  ;;  %v1475_v47 = vld [vmem:[%s4190_s6 + $0x30] sm:$0xff] }
 0x6ed   : > { %v1137_v50 = vpop.permute.xlu0 %1136 }
 0x6f4   : > { %v3483_v48 = vpop.eup %3482 }
 0x6f5   : > { %v983_v49 = vmul.f32 %v3483_v48, %v3481_v41  ;;  %v1472_v41 = vld [vmem:[%s4190_s6 + $0x18] sm:$0xff] }
 0x6f6   : > { %v1476_v48 = vld [vmem:[%s4190_s6 + $0x38] sm:$0xff] }
 0x6f7   : > { %3122 = vmatmul.mubr.msk.f32.vlgmr.msra.gmra.mrb[6].mxu1 %vm498_vm3, %v983_v49  ;;  %v3374_v49 = vpack.c.bf16 %v1476_v48, %v1475_v47 }
 0x6f8   : > { %3132 = vmatpush3.xpose.msk.msra.mxu1 %vm423_vm2, %v1137_v50  ;;  %3133 = vmatprep.mubr.msk.f32.mxu1 %vm3521_vm1, %v3520_v16  ;;  %v1477_v50 = vld [vmem:[%s4190_s6 + $0x40] sm:$0xff] }
 0x6f9   : > { %3349 = vmatprep.subr.bf16.mxu1 %v3527_v5 }
 0x6fb   : > { %3134 = vmatmul.mubr.msk.f32.vlgmr.msra.gmra.mrb[8].mxu1 %vm423_vm2, %v1135_v39  ;;  %v1478_v39 = vld [vmem:[%s4190_s6 + $0x48] sm:$0xff] }
 0x6fc   : > { %3145 = vmatprep.mubr.msk.f32.mxu1 %vm3521_vm1, %v3520_v16 }
 0x7ca   : > { %v1056_v51 = vpop.f32.mrb[6].mxu1 }
 0x7cb   : > { %v3123_v52 = vpop.f32.mrb[7].mxu1  ;;  %3129 = vmatmul.mubr.msk.f32.vlgmr.msra.gmra.mrb[10].mxu0 %vm423_vm2, %v1056_v51  ;;  %v3377_v51 = vpack.c.bf16 %v1478_v39, %v1477_v50 }
 0x7cc   : > { %3138 = vmatprep.mubr.msk.f32.mxu0 %vm3521_vm1, %v3520_v16  ;;  %v1479_v52 = vld [vmem:[%s4190_s6 + $0x50] sm:$0xff] }
 0x7ce   : > { %v1208_v54 = vpop.f32.mrb[8].mxu1 }
 0x7cf   : > { %v1209_v56 = vadd.f32 %v1208_v54, %v3775_v53  ;;  %v3135_v57 = vpop.f32.mrb[9].mxu1  ;;  %v1480_v54 = vld [vmem:[%s4190_s6 + $0x58] sm:$0xff] }
 0x7d0   : > { %v1481_v57 = vld [vmem:[%s4190_s6 + $0x60] sm:$0xff] }
 0x7d1   : > { %v1212_v58 = vsel %vm498_vm3, %v1209_v56, -inf }
 0x7d2   : > { %1213 = vmax.xlane.f32.xlu1 %v1212_v58  ;;  %v1482_v58 = vld [vmem:[%s4190_s6 + $0x68] sm:$0xff] }
 0x7e3   : > { %1223 = vrot.lane.b32.xlu1 %v3670_v40, %s3528_s10  ;;  %v345_v40 = vld [vmem:[%s4188_s4 + $0x38] sm:$0xff] }
 0x7e4   : > { %v3350_v3 = vpack.c.bf16 %v345_v40, %v344_v2 }
 0x7e6   : > { %3351 = vmatpush3.bf16.msra.mxu1 %v3350_v3 }
 0x7e7   : > { %3364 = vmatprep.subr.bf16.mxu1 %v3527_v5 }
 0x85f   : > { %v1214_v59 = vpop.xlane.xlu1 %1213 }
 0x860   : > { %v1215_v60 = vsub.f32 %v1209_v56, %v1214_v59  ;;  %v3380_v56 = vpack.c.bf16 %v1480_v54, %v1479_v52  ;;  %v3383_v59 = vpack.c.bf16 %v1482_v58, %v1481_v57 }
 0x862   : > { %v1216_v61 = vmul.f32 1.442695, %v1215_v60 }
 0x863   : > { %v1224_v62 = vpop.permute.xlu1 %1223 }
 0x864   : > { %3484 = vpow2.f32 %v1216_v61  ;;  %3137 = vmatpush3.msra.mxu0 %v1224_v62 }
 0x865   : > { %3352 = vmatprep.subr.bf16.mxu0 %v3527_v5 }
 0x86e   : > { %v3485_v63 = vpop.eup %3484 }
 0x86f   : > { %v1218_v1 = vsel %vm498_vm3, %v3485_v63, 0.0 }
 0x870   : > { %1219 = vadd.xlane.f32.xlu0 %v1218_v1 }
 0x89e   : > { %v1129_v4 = vpop.f32.mrb[10].mxu0 }
 0x89f   : > { %v1133_v6 = vadd.f32 %v1129_v4, %v892_v37  ;;  %v3130_v7 = vpop.f32.mrb[11].mxu0  ;;  %v1471_v37 = vld [vmem:[%s4190_s6 + $0x10] sm:$0xff] }
 0x8a0   : > { %v3368_v42 = vpack.c.bf16 %v1472_v41, %v1471_v37  ;;  %v1483_v4 = vld [vmem:[%s4190_s6 + $0x70] sm:$0xff]  ;;  %v2916_v37 = vld [vmem:[%s4187_s3 + $0xe8] sm:$0xff] }
 0x8fd   : > { %v1220_v8 = vpop.xlane.xlu0 %1219 }
 0x8fe   : > { %3486 = vrcp.f32 %v1220_v8 }
 0x908   : > { %v3487_v9 = vpop.eup %3486 }
 0x909   : > { %v1222_v10 = vmul.f32 %v3487_v9, %v3485_v63  ;;  %v1384_v63 = vsub.s32 1, %v3647_v32 }
 0x90b   : > { %3139 = vmatmul.mubr.msk.f32.vlgmr.msra.gmra.mrb[12].mxu0 %vm498_vm3, %v1222_v10  ;;  %v1385_v1 = vrot.slane %v3653_v34, %v1384_v63 }
 0x90c   : > { %3164 = vmatprep.mubr.msk.f32.mxu0 %vm3521_vm1, %v3520_v16  ;;  %3354 = vmatpush3.bf16.msra.mxu0 %v3353_v22  ;;  %v2908_v22 = vld [vmem:[%s4187_s3 + $0xa8] sm:$0xff] }
 0x90d   : > { %3355 = vmatprep.subr.bf16.mxu0 %v3527_v5 }
 0x9de   : > { %v1295_v11 = vpop.f32.mrb[12].mxu0 }
 0x9df   : > { %v3140_v12 = vpop.f32.mrb[13].mxu0  ;;  %3146 = vmatmul.mubr.msk.f32.vlgmr.msra.gmra.mrb[10].mxu1 %vm423_vm2, %v1295_v11 }
 0x9e0   : > { %3199 = vmatprep.mubr.msk.f32.mxu1 %vm3521_vm1, %v3520_v16  ;;  %3366 = vmatpush3.bf16.msra.mxu1 %v3365_v38  ;;  %v2918_v38 = vld [vmem:[%s4187_s3 + $0xf8] sm:$0xff] }
 0x9e1   : > { %3367 = vmatprep.subr.bf16.mxu1 %v3527_v5  ;;  %v3400_v41 = vpack.c.bf16 %v2918_v38, %v2916_v37 }
 0x9e4   : > { %3369 = vmatpush3.bf16.msra.mxu1 %v3368_v42  ;;  %v2915_v42 = vld [vmem:[%s4187_s3 + $0xe0] sm:$0xff] }
 0x9e5   : > { %3370 = vmatprep.subr.bf16.mxu1 %v3527_v5  ;;  %v3402_v45 = vpack.c.bf16 %v2917_v43, %v2915_v42 }
 0x9e8   : > { %3372 = vmatpush3.bf16.msra.mxu1 %v3371_v46 }
 0x9e9   : > { %3373 = vmatprep.subr.bf16.mxu1 %v3527_v5 }
 0x9ec   : > { %3375 = vmatpush3.bf16.msra.mxu1 %v3374_v49  ;;  %v3954_v49 = vld [vmem:[%s4186_s2 + $0x2] sm:$0x3] }
 0x9ed   : > { %3376 = vmatprep.subr.bf16.mxu1 %v3527_v5  ;;  %v1569_v50 = vrot.slane %v3954_v49, %v319_v33 }
 0x9f0   : > { %3378 = vmatpush3.bf16.msra.mxu1 %v3377_v51 }
 0x9f1   : > { %3379 = vmatprep.subr.bf16.mxu1 %v3527_v5 }
 0x9f4   : > { %3381 = vmatpush3.bf16.msra.mxu1 %v3380_v56 }
 0x9f5   : > { %3382 = vmatprep.subr.bf16.mxu1 %v3527_v5 }
 0x9f8   : > { %3384 = vmatpush3.bf16.msra.mxu1 %v3383_v59 }
 0x9f9   : > { %3385 = vmatprep.subr.bf16.mxu1 %v3527_v5 }
 0xab2   : > { %v1368_v13 = vpop.f32.mrb[10].mxu1 }
 0xab3   : > { %v1372_v14 = vadd.f32 %v1368_v13, %v1133_v6  ;;  %v3147_v15 = vpop.f32.mrb[11].mxu1  ;;  %v1484_v6 = vld [vmem:[%s4190_s6 + $0x78] sm:$0xff] }
 0xab4   : > { %v3386_v7 = vpack.c.bf16 %v1484_v6, %v1483_v4  ;;  %v2904_v15 = vld [vmem:[%s4187_s3 + $0x88] sm:$0xff] }
 0xab5   : > { %v3799_v17 = vadd.f32 %v1372_v14, %v3591_v0  ;;  %v1389_v0 = vld [vmem:[%s4189_s5 + $0x10] sm:$0xff] }
 0xab6   : > { %v3356_v25 = vpack.c.bf16 %v1390_v23, %v1389_v0  ;;  %3387 = vmatpush3.bf16.msra.mxu1 %v3386_v7  ;;  %v2910_v0 = vld [vmem:[%s4187_s3 + $0xb8] sm:$0xff] }
 0xab7   : > { %v1374_v18 = vmul.f32 %v3799_v17, %v3799_v17  ;;  %3207 = vmatprep.subr.mxu1 %v3520_v16  ;;  %v3392_v23 = vpack.c.bf16 %v2910_v0, %v2908_v22  ;;  %v2920_v22 = vld [vmem:[%s4188_s4 + $0x48] sm:$0xff] }
 0xab8   : > { %3357 = vmatpush3.bf16.msra.mxu0 %v3356_v25  ;;  %v2907_v25 = vld [vmem:[%s4187_s3 + $0xa0] sm:$0xff] }
 0xab9   : > { %v1375_v19 = vsel %vm308_vm0, %v1374_v18, 0.0  ;;  %3358 = vmatprep.subr.bf16.mxu0 %v3527_v5  ;;  %v2906_v18 = vld [vmem:[%s4187_s3 + $0x98] sm:$0xff]  ;;  %v3394_v27 = vpack.c.bf16 %v2909_v26, %v2907_v25 }
 0xaba   : > { %1376 = vadd.xlane.f32.xlu0 %v1375_v19  ;;  %v3388_v19 = vpack.c.bf16 %v2906_v18, %v2904_v15 }
 0xabc   : > { %3360 = vmatpush3.bf16.msra.mxu0 %v3359_v28  ;;  %v2912_v28 = vld [vmem:[%s4187_s3 + $0xc8] sm:$0xff] }
 0xabd   : > { %3361 = vmatprep.subr.bf16.mxu0 %v3527_v5  ;;  %v3396_v30 = vpack.c.bf16 %v2914_v29, %v2912_v28 }
 0xac0   : > { %3363 = vmatpush3.bf16.msra.mxu0 %v3362_v31  ;;  %v2911_v31 = vld [vmem:[%s4187_s3 + $0xc0] sm:$0xff] }
 0xac1   : > { %3389 = vmatprep.subr.bf16.mxu0 %v3388_v19  ;;  %v3398_v36 = vpack.c.bf16 %v2913_v35, %v2911_v31 }
 0xb47   : > { %v1377_v60 = vpop.xlane.xlu0 %1376 }
 0xb48   : > { %v1378_v61 = vmul.f32 0.015625, %v1377_v60 }
 0xb4a   : > { %v1379_v62 = vadd.f32 1e-06, %v1378_v61 }
 0xb4c   : > { %3488 = vrsqrt.f32 %v1379_v62 }
 0xb56   : > { %v3489_v2 = vpop.eup %3488 }
 0xb57   : > { %v1381_v40 = vmul.f32 %v3489_v2, %v3799_v17 }
 0xb59   : > { %v1386_v3 = vmul.f32 %v1385_v1, %v1381_v40 }
 0xb5b   : > { %3165 = vmatmul.mubr.msk.f32.vlgmr.msra.gmra.mrb[14].mxu0 %vm308_vm0, %v1386_v3 }
 0xb5c   : > { %1664 = vmatprep.mubr.f32.mxu0 %v3520_v16 }
 0xc2e   : > { %v1464_v34 = vpop.f32.mrb[14].mxu0 }
 0xc2f   : > { %v1468_v8 = vmax.f32 %v1464_v34, 0.0  ;;  %v3166_v9 = vpop.f32.mrb[15].mxu0 }
 0xc31   : > { %3200 = vmatmul.mubr.f32.vlgmr.msra.gmra.mrb[12].mxu1 %v1468_v8 }
 0xc32   : > { %3209 = vmatprep.mubr.msk.f32.mxu1 %vm3521_vm1, %v3520_v16 }
 0xd04   : > { %v1551_v10 = vpop.f32.mrb[12].mxu1 }
 0xd05   : > { %v3897_v11 = vadd.f32 %v1551_v10, %v3799_v17  ;;  %v3201_v12 = vpop.f32.mrb[13].mxu1  ;;  %v2903_v17 = vld [vmem:[%s4187_s3 + $0x80] sm:$0xff] }
 0xd06   : > { %v3390_v21 = vpack.c.bf16 %v2905_v20, %v2903_v17 }
 0xd07   : > { %v1558_v13 = vmul.f32 %v3897_v11, %v3897_v11 }
 0xd08   : > { %3391 = vmatpush1.bf16.msra.mxu0 %v3390_v21  ;;  %v2919_v21 = vld [vmem:[%s4188_s4 + $0x40] sm:$0xff] }
 0xd09   : > { %v1559_v14 = vsel %vm308_vm0, %v1558_v13, 0.0  ;;  %3393 = vmatprep.subr.bf16.mxu0 %v3392_v23  ;;  %v2921_v13 = vld [vmem:[%s4188_s4 + $0x50] sm:$0xff]  ;;  %v3408_v25 = vpack.c.bf16 %v2920_v22, %v2919_v21 }
 0xd0a   : > { %1560 = vadd.xlane.f32.xlu0 %v1559_v14  ;;  %v2922_v14 = vld [vmem:[%s4188_s4 + $0x58] sm:$0xff] }
 0xd0b   : > { %v3405_v15 = vpack.c.bf16 %v2922_v14, %v2921_v13 }
 0xd0c   : > { %3395 = vmatpush1.bf16.msra.mxu0 %v3394_v27 }
 0xd0d   : > { %3397 = vmatprep.subr.bf16.mxu0 %v3396_v30 }
 0xd10   : > { %3399 = vmatpush1.bf16.msra.mxu0 %v3398_v36 }
 0xd11   : > { %3401 = vmatprep.subr.bf16.mxu0 %v3400_v41 }
 0xd14   : > { %3403 = vmatpush1.bf16.msra.mxu0 %v3402_v45 }
 0xd15   : > { %3202 = vmatprep.subr.mxu0 %v3520_v16 }
 0xd97   : > { %v1561_v46 = vpop.xlane.xlu0 %1560 }
 0xd98   : > { %v1562_v47 = vmul.f32 0.015625, %v1561_v46 }
 0xd9a   : > { %v1563_v48 = vadd.f32 1e-06, %v1562_v47 }
 0xd9c   : > { %3490 = vrsqrt.f32 %v1563_v48 }
 0xda6   : > { %v3491_v39 = vpop.eup %3490 }
 0xda7   : > { %v1565_v51 = vmul.f32 %v3491_v39, %v3897_v11 }
 0xda9   : > { %v1570_v52 = vmul.f32 %v1569_v50, %v1565_v51 }
 0xdab   : > { %2927 = vmatmul.mubr.msk.f32.vlgmr.msra.gmra.mrb[16].mxu0 %vm308_vm0, %v1570_v52 }
 0xdac   : > { %3204 = vmatprep.mubr.msk.f32.mxu0 %vm3521_vm1, %v3520_v16 }
 0xe7e   : > { %v3963_v54 = vpop.f32.mrb[16].mxu0 }
 0xe7f   : > { %1834 = vrot.lane.b32.xlu0 %v3963_v54, %s3523_s30  ;;  %1672 = vrot.lane.b32.xlu1 %v3963_v54, %s3524_s9  ;;  %v3969_v56 = vpop.f32.mrb[17].mxu0 }
 0xe80   : > { %3208 = vmatpush3.msra.mxu1 %v3969_v56 }
 0xe81   : > { %3217 = vmatprep.subr.mxu1 %v3520_v16 }
 0xe83   : > { %1832 = vrot.lane.b32.xlu1 %v3963_v54, %s3522_s26 }
 0xef1   : > { %v1673_v33 = vpop.permute.xlu1 %1672  ;;  %v1835_v57 = vpop.permute.xlu0 %1834 }
 0xef2   : > { %3203 = vmatpush3.xpose.msk.msra.mxu0 %vm423_vm2, %v1673_v33  ;;  %v2923_v33 = vld [vmem:[%s4188_s4 + $0x60] sm:$0xff] }
 0xef3   : > { %3212 = vmatprep.subr.mxu0 %v3520_v16 }
 0xef5   : > { %3205 = vmatmul.mubr.msk.f32.vlgmr.msra.gmra.mrb[18].mxu0 %vm423_vm2, %v3963_v54  ;;  %v1833_v58 = vpop.permute.xlu1 %1832 }
 0xef6   : > { %3213 = vmatpush3.xpose.msk.msra.mxu0 %vm423_vm2, %v1835_v57  ;;  %3214 = vmatprep.mubr.msk.f32.mxu0 %vm3521_vm1, %v3520_v16  ;;  %v2924_v57 = vld [vmem:[%s4188_s4 + $0x68] sm:$0xff] }
 0xef7   : > { %3404 = vmatprep.subr.bf16.mxu0 %v3527_v5 }
 0xef9   : > { %3215 = vmatmul.mubr.msk.f32.vlgmr.msra.gmra.mrb[20].mxu0 %vm423_vm2, %v1833_v58  ;;  %v3411_v58 = vpack.c.bf16 %v2924_v57, %v2923_v33  ;;  %v2961_v57 = vld [vmem:[%s4190_s6 + $0xc0] sm:$0xff] }
 0xefa   : > { %3226 = vmatprep.mubr.msk.f32.mxu0 %vm3521_vm1, %v3520_v16  ;;  %3406 = vmatpush3.bf16.msra.mxu0 %v3405_v15 }
 0xefb   : > { %3236 = vmatprep.subr.mxu0 %v3520_v16 }
 0xfc8   : > { %v1744_v59 = vpop.f32.mrb[18].mxu0 }
 0xfc9   : > { %v1745_v60 = vadd.f32 %v1744_v59, %v3700_v55  ;;  %v3206_v61 = vpop.f32.mrb[19].mxu0 }
 0xfcb   : > { %v1748_v62 = vsel %vm498_vm3, %v1745_v60, -inf }
 0xfcc   : > { %1749 = vmax.xlane.f32.xlu1 %v1748_v62  ;;  %v1906_v1 = vpop.f32.mrb[20].mxu0 }
 0xfcd   : > { %v1907_v2 = vadd.f32 %v1906_v1, %v3689_v44  ;;  %v3216_v40 = vpop.f32.mrb[21].mxu0 }
 0xfcf   : > { %v1910_v3 = vsel %vm498_vm3, %v1907_v2, -inf }
 0xfd0   : > { %1911 = vmax.xlane.f32.xlu0 %v1910_v3 }
 0xfe6   : > { %2146 = vrot.lane.b32.xlu0 %v3963_v54, %s3525_s12 }
0x1059   : > { %v1750_v4 = vpop.xlane.xlu1 %1749 }
0x105a   : > { %v1751_v6 = vsub.f32 %v1745_v60, %v1750_v4 }
0x105c   : > { %v1752_v7 = vmul.f32 1.442695, %v1751_v6 }
0x105d   : > { %v1912_v34 = vpop.xlane.xlu0 %1911 }
0x105e   : > { %3492 = vpow2.f32 %v1752_v7  ;;  %v1913_v55 = vsub.f32 %v1907_v2, %v1912_v34 }
0x1060   : > { %v1914_v8 = vmul.f32 1.442695, %v1913_v55 }
0x1061   : > { %v2147_v30 = vpop.permute.xlu0 %2146 }
0x1062   : > { %3494 = vpow2.f32 %v1914_v8 }
0x1068   : > { %v3493_v9 = vpop.eup %3492 }
0x1069   : > { %v1754_v10 = vsel %vm498_vm3, %v3493_v9, 0.0 }
0x106a   : > { %1755 = vadd.xlane.f32.xlu1 %v1754_v10  ;;  %v2925_v10 = vld [vmem:[%s4188_s4 + $0x70] sm:$0xff] }
0x106c   : > { %v3495_v44 = vpop.eup %3494 }
0x106d   : > { %v1916_v12 = vsel %vm498_vm3, %v3495_v44, 0.0 }
0x106e   : > { %1917 = vadd.xlane.f32.xlu1 %v1916_v12 }
0x107f   : > { %1922 = vrot.lane.b32.xlu1 %v3969_v56, %s3522_s26 }
0x1083   : > { %2144 = vrot.lane.b32.xlu1 %v3963_v54, %s3526_s15 }
0x10f7   : > { %v1756_v18 = vpop.xlane.xlu1 %1755 }
0x10f8   : > { %3496 = vrcp.f32 %v1756_v18 }
0x10fb   : > { %v1918_v19 = vpop.xlane.xlu1 %1917 }
0x10fc   : > { %3498 = vrcp.f32 %v1918_v19 }
0x10ff   : > { %v1923_v0 = vpop.permute.xlu1 %1922 }
0x1102   : > { %v3497_v17 = vpop.eup %3496 }
0x1103   : > { %v1758_v20 = vmul.f32 %v3497_v17, %v3493_v9  ;;  %v2145_v35 = vpop.permute.xlu1 %2144 }
0x1105   : > { %3210 = vmatmul.mubr.msk.f32.vlgmr.msra.gmra.mrb[14].mxu1 %vm498_vm3, %v1758_v20 }
0x1106   : > { %v3499_v23 = vpop.eup %3498  ;;  %3218 = vmatpush3.msra.mxu1 %v1923_v0  ;;  %3219 = vmatprep.mubr.msk.f32.mxu1 %vm3521_vm1, %v3520_v16 }
0x1107   : > { %v1920_v26 = vmul.f32 %v3499_v23, %v3495_v44  ;;  %3407 = vmatprep.subr.bf16.mxu1 %v3527_v5 }
0x1109   : > { %3220 = vmatmul.mubr.msk.f32.vlgmr.msra.gmra.mrb[16].mxu1 %vm498_vm3, %v1920_v26 }
0x110a   : > { %3409 = vmatpush3.bf16.msra.mxu1 %v3408_v25  ;;  %3233 = vmatprep.mubr.msk.f32.mxu1 %vm3521_vm1, %v3520_v16 }
0x110b   : > { %3241 = vmatprep.subr.mxu1 %v3520_v16 }
0x11d8   : > { %v1828_v27 = vpop.f32.mrb[14].mxu1 }
0x11d9   : > { %v3211_v28 = vpop.f32.mrb[15].mxu1  ;;  %3234 = vmatmul.mubr.msk.f32.vlgmr.msra.gmra.mrb[18].mxu1 %vm423_vm2, %v1828_v27  ;;  %v2944_v27 = vld [vmem:[%s4189_s5 + $0x40] sm:$0xff] }
0x11da   : > { %3243 = vmatprep.mubr.msk.f32.mxu1 %vm3521_vm1, %v3520_v16 }
0x11dc   : > { %v1994_v29 = vpop.f32.mrb[16].mxu1 }
0x11dd   : > { %v3221_v31 = vpop.f32.mrb[17].mxu1  ;;  %3227 = vmatmul.mubr.msk.f32.vlgmr.msra.gmra.mrb[22].mxu0 %vm423_vm2, %v1994_v29  ;;  %v2947_v29 = vld [vmem:[%s4189_s5 + $0x58] sm:$0xff] }
0x11de   : > { %3237 = vmatpush3.xpose.msk.msra.mxu0 %vm423_vm2, %v2147_v30  ;;  %3238 = vmatprep.mubr.msk.f32.mxu0 %vm3521_vm1, %v3520_v16  ;;  %v2948_v31 = vld [vmem:[%s4189_s5 + $0x60] sm:$0xff] }
0x11df   : > { %3410 = vmatprep.subr.bf16.mxu0 %v3527_v5 }
0x11e1   : > { %3239 = vmatmul.mubr.msk.f32.vlgmr.msra.gmra.mrb[24].mxu0 %vm423_vm2, %v2145_v35  ;;  %v2949_v35 = vld [vmem:[%s4189_s5 + $0x68] sm:$0xff] }
0x11e2   : > { %3250 = vmatprep.mubr.msk.f32.mxu0 %vm3521_vm1, %v3520_v16  ;;  %3412 = vmatpush3.bf16.msra.mxu0 %v3411_v58  ;;  %v2962_v58 = vld [vmem:[%s4190_s6 + $0xc8] sm:$0xff] }
0x11e3   : > { %3258 = vmatprep.subr.mxu0 %v3520_v16 }
0x12ac   : > { %v2140_v36 = vpop.f32.mrb[18].mxu1 }
0x12ad   : > { %v3235_v37 = vpop.f32.mrb[19].mxu1 }
0x12ae   : > { %v2950_v37 = vld [vmem:[%s4189_s5 + $0x70] sm:$0xff] }
0x12b0   : > { %v2067_v38 = vpop.f32.mrb[22].mxu0 }
0x12b1   : > { %v2141_v41 = vadd.f32 %v2140_v36, %v2067_v38  ;;  %v3228_v42 = vpop.f32.mrb[23].mxu0  ;;  %v3423_v36 = vpack.c.bf16 %v2949_v35, %v2948_v31  ;;  %v2951_v38 = vld [vmem:[%s4189_s5 + $0x78] sm:$0xff] }
0x12b2   : > { %v2953_v42 = vld [vmem:[%s4190_s6 + $0x80] sm:$0xff] }
0x12b4   : > { %v2218_v43 = vpop.f32.mrb[24].mxu0 }
0x12b5   : > { %v2219_v45 = vadd.f32 %v2218_v43, %v3744_v24  ;;  %v3240_v46 = vpop.f32.mrb[25].mxu0  ;;  %v2954_v43 = vld [vmem:[%s4190_s6 + $0x88] sm:$0xff] }
0x12b6   : > { %v3429_v46 = vpack.c.bf16 %v2954_v43, %v2953_v42 }
0x12b7   : > { %v2222_v47 = vsel %vm498_vm3, %v2219_v45, -inf }
0x12b8   : > { %2223 = vmax.xlane.f32.xlu1 %v2222_v47  ;;  %v2956_v47 = vld [vmem:[%s4190_s6 + $0x98] sm:$0xff] }
0x12c9   : > { %2233 = vrot.lane.b32.xlu1 %v3969_v56, %s3526_s15 }
0x12cd   : > { %2383 = vrot.lane.b32.xlu1 %v3963_v54, %s3528_s10 }
0x1345   : > { %v2224_v48 = vpop.xlane.xlu1 %2223 }
0x1346   : > { %v2225_v50 = vsub.f32 %v2219_v45, %v2224_v48  ;;  %v2955_v45 = vld [vmem:[%s4190_s6 + $0x90] sm:$0xff] }
0x1347   : > { %v3432_v48 = vpack.c.bf16 %v2956_v47, %v2955_v45 }
0x1348   : > { %v2226_v39 = vmul.f32 1.442695, %v2225_v50  ;;  %v2957_v50 = vld [vmem:[%s4190_s6 + $0xa0] sm:$0xff] }
0x1349   : > { %v2234_v51 = vpop.permute.xlu1 %2233 }
0x134a   : > { %3500 = vpow2.f32 %v2226_v39  ;;  %3242 = vmatpush3.msra.mxu1 %v2234_v51  ;;  %v2958_v39 = vld [vmem:[%s4190_s6 + $0xa8] sm:$0xff] }
0x134b   : > { %3253 = vmatprep.subr.mxu1 %v3520_v16  ;;  %v3435_v51 = vpack.c.bf16 %v2958_v39, %v2957_v50 }
0x1354   : > { %v3501_v52 = vpop.eup %3500 }
0x1355   : > { %v2228_v24 = vsel %vm498_vm3, %v3501_v52, 0.0 }
0x1356   : > { %2229 = vadd.xlane.f32.xlu0 %v2228_v24  ;;  %v2960_v24 = vld [vmem:[%s4190_s6 + $0xb8] sm:$0xff] }
0x136c   : > { %2385 = vrot.lane.b32.xlu0 %v3963_v54, %s3529_s11  ;;  %v2384_v54 = vpop.permute.xlu1 %2383 }
0x13e3   : > { %v2230_v59 = vpop.xlane.xlu0 %2229 }
0x13e4   : > { %3502 = vrcp.f32 %v2230_v59  ;;  %v3441_v59 = vpack.c.bf16 %v2962_v58, %v2961_v57 }
0x13e7   : > { %v2386_v62 = vpop.permute.xlu0 %2385 }
0x13ee   : > { %v3503_v60 = vpop.eup %3502 }
0x13ef   : > { %v2232_v61 = vmul.f32 %v3503_v60, %v3501_v52  ;;  %v2959_v52 = vld [vmem:[%s4190_s6 + $0xb0] sm:$0xff] }
0x13f0   : > { %v3438_v33 = vpack.c.bf16 %v2960_v24, %v2959_v52  ;;  %v2963_v60 = vld [vmem:[%s4190_s6 + $0xd0] sm:$0xff] }
0x13f1   : > { %3244 = vmatmul.mubr.msk.f32.vlgmr.msra.gmra.mrb[20].mxu1 %vm498_vm3, %v2232_v61  ;;  %v2964_v61 = vld [vmem:[%s4190_s6 + $0xd8] sm:$0xff] }
0x13f2   : > { %3254 = vmatpush3.xpose.msk.msra.mxu1 %vm423_vm2, %v2386_v62  ;;  %3255 = vmatprep.mubr.msk.f32.mxu1 %vm3521_vm1, %v3520_v16  ;;  %v3444_v62 = vpack.c.bf16 %v2964_v61, %v2963_v60 }
0x13f3   : > { %3413 = vmatprep.subr.bf16.mxu1 %v3527_v5 }
0x13f5   : > { %3256 = vmatmul.mubr.msk.f32.vlgmr.msra.gmra.mrb[22].mxu1 %vm423_vm2, %v2384_v54  ;;  %v2965_v54 = vld [vmem:[%s4190_s6 + $0xe0] sm:$0xff] }
0x13f6   : > { %3267 = vmatprep.mubr.msk.f32.mxu1 %vm3521_vm1, %v3520_v16 }
0x14c4   : > { %v2305_v1 = vpop.f32.mrb[20].mxu1 }
0x14c5   : > { %v3245_v2 = vpop.f32.mrb[21].mxu1  ;;  %3251 = vmatmul.mubr.msk.f32.vlgmr.msra.gmra.mrb[26].mxu0 %vm423_vm2, %v2305_v1  ;;  %v2966_v1 = vld [vmem:[%s4190_s6 + $0xe8] sm:$0xff] }
0x14c6   : > { %3260 = vmatprep.mubr.msk.f32.mxu0 %vm3521_vm1, %v3520_v16  ;;  %v3447_v2 = vpack.c.bf16 %v2966_v1, %v2965_v54 }
0x14c8   : > { %v2457_v40 = vpop.f32.mrb[22].mxu1 }
0x14c9   : > { %v2458_v3 = vadd.f32 %v2457_v40, %v3775_v53  ;;  %v3257_v4 = vpop.f32.mrb[23].mxu1  ;;  %v2926_v53 = vld [vmem:[%s4188_s4 + $0x78] sm:$0xff] }
0x14ca   : > { %v3414_v44 = vpack.c.bf16 %v2926_v53, %v2925_v10 }
0x14cb   : > { %v2461_v6 = vsel %vm498_vm3, %v2458_v3, -inf }
0x14cc   : > { %2462 = vmax.xlane.f32.xlu1 %v2461_v6  ;;  %3415 = vmatpush3.bf16.msra.mxu1 %v3414_v44  ;;  %v2634_v6 = vrot.slane %v3954_v49, %v1384_v63 }
0x14cd   : > { %3428 = vmatprep.subr.bf16.mxu1 %v3527_v5 }
0x1559   : > { %v2463_v7 = vpop.xlane.xlu1 %2462 }
0x155a   : > { %v2464_v34 = vsub.f32 %v2458_v3, %v2463_v7 }
0x155c   : > { %v2465_v55 = vmul.f32 1.442695, %v2464_v34 }
0x155e   : > { %3504 = vpow2.f32 %v2465_v55 }
0x1568   : > { %v3505_v8 = vpop.eup %3504 }
0x1569   : > { %v2467_v9 = vsel %vm498_vm3, %v3505_v8, 0.0 }
0x156a   : > { %2468 = vadd.xlane.f32.xlu0 %v2467_v9 }
0x1580   : > { %2472 = vrot.lane.b32.xlu0 %v3969_v56, %s3528_s10 }
0x1598   : > { %v2378_v12 = vpop.f32.mrb[26].mxu0 }
0x1599   : > { %v2382_v13 = vadd.f32 %v2378_v12, %v2141_v41  ;;  %v3252_v14 = vpop.f32.mrb[27].mxu0  ;;  %v3426_v41 = vpack.c.bf16 %v2951_v38, %v2950_v37 }
0x15f7   : > { %v2469_v15 = vpop.xlane.xlu0 %2468 }
0x15f8   : > { %3506 = vrcp.f32 %v2469_v15 }
0x15fb   : > { %v2473_v18 = vpop.permute.xlu0 %2472 }
0x15fc   : > { %3259 = vmatpush3.msra.mxu0 %v2473_v18 }
0x15fd   : > { %3416 = vmatprep.subr.bf16.mxu0 %v3527_v5 }
0x1602   : > { %v3507_v56 = vpop.eup %3506 }
0x1603   : > { %v2471_v19 = vmul.f32 %v3507_v56, %v3505_v8  ;;  %v2967_v8 = vld [vmem:[%s4190_s6 + $0xf0] sm:$0xff] }
0x1605   : > { %3261 = vmatmul.mubr.msk.f32.vlgmr.msra.gmra.mrb[28].mxu0 %vm498_vm3, %v2471_v19  ;;  %v2969_v19 = vld [vmem:[%s4191_s7] ss:$0 sm:$0xff] }
0x1606   : > { %3286 = vmatprep.mubr.msk.f32.mxu0 %vm3521_vm1, %v3520_v16 }
0x16d8   : > { %v2544_v17 = vpop.f32.mrb[28].mxu0 }
0x16d9   : > { %v3262_v20 = vpop.f32.mrb[29].mxu0  ;;  %3268 = vmatmul.mubr.msk.f32.vlgmr.msra.gmra.mrb[24].mxu1 %vm423_vm2, %v2544_v17 }
0x16da   : > { %3321 = vmatprep.mubr.msk.f32.mxu1 %vm3521_vm1, %v3520_v16  ;;  %v2945_v16 = vld [vmem:[%s4189_s5 + $0x48] sm:$0xff]  ;;  %3430 = vmatpush3.bf16.msra.mxu1 %v3429_v46 }
0x16db   : > { %v3417_v28 = vpack.c.bf16 %v2945_v16, %v2944_v27  ;;  %3431 = vmatprep.subr.bf16.mxu1 %v3527_v5 }
0x16dd   : > { %3418 = vmatpush3.bf16.msra.mxu0 %v3417_v28 }
0x16de   : > { %3419 = vmatprep.subr.bf16.mxu0 %v3527_v5  ;;  %3433 = vmatpush3.bf16.msra.mxu1 %v3432_v48 }
0x16df   : > { %3434 = vmatprep.subr.bf16.mxu1 %v3527_v5 }
0x16e2   : > { %3436 = vmatpush3.bf16.msra.mxu1 %v3435_v51 }
0x16e3   : > { %3437 = vmatprep.subr.bf16.mxu1 %v3527_v5 }
0x16e6   : > { %3439 = vmatpush3.bf16.msra.mxu1 %v3438_v33 }
0x16e7   : > { %3440 = vmatprep.subr.bf16.mxu1 %v3527_v5 }
0x16ea   : > { %3442 = vmatpush3.bf16.msra.mxu1 %v3441_v59 }
0x16eb   : > { %3443 = vmatprep.subr.bf16.mxu1 %v3527_v5 }
0x16ee   : > { %3445 = vmatpush3.bf16.msra.mxu1 %v3444_v62 }
0x16ef   : > { %3446 = vmatprep.subr.bf16.mxu1 %v3527_v5 }
0x16f2   : > { %3448 = vmatpush3.bf16.msra.mxu1 %v3447_v2 }
0x16f3   : > { %3449 = vmatprep.subr.bf16.mxu1 %v3527_v5 }
0x17ac   : > { %v2617_v21 = vpop.f32.mrb[24].mxu1 }
0x17ad   : > { %v2621_v22 = vadd.f32 %v2617_v21, %v2382_v13  ;;  %v3269_v0 = vpop.f32.mrb[25].mxu1 }
0x17af   : > { %v4078_v23 = vadd.f32 %v2621_v22, %v3897_v11  ;;  %v2946_v11 = vld [vmem:[%s4189_s5 + $0x50] sm:$0xff] }
0x17b0   : > { %v3420_v30 = vpack.c.bf16 %v2947_v29, %v2946_v11 }
0x17b1   : > { %v2623_v25 = vmul.f32 %v4078_v23, %v4078_v23 }
0x17b2   : > { %3421 = vmatpush3.bf16.msra.mxu0 %v3420_v30 }
0x17b3   : > { %v2624_v26 = vsel %vm308_vm0, %v2623_v25, 0.0  ;;  %3422 = vmatprep.subr.bf16.mxu0 %v3527_v5 }
0x17b4   : > { %2625 = vadd.xlane.f32.xlu1 %v2624_v26 }
0x17b6   : > { %3424 = vmatpush3.bf16.msra.mxu0 %v3423_v36 }
0x17b7   : > { %3425 = vmatprep.subr.bf16.mxu0 %v3527_v5  ;;  %v2968_v5 = vld [vmem:[%s4190_s6 + $0xf8] sm:$0xff] }
0x17b8   : > { %v3450_v9 = vpack.c.bf16 %v2968_v5, %v2967_v8 }
0x17ba   : > { %3427 = vmatpush3.bf16.msra.mxu0 %v3426_v41  ;;  %3451 = vmatpush3.bf16.msra.mxu1 %v3450_v9 }
0x1841   : > { %v2626_v40 = vpop.xlane.xlu1 %2625 }
0x1842   : > { %v2627_v3 = vmul.f32 0.015625, %v2626_v40 }
0x1844   : > { %v2628_v4 = vadd.f32 1e-06, %v2627_v3 }
0x1846   : > { %3508 = vrsqrt.f32 %v2628_v4 }
0x1850   : > { %v3509_v7 = vpop.eup %3508 }
0x1851   : > { %v2630_v34 = vmul.f32 %v3509_v7, %v4078_v23 }
0x1853   : > { %v2635_v55 = vmul.f32 %v2634_v6, %v2630_v34 }
0x1855   : > { %3287 = vmatmul.mubr.msk.f32.vlgmr.msra.gmra.mrb[30].mxu0 %vm308_vm0, %v2635_v55 }
0x1928   : > { %v2714_v10 = vpop.f32.mrb[30].mxu0 }
0x1929   : > { %v2718_v32 = vmax.f32 %v2714_v10, 0.0  ;;  %v3288_v63 = vpop.f32.mrb[31].mxu0 }
0x192b   : > { %3322 = vmatmul.mubr.f32.vlgmr.msra.gmra.mrb[26].mxu1 %v2718_v32 }
0x19fe   : > { %v2802_v49 = vpop.f32.mrb[26].mxu1 }
0x19ff   : > { %v2806_v53 = vadd.f32 %v2802_v49, %v4078_v23  ;;  %v3323_v44 = vpop.f32.mrb[27].mxu1 }
0x1a01   : > { %v2808_v12 = vmul.f32 %v2806_v53, %v2806_v53 }
0x1a03   : > { %v2809_v13 = vsel %vm308_vm0, %v2808_v12, 0.0 }
0x1a04   : > { %2810 = vadd.xlane.f32.xlu1 %v2809_v13 }
0x1a91   : > { %v2811_v14 = vpop.xlane.xlu1 %2810 }
0x1a92   : > { %v2812_v15 = vmul.f32 0.015625, %v2811_v14 }
0x1a94   : > { %v2813_v18 = vadd.f32 1e-06, %v2812_v15 }
0x1a96   : > { %3510 = vrsqrt.f32 %v2813_v18 }
0x1aa0   : > { %v3511_v56 = vpop.eup %3510 }
0x1aa1   : > { %v2815_v17 = vmul.f32 %v3511_v56, %v2806_v53 }
0x1aa3   : > { %v2822_v20 = vmul.f32 %v2969_v19, %v2815_v17 }
0x1aa5   : > { %2823 = vst.msk [vmem:[%s300_s16] sm:$0xff] %vm308_vm0, %v2822_v20 }
0x1aa6 PF: > { %s18_s27 = sadd.s32 1, %s3518_s27  }
0x1aa7   : > { %p15_p4 = scmp.ge.s32.totalorder %s18_s27, 4  }
0x1aa9   :  { %17 = sbr.rel (!%p15_p4) target bundleno = 1 (0x1), region = 87 }

// kernel: t5_loss.3
= control target key start
LH: loop header
LB: loop body
LE: loop exit
PB: predicated region body
PF: predicated region fallthrough
CT: control target
= control target key end

     0   :  { %s8298_s0 = inlined_call_operand.vmem [shape: f32[2,8,64], index: 0, kind: input, shape index: {}]   ;;  %s8299_s1 = inlined_call_operand.vmem [shape: f32[2,8,64], index: 1, kind: input, shape index: {}]   ;;  %s8300_s2 = inlined_call_operand.vmem [shape: f32[2,8,8], index: 2, kind: input, shape index: {}]   ;;  %s8301_s3 = inlined_call_operand.vmem [shape: f32[2,8,128], index: 3, kind: input, shape index: {}]   ;;  %s8302_s4 = inlined_call_operand.vmem [shape: f32[4,8,8], index: 4, kind: input, shape index: {}]   ;;  %s8303_s5 = inlined_call_operand.vmem [shape: f32[2,3,64], index: 5, kind: input, shape index: {}]   ;;  %s8304_s6 = inlined_call_operand.vmem [shape: f32[2,64,192], index: 6, kind: input, shape index: {}]   ;;  %s8305_s7 = inlined_call_operand.vmem [shape: f32[2,64,64], index: 7, kind: input, shape index: {}]   ;;  %s8306_s8 = inlined_call_operand.vmem [shape: f32[2,64,192], index: 8, kind: input, shape index: {}]   ;;  %s8307_s9 = inlined_call_operand.vmem [shape: f32[2,64,64], index: 9, kind: input, shape index: {}]   ;;  %s8308_s10 = inlined_call_operand.vmem [shape: f32[2,64,128], index: 10, kind: input, shape index: {}]   ;;  %s8309_s11 = inlined_call_operand.vmem [shape: f32[2,128,64], index: 11, kind: input, shape index: {}]   ;;  %s8310_s12 = inlined_call_operand.vmem [shape: f32[1,64], index: 12, kind: input, shape index: {}]   ;;  %s8311_s13 = inlined_call_operand.vmem [shape: f32[128,64], index: 13, kind: input, shape index: {}]   ;;  %s8312_s14 = inlined_call_operand.hbm [shape: f32[1,1], index: 14, kind: output, shape index: {}]  }
   0x1   :  { %8329 = sst [smem:[#allocation8_spill]] %s8298_s0 }
   0x2   :  { %8330 = sst [smem:[#allocation9_spill]] %s8299_s1 }
   0x3   :  { %8331 = sst [smem:[#allocation10_spill]] %s8300_s2 }
   0x4   :  { %8332 = sst [smem:[#allocation11_spill]] %s8312_s14 }
   0x5   :  { %19 = vsyncpa [#allocation5], 0  ;;  %s7141_s29 = smov 0  }
   0x6 LB: > { %8333 = sst [smem:[#allocation7_spill]] %s7052_s29  ;;  %s7147_s30 = sadd.s32 4294967295, %s7052_s29   ;;  %s7052_s29 = sphi %s7141_s29, %s25_s29  }
   0x7   : > { %p5706_p0 = scmp.ge.s32.totalorder %s7052_s29, 1  ;;  %p434_p1 = scmp.lt.s32.totalorder %s7052_s29, 3 }
   0x9   : > { %p435_p2 = pnand %p5706_p0, %p434_p1 }
   0xa   : > { %p486_p3 = scmp.lt.s32.totalorder (!%p435_p2), %s7147_s30, 1  ;;  %s8334_s0 = sld [smem:[#allocation8_spill]] (!%p435_p2) }
   0xb   : > { %438 = sbr.rel (%p435_p2) target bundleno = 13397 (0x3455), region = 76  ;;  %s8335_s1 = sld [smem:[#allocation9_spill]] (!%p435_p2) }
   0xc   : > { %s8336_s2 = sld [smem:[#allocation10_spill]] (!%p435_p2)  ;;  %p5711_p4 = scmp.ne.s32.totalorder (!%p435_p2), %s7147_s30, 0 }
  0x12   : > { %s487_s15 = scalar_select %p486_p3, %s7147_s30, 1 }
  0x13   : > { %505 = sbr.rel (%p5711_p4) target bundleno = 26 (0x1a), region = 80  ;;  %vm506_vm0 = vcmask (!%p5711_p4), 0   ;;  %v7054_v0 = vmov (!%p5711_p4), 0.0  }
  0x14   : > { %s7153_s16 = sshll.u32 %s487_s15, 3  ;;  %507 = vst.msk [vmem:[#allocation2] sm:$0x1] (!%p5711_p4), %vm506_vm0, %v7054_v0  ;;  %508 = vst.msk [vmem:[#allocation3] sm:$0x1] (!%p5711_p4), %vm506_vm0, %v7054_v0 }
  0x15   : > { %s489_s19 = scalar_lea.vmem %s8334_s0, %s7153_s16  ;;  %s7163_s22 = scalar_lea.vmem %s8335_s1, %s7153_s16 }
  0x16   : > { %s7169_s25 = scalar_lea.vmem %s8336_s2, %s7153_s16 }
  0x1a PF: > { %v7176_v1 = vld [vmem:[%s489_s19] sm:$0xff]  ;;  %vm534_vm1 = vcmask 523264   ;;  %v549_v4 = vld [vmem:[%s8304_s6 + $0x8] sm:$0xff]  ;;  %v551_v5 = vld [vmem:[%s8304_s6 + $0x18] sm:$0xff]  ;;  %v7055_v17 = vmov 0.0   ;;  %v543_v31 = vlaneseq  ;;  %vm7056_vm2 = vmmov 0  }
  0x1b   : > { %v533_v2 = vmul.f32 %v7176_v1, %v7176_v1  ;;  %v6587_v6 = vpack.c.bf16 %v551_v5, %v549_v4  ;;  %v548_v7 = vld [vmem:[%s8304_s6] sm:$0xff]  ;;  %v550_v8 = vld [vmem:[%s8304_s6 + $0x10] sm:$0xff]  ;;  %v553_v10 = vld [vmem:[%s8304_s6 + $0x28] sm:$0xff]  ;;  %639 = vmatprep.mubr.f32.mxu1 %v7055_v17  ;;  %6144 = vmatprep.mubr.msk.f32.mxu0 %vm7056_vm2, %v7055_v17  ;;  %s8325_s18 = smov 64   ;;  %vm649_vm3 = vcmask 130048   ;;  %vm725_vm4 = vcmask 64512  }
  0x1c   : > { %v6589_v9 = vpack.c.bf16 %v550_v8, %v548_v7  ;;  %v555_v11 = vld [vmem:[%s8304_s6 + $0x38] sm:$0xff]  ;;  %v552_v12 = vld [vmem:[%s8304_s6 + $0x20] sm:$0xff]  ;;  %v554_v14 = vld [vmem:[%s8304_s6 + $0x30] sm:$0xff]  ;;  %v7231_v33 = vshrl.u32 %v543_v31, 7  ;;  %s8321_s28 = smov 48   ;;  %s8323_s23 = smov 112  }
  0x1d   : > { %v535_v3 = vsel %vm534_vm1, %v533_v2, 0.0  ;;  %6588 = vmatprep.subr.bf16.mxu1 %v6587_v6  ;;  %v6591_v13 = vpack.c.bf16 %v555_v11, %v553_v10  ;;  %v557_v15 = vld [vmem:[%s8304_s6 + $0x48] sm:$0xff]  ;;  %v559_v16 = vld [vmem:[%s8304_s6 + $0x58] sm:$0xff]  ;;  %v6593_v18 = vpack.c.bf16 %v554_v14, %v552_v12  ;;  %v556_v20 = vld [vmem:[%s8304_s6 + $0x40] sm:$0xff]  ;;  %s8319_s26 = smov 96   ;;  %s8317_s27 = smov 32  }
  0x1e   : > { %536 = vadd.xlane.f32.xlu0 %v535_v3  ;;  %6590 = vmatpush1.bf16.msra.mxu1 %v6589_v9  ;;  %v6595_v19 = vpack.c.bf16 %v559_v16, %v557_v15  ;;  %v558_v21 = vld [vmem:[%s8304_s6 + $0x50] sm:$0xff]  ;;  %v561_v22 = vld [vmem:[%s8304_s6 + $0x68] sm:$0xff]  ;;  %v563_v23 = vld [vmem:[%s8304_s6 + $0x78] sm:$0xff]  ;;  %v545_v34 = vsub.s32 0, %v7231_v33  ;;  %v7062_v11 = vmov 0.0|0.0   ;;  %s8313_s19 = smov 16  }
  0x1f   : > { %6592 = vmatprep.subr.bf16.mxu1 %v6591_v13  ;;  %v6597_v24 = vpack.c.bf16 %v558_v21, %v556_v20  ;;  %v6599_v25 = vpack.c.bf16 %v563_v23, %v561_v22  ;;  %v560_v26 = vld [vmem:[%s8304_s6 + $0x60] sm:$0xff]  ;;  %v562_v27 = vld [vmem:[%s8304_s6 + $0x70] sm:$0xff]  ;;  %v513_v62 = vld [vmem:[%s8302_s4 + $0x8] sm:$0xff]  ;;  %6609 = vmatprep.subr.bf16.mxu0 %v7062_v11  ;;  %s8315_s24 = smov 80   ;;  %s8337_s15 = smov 112   ;;  %vm5604_vm6 = vcmask 0  }
  0x20   : > { %v6601_v28 = vpack.c.bf16 %v562_v27, %v560_v26  ;;  %v7237_v35 = vld [vmem:[%s8303_s5] sm:$0x7]  ;;  %v566_v13 = vld [vmem:[%s8305_s7 + $0x10] sm:$0xff]  ;;  %v567_v14 = vld [vmem:[%s8305_s7 + $0x18] sm:$0xff]  ;;  %s8338_s17 = smov 48   ;;  %s8343_s1 = smov 64  }
  0x21   : > { %v546_v36 = vrot.slane %v7237_v35, %v545_v34  ;;  %v512_v43 = vld [vmem:[%s8302_s4] sm:$0xff]  ;;  %v6604_v16 = vpack.c.bf16 %v567_v14, %v566_v13  ;;  %v565_v20 = vld [vmem:[%s8305_s7 + $0x8] sm:$0xff]  ;;  %v514_v31 = vld [vmem:[%s8302_s4 + $0x10] sm:$0xff]  ;;  %p6823_p5 = scmp.eq.s32.totalorder %s7147_s30, 1 }
  0x22   : > { %6594 = vmatpush1.bf16.msra.mxu1 %v6593_v18  ;;  %v7266_v45 = vld [vmem:[%s7169_s25] sm:$0xff]  ;;  %vm8189_vm5 = vmpackc.low %vm534_vm1, %vm534_vm1 }
  0x23   : > { %6596 = vmatprep.subr.bf16.mxu1 %v6595_v19  ;;  %v564_v19 = vld [vmem:[%s8305_s7] sm:$0xff] }
  0x24   : > { %v6607_v21 = vpack.c.bf16 %v565_v20, %v564_v19  ;;  %v1618_v20 = vld [vmem:[%s8306_s8 + $0x8] sm:$0xff] }
  0x26   : > { %6598 = vmatpush1.bf16.msra.mxu1 %v6597_v24 }
  0x27   : > { %6600 = vmatprep.subr.bf16.mxu1 %v6599_v25 }
  0x2a   : > { %6602 = vmatpush1.bf16.msra.mxu1 %v6601_v28 }
  0x2b   : > { %6096 = vmatprep.subr.mxu1 %v7055_v17 }
  0xab   : > { %v537_v29 = vpop.xlane.xlu0 %536 }
  0xac   : > { %v539_v30 = vmul.f32 0.015625, %v537_v29 }
  0xae   : > { %v540_v32 = vadd.f32 1e-06, %v539_v30 }
  0xb0   : > { %6925 = vrsqrt.f32 %v540_v32 }
  0xba   : > { %v6926_v37 = vpop.eup %6925 }
  0xbb   : > { %v542_v38 = vmul.f32 %v6926_v37, %v7176_v1 }
  0xbd   : > { %v547_v39 = vmul.f32 %v546_v36, %v542_v38 }
  0xbf   : > { %5712 = vmatmul.mubr.msk.f32.vlgmr.msra.gmra.mrb[0].mxu1 %vm534_vm1, %v547_v39 }
  0xc0   : > { %6098 = vmatprep.mubr.msk.f32.mxu1 %vm7056_vm2, %v7055_v17 }
 0x192   : > { %v7248_v40 = vpop.f32.mrb[0].mxu1 }
 0x193   : > { %647 = vrot.lane.b32.xlu0 %v7248_v40, %s8325_s18  ;;  %v7252_v41 = vpop.f32.mrb[1].mxu1 }
 0x205   : > { %v648_v42 = vpop.permute.xlu0 %647 }
 0x206   : > { %6097 = vmatpush3.xpose.msk.msra.mxu1 %vm649_vm3, %v648_v42 }
 0x207   : > { %6101 = vmatprep.subr.mxu1 %v7055_v17 }
 0x209   : > { %6099 = vmatmul.mubr.msk.f32.vlgmr.msra.gmra.mrb[2].mxu1 %vm649_vm3, %v7248_v40 }
 0x20a   : > { %6102 = vmatpush3.msra.mxu1 %v7252_v41  ;;  %6103 = vmatprep.mubr.msk.f32.mxu1 %vm7056_vm2, %v7055_v17 }
 0x20b   : > { %6106 = vmatprep.subr.mxu1 %v7055_v17 }
 0x2dc   : > { %v720_v44 = vpop.f32.mrb[2].mxu1 }
 0x2dd   : > { %v721_v46 = vadd.f32 %v720_v44, %v512_v43  ;;  %v6100_v47 = vpop.f32.mrb[3].mxu1 }
 0x2df   : > { %v724_v48 = vadd.f32 %v721_v46, %v7266_v45 }
 0x2e1   : > { %v726_v49 = vsel %vm725_vm4, %v724_v48, -inf }
 0x2e2   : > { %727 = vmax.xlane.f32.xlu1 %v726_v49  ;;  %v569_v49 = vld [vmem:[%s8305_s7 + $0x28] sm:$0xff] }
 0x2f3   : > { %812 = vrot.lane.b32.xlu1 %v7248_v40, %s8321_s28  ;;  %s8340_s28 = smov 32  }
 0x36f   : > { %v728_v50 = vpop.xlane.xlu1 %727 }
 0x370   : > { %v729_v51 = vsub.f32 %v724_v48, %v728_v50  ;;  %v568_v48 = vld [vmem:[%s8305_s7 + $0x20] sm:$0xff] }
 0x372   : > { %v730_v52 = vmul.f32 1.442695, %v729_v51 }
 0x373   : > { %v813_v55 = vpop.permute.xlu1 %812 }
 0x374   : > { %6927 = vpow2.f32 %v730_v52 }
 0x37e   : > { %v6928_v53 = vpop.eup %6927 }
 0x37f   : > { %v732_v54 = vsel %vm725_vm4, %v6928_v53, 0.0 }
 0x380   : > { %733 = vadd.xlane.f32.xlu1 %v732_v54 }
 0x391   : > { %810 = vrot.lane.b32.xlu1 %v7248_v40, %s8323_s23 }
 0x40d   : > { %v734_v56 = vpop.xlane.xlu1 %733 }
 0x40e   : > { %6929 = vrcp.f32 %v734_v56 }
 0x411   : > { %v811_v59 = vpop.permute.xlu1 %810 }
 0x418   : > { %v6930_v57 = vpop.eup %6929 }
 0x419   : > { %v736_v58 = vmul.f32 %v6930_v57, %v6928_v53 }
 0x41b   : > { %6104 = vmatmul.mubr.msk.f32.vlgmr.msra.gmra.mrb[4].mxu1 %vm725_vm4, %v736_v58  ;;  %v515_v58 = vld [vmem:[%s8302_s4 + $0x18] sm:$0xff] }
 0x41c   : > { %6107 = vmatpush3.xpose.msk.msra.mxu1 %vm649_vm3, %v813_v55  ;;  %6108 = vmatprep.mubr.msk.f32.mxu1 %vm7056_vm2, %v7055_v17 }
 0x41d   : > { %6111 = vmatprep.subr.mxu1 %v7055_v17 }
 0x41f   : > { %6109 = vmatmul.mubr.msk.f32.vlgmr.msra.gmra.mrb[6].mxu1 %vm649_vm3, %v811_v59 }
 0x420   : > { %6113 = vmatprep.mubr.msk.f32.mxu1 %vm7056_vm2, %v7055_v17 }
 0x4ee   : > { %v806_v60 = vpop.f32.mrb[4].mxu1 }
 0x4ef   : > { %v6105_v61 = vpop.f32.mrb[5].mxu1 }
 0x4f2   : > { %v884_v63 = vpop.f32.mrb[6].mxu1 }
 0x4f3   : > { %v885_v0 = vadd.f32 %v884_v63, %v513_v62  ;;  %v6110_v2 = vpop.f32.mrb[7].mxu1 }
 0x4f5   : > { %v888_v3 = vadd.f32 %v885_v0, %v7266_v45 }
 0x4f7   : > { %v889_v4 = vsel %vm725_vm4, %v888_v3, -inf }
 0x4f8   : > { %890 = vmax.xlane.f32.xlu0 %v889_v4 }
 0x50e   : > { %901 = vrot.lane.b32.xlu0 %v7252_v41, %s8323_s23  ;;  %s8341_s23 = smov 80  }
 0x512   : > { %1123 = vrot.lane.b32.xlu0 %v7248_v40, %s8319_s26 }
 0x585   : > { %v891_v5 = vpop.xlane.xlu0 %890 }
 0x586   : > { %v892_v6 = vsub.f32 %v888_v3, %v891_v5 }
 0x588   : > { %v893_v7 = vmul.f32 1.442695, %v892_v6 }
 0x589   : > { %v902_v8 = vpop.permute.xlu0 %901 }
 0x58a   : > { %6931 = vpow2.f32 %v893_v7  ;;  %6112 = vmatpush3.msra.mxu1 %v902_v8 }
 0x58b   : > { %6603 = vmatprep.subr.bf16.mxu1 %v7062_v11 }
 0x58d   : > { %v1124_v25 = vpop.permute.xlu0 %1123 }
 0x594   : > { %v6932_v9 = vpop.eup %6931 }
 0x595   : > { %v895_v10 = vsel %vm725_vm4, %v6932_v9, 0.0 }
 0x596   : > { %896 = vadd.xlane.f32.xlu1 %v895_v10 }
 0x5a7   : > { %1125 = vrot.lane.b32.xlu1 %v7248_v40, %s8317_s27 }
 0x623   : > { %v897_v12 = vpop.xlane.xlu1 %896 }
 0x624   : > { %6933 = vrcp.f32 %v897_v12 }
 0x627   : > { %v1126_v24 = vpop.permute.xlu1 %1125 }
 0x62e   : > { %v6934_v15 = vpop.eup %6933 }
 0x62f   : > { %v899_v18 = vmul.f32 %v6934_v15, %v6932_v9  ;;  %v1619_v15 = vld [vmem:[%s8306_s8 + $0x10] sm:$0xff] }
 0x631   : > { %6114 = vmatmul.mubr.msk.f32.vlgmr.msra.gmra.mrb[8].mxu1 %vm725_vm4, %v899_v18  ;;  %v1617_v18 = vld [vmem:[%s8306_s8] sm:$0xff] }
 0x632   : > { %6605 = vmatpush3.bf16.msra.mxu1 %v6604_v16  ;;  %6120 = vmatprep.mubr.msk.f32.mxu1 %vm7056_vm2, %v7055_v17  ;;  %v1620_v16 = vld [vmem:[%s8306_s8 + $0x18] sm:$0xff] }
 0x633   : > { %6606 = vmatprep.subr.bf16.mxu1 %v7062_v11  ;;  %v6850_v19 = vpack.i.bf16 %v1620_v16, %v1619_v15 }
 0x704   : > { %v973_v22 = vpop.f32.mrb[8].mxu1 }
 0x705   : > { %v6115_v23 = vpop.f32.mrb[9].mxu1  ;;  %6121 = vmatmul.mubr.msk.f32.vlgmr.msra.gmra.mrb[10].mxu1 %vm649_vm3, %v973_v22  ;;  %v1621_v22 = vld [vmem:[%s8306_s8 + $0x20] sm:$0xff] }
 0x706   : > { %6608 = vmatpush3.bf16.msra.mxu1 %v6607_v21  ;;  %6127 = vmatprep.mubr.msk.f32.mxu1 %vm7056_vm2, %v7055_v17  ;;  %v6616_v21 = vpack.c.bf16 %v1619_v15, %v1617_v18  ;;  %v1622_v23 = vld [vmem:[%s8306_s8 + $0x28] sm:$0xff] }
 0x707   : > { %6130 = vmatprep.subr.mxu1 %v7055_v17 }
 0x709   : > { %6128 = vmatmul.mubr.msk.f32.vlgmr.msra.gmra.mrb[12].mxu1 %vm649_vm3, %v806_v60 }
 0x70a   : > { %6132 = vmatprep.mubr.msk.f32.mxu1 %vm7056_vm2, %v7055_v17 }
 0x70f   : > { %6131 = vmatpush3.xpose.msk.msra.mxu1 %vm649_vm3, %v1126_v24  ;;  %v6845_v24 = vpack.i.bf16 %v1618_v20, %v1617_v18  ;;  %v1632_v20 = vld [vmem:[%s8306_s8 + $0x78] sm:$0xff] }
 0x710   : > { %6135 = vmatprep.subr.mxu1 %v7055_v17 }
 0x712   : > { %6133 = vmatmul.mubr.msk.f32.vlgmr.msra.gmra.mrb[14].mxu1 %vm649_vm3, %v1124_v25  ;;  %v1623_v25 = vld [vmem:[%s8306_s8 + $0x30] sm:$0xff] }
 0x713   : > { %6137 = vmatprep.mubr.msk.f32.mxu1 %vm7056_vm2, %v7055_v17 }
 0x7d8   : > { %v1046_v26 = vpop.f32.mrb[10].mxu1 }
 0x7d9   : > { %v6122_v27 = vpop.f32.mrb[11].mxu1 }
 0x7da   : > { %v6855_v27 = vpack.i.bf16 %v1622_v23, %v1621_v22 }
 0x7dc   : > { %v1119_v28 = vpop.f32.mrb[12].mxu1 }
 0x7dd   : > { %v7325_v29 = vadd.f32 %v1119_v28, %v1046_v26  ;;  %v6129_v30 = vpop.f32.mrb[13].mxu1  ;;  %v1624_v26 = vld [vmem:[%s8306_s8 + $0x38] sm:$0xff]  ;;  %v6619_v28 = vpack.c.bf16 %v1623_v25, %v1621_v22 }
 0x7de   : > { %v1625_v30 = vld [vmem:[%s8306_s8 + $0x40] sm:$0xff] }
 0x7e5   : > { %v1197_v32 = vpop.f32.mrb[14].mxu1 }
 0x7e6   : > { %v1198_v36 = vadd.f32 %v1197_v32, %v514_v31  ;;  %v6134_v37 = vpop.f32.mrb[15].mxu1  ;;  %v1626_v31 = vld [vmem:[%s8306_s8 + $0x48] sm:$0xff]  ;;  %v1627_v32 = vld [vmem:[%s8306_s8 + $0x50] sm:$0xff] }
 0x7e7   : > { %v6865_v37 = vpack.i.bf16 %v1626_v31, %v1625_v30 }
 0x7e8   : > { %v1201_v38 = vadd.f32 %v1198_v36, %v7266_v45  ;;  %v1628_v36 = vld [vmem:[%s8306_s8 + $0x58] sm:$0xff] }
 0x7ea   : > { %v1202_v39 = vsel %vm725_vm4, %v1201_v38, -inf }
 0x7eb   : > { %1203 = vmax.xlane.f32.xlu1 %v1202_v39  ;;  %v6870_v39 = vpack.i.bf16 %v1628_v36, %v1627_v32  ;;  %v1614_v36 = vsub.s32 1, %v7231_v33 }
 0x7fc   : > { %1365 = vrot.lane.b32.xlu1 %v7248_v40, %s8313_s19  ;;  %s8339_s19 = smov 96  }
 0x800   : > { %1363 = vrot.lane.b32.xlu1 %v7248_v40, %s8315_s24  ;;  %v6610_v40 = vpack.c.bf16 %v569_v49, %v568_v48 }
 0x802   : > { %6611 = vmatpush3.bf16.msra.mxu0 %v6610_v40 }
 0x803   : > { %6152 = vmatprep.subr.mxu0 %v7055_v17 }
 0x878   : > { %v1204_v42 = vpop.xlane.xlu1 %1203 }
 0x879   : > { %v1205_v43 = vsub.f32 %v1201_v38, %v1204_v42  ;;  %v6622_v38 = vpack.c.bf16 %v1627_v32, %v1625_v30  ;;  %v510_v32 = vld [vmem:[%s7163_s22] sm:$0xff] }
 0x87b   : > { %v1206_v44 = vmul.f32 1.442695, %v1205_v43 }
 0x87c   : > { %v1366_v53 = vpop.permute.xlu1 %1365 }
 0x87d   : > { %6935 = vpow2.f32 %v1206_v44  ;;  %v1629_v44 = vld [vmem:[%s8306_s8 + $0x60] sm:$0xff] }
 0x880   : > { %v1364_v55 = vpop.permute.xlu1 %1363 }
 0x887   : > { %v6936_v46 = vpop.eup %6935 }
 0x888   : > { %v1208_v47 = vsel %vm725_vm4, %v6936_v46, 0.0 }
 0x889   : > { %1209 = vadd.xlane.f32.xlu0 %v1208_v47  ;;  %v1631_v47 = vld [vmem:[%s8306_s8 + $0x70] sm:$0xff] }
 0x88a   : > { %v6625_v49 = vpack.c.bf16 %v1631_v47, %v1629_v44 }
 0x89f   : > { %1213 = vrot.lane.b32.xlu0 %v7252_v41, %s8319_s26  ;;  %s8346_s26 = scalar_lea.vmem %s8301_s3, %s7153_s16  ;;  %s7065_s16 = smov [#allocation4]  }
 0x8a0   : > { %s5628_s27 = sshll.u32 %s7065_s16, 4  ;;  %s5629_s27 = int_to_ptr.vmem [resolvable:$true] %s5628_s27 }
 0x8a1   : > { %p7023_p9 = scmp.lt.s32.totalorder %s5629_s27, %s5629_s27 }
 0x916   : > { %v1210_v50 = vpop.xlane.xlu0 %1209 }
 0x917   : > { %6937 = vrcp.f32 %v1210_v50 }
 0x91a   : > { %v1214_v51 = vpop.permute.xlu0 %1213 }
 0x91b   : > { %6136 = vmatpush3.msra.mxu1 %v1214_v51 }
 0x91c   : > { %6147 = vmatprep.subr.mxu1 %v7055_v17 }
 0x921   : > { %v6938_v52 = vpop.eup %6937 }
 0x922   : > { %v1212_v54 = vmul.f32 %v6938_v52, %v6936_v46  ;;  %v1630_v46 = vld [vmem:[%s8306_s8 + $0x68] sm:$0xff] }
 0x923   : > { %v6875_v48 = vpack.i.bf16 %v1630_v46, %v1629_v44 }
 0x924   : > { %6138 = vmatmul.mubr.msk.f32.vlgmr.msra.gmra.mrb[16].mxu1 %vm725_vm4, %v1212_v54 }
 0x925   : > { %6148 = vmatpush3.xpose.msk.msra.mxu1 %vm649_vm3, %v1366_v53  ;;  %6149 = vmatprep.mubr.msk.f32.mxu1 %vm7056_vm2, %v7055_v17 }
 0x926   : > { %6612 = vmatprep.subr.bf16.mxu1 %v7062_v11 }
 0x928   : > { %6150 = vmatmul.mubr.msk.f32.vlgmr.msra.gmra.mrb[18].mxu1 %vm649_vm3, %v1364_v55 }
 0x929   : > { %6161 = vmatprep.mubr.msk.f32.mxu1 %vm7056_vm2, %v7055_v17 }
 0x9f7   : > { %v1285_v56 = vpop.f32.mrb[16].mxu1 }
 0x9f8   : > { %v6139_v57 = vpop.f32.mrb[17].mxu1  ;;  %6145 = vmatmul.mubr.msk.f32.vlgmr.msra.gmra.mrb[0].mxu0 %vm649_vm3, %v1285_v56 }
 0x9f9   : > { %6154 = vmatprep.mubr.msk.f32.mxu0 %vm7056_vm2, %v7055_v17 }
 0x9fb   : > { %v1437_v59 = vpop.f32.mrb[18].mxu1 }
 0x9fc   : > { %v1438_v60 = vadd.f32 %v1437_v59, %v515_v58  ;;  %v6151_v61 = vpop.f32.mrb[19].mxu1 }
 0x9fe   : > { %v1441_v62 = vadd.f32 %v1438_v60, %v7266_v45  ;;  %v570_v45 = vld [vmem:[%s8305_s7 + $0x30] sm:$0xff] }
 0xa00   : > { %v1442_v63 = vsel %vm725_vm4, %v1441_v62, -inf }
 0xa01   : > { %1443 = vmax.xlane.f32.xlu0 %v1442_v63 }
 0xa17   : > { %1453 = vrot.lane.b32.xlu0 %v7252_v41, %s8315_s24  ;;  %v571_v41 = vld [vmem:[%s8305_s7 + $0x38] sm:$0xff]  ;;  %s8342_s24 = smov 16  }
 0xa18   : > { %v6613_v7 = vpack.c.bf16 %v571_v41, %v570_v45 }
 0xa1a   : > { %6614 = vmatpush3.bf16.msra.mxu1 %v6613_v7 }
 0xa1b   : > { %6627 = vmatprep.subr.bf16.mxu1 %v7062_v11  ;;  %6851 = vrot.lane.b32.xlu0 %v6850_v19, %s8325_s18 }
 0xa1f   : > { %6856 = vrot.lane.b32.xlu0 %v6855_v27, %s8325_s18 }
 0xa23   : > { %6866 = vrot.lane.b32.xlu0 %v6865_v37, %s8325_s18  ;;  %v1615_v37 = vrot.slane %v7237_v35, %v1614_v36 }
 0xa27   : > { %6876 = vrot.lane.b32.xlu0 %v6875_v48, %s8325_s18 }
 0xa8e   : > { %v1444_v0 = vpop.xlane.xlu0 %1443 }
 0xa8f   : > { %v1445_v2 = vsub.f32 %v1441_v62, %v1444_v0 }
 0xa91   : > { %v1446_v3 = vmul.f32 1.442695, %v1445_v2 }
 0xa92   : > { %v1454_v4 = vpop.permute.xlu0 %1453 }
 0xa93   : > { %6939 = vpow2.f32 %v1446_v3  ;;  %6153 = vmatpush3.msra.mxu0 %v1454_v4 }
 0xa94   : > { %6615 = vmatprep.subr.bf16.mxu0 %v7062_v11 }
 0xa96   : > { %v6852_v50 = vpop.permute.xlu0 %6851 }
 0xa97   : > { %v6854_v53 = vunpack.i.h.bf16 %v6852_v50  ;;  %v6853_v54 = vunpack.i.l.bf16 %v6852_v50 }
 0xa99   : > { %v1763_v56 = vsel %vm534_vm1, %v6853_v54, %v6854_v53 }
 0xa9a   : > { %v6857_v59 = vpop.permute.xlu0 %6856 }
 0xa9b   : > { %v6859_v62 = vunpack.i.h.bf16 %v6857_v59  ;;  %v6858_v63 = vunpack.i.l.bf16 %v6857_v59 }
 0xa9d   : > { %v6940_v5 = vpop.eup %6939  ;;  %v1764_v2 = vsel %vm534_vm1, %v6858_v63, %v6859_v62 }
 0xa9e   : > { %v1448_v6 = vsel %vm725_vm4, %v6940_v5, 0.0 }
 0xa9f   : > { %1449 = vadd.xlane.f32.xlu1 %v1448_v6 }
 0xab0   : > { %6846 = vrot.lane.b32.xlu1 %v6845_v24, %s8325_s18 }
 0xacb   : > { %v1358_v8 = vpop.f32.mrb[0].mxu0 }
 0xacc   : > { %v7375_v9 = vadd.f32 %v1358_v8, %v7325_v29  ;;  %v6146_v10 = vpop.f32.mrb[1].mxu0  ;;  %v6860_v29 = vpack.i.bf16 %v1624_v26, %v1623_v25 }
 0xace   : > { %6861 = vrot.lane.b32.xlu1 %v6860_v29, %s8325_s18 }
 0xad2   : > { %6871 = vrot.lane.b32.xlu1 %v6870_v39, %s8325_s18 }
 0xb2c   : > { %v1450_v12 = vpop.xlane.xlu1 %1449 }
 0xb2d   : > { %6941 = vrcp.f32 %v1450_v12 }
 0xb30   : > { %v6847_v40 = vpop.permute.xlu1 %6846 }
 0xb31   : > { %v6849_v51 = vunpack.i.h.bf16 %v6847_v40  ;;  %v6848_v52 = vunpack.i.l.bf16 %v6847_v40 }
 0xb33   : > { %v1762_v55 = vsel %vm534_vm1, %v6848_v52, %v6849_v51 }
 0xb34   : > { %v6628_v57 = vpack.c.bf16 %v1763_v56, %v1762_v55 }
 0xb37   : > { %v6942_v13 = vpop.eup %6941 }
 0xb38   : > { %v1452_v14 = vmul.f32 %v6942_v13, %v6940_v5  ;;  %v6867_v5 = vpop.permute.xlu0 %6866 }
 0xb39   : > { %v6869_v41 = vunpack.i.h.bf16 %v6867_v5  ;;  %v6868_v7 = vunpack.i.l.bf16 %v6867_v5 }
 0xb3a   : > { %6155 = vmatmul.mubr.msk.f32.vlgmr.msra.gmra.mrb[2].mxu0 %vm725_vm4, %v1452_v14 }
 0xb3b   : > { %6180 = vmatprep.mubr.msk.f32.mxu0 %vm7056_vm2, %v7055_v17  ;;  %6617 = vmatpush3.bf16.msra.mxu0 %v6616_v21  ;;  %v1766_v10 = vsel %vm534_vm1, %v6868_v7, %v6869_v41  ;;  %v6880_v21 = vpack.i.bf16 %v1632_v20, %v1631_v47  ;;  %v1634_v41 = vld [vmem:[%s8307_s9 + $0x8] sm:$0xff] }
 0xb3c   : > { %6618 = vmatprep.subr.bf16.mxu0 %v7062_v11  ;;  %v6877_v22 = vpop.permute.xlu0 %6876 }
 0xb3d   : > { %v6879_v24 = vunpack.i.h.bf16 %v6877_v22 }
 0xb3f   : > { %6620 = vmatpush3.bf16.msra.mxu0 %v6619_v28 }
 0xb40   : > { %6621 = vmatprep.subr.bf16.mxu0 %v7062_v11  ;;  %v6862_v58 = vpop.permute.xlu1 %6861 }
 0xb41   : > { %v6864_v60 = vunpack.i.h.bf16 %v6862_v58  ;;  %v6863_v61 = vunpack.i.l.bf16 %v6862_v58 }
 0xb43   : > { %6623 = vmatpush3.bf16.msra.mxu0 %v6622_v38  ;;  %v1765_v0 = vsel %vm534_vm1, %v6863_v61, %v6864_v60 }
 0xb44   : > { %6624 = vmatprep.subr.bf16.mxu0 %v7062_v11  ;;  %v6631_v3 = vpack.c.bf16 %v1765_v0, %v1764_v2  ;;  %v6872_v4 = vpop.permute.xlu1 %6871 }
 0xb45   : > { %v6874_v6 = vunpack.i.h.bf16 %v6872_v4  ;;  %v6873_v45 = vunpack.i.l.bf16 %v6872_v4 }
 0xb47   : > { %6626 = vmatpush3.bf16.msra.mxu0 %v6625_v49  ;;  %v1767_v8 = vsel %vm534_vm1, %v6873_v45, %v6874_v6  ;;  %v1633_v45 = vld [vmem:[%s8307_s9] sm:$0xff] }
 0xb48   : > { %6202 = vmatprep.subr.mxu0 %v7055_v17  ;;  %v6634_v12 = vpack.c.bf16 %v1767_v8, %v1766_v10  ;;  %v6643_v8 = vpack.c.bf16 %v1634_v41, %v1633_v45 }
 0xc0d   : > { %v1525_v42 = vpop.f32.mrb[2].mxu0 }
 0xc0e   : > { %v6156_v43 = vpop.f32.mrb[3].mxu0  ;;  %6162 = vmatmul.mubr.msk.f32.vlgmr.msra.gmra.mrb[20].mxu1 %vm649_vm3, %v1525_v42 }
 0xc0f   : > { %6199 = vmatprep.mubr.msk.f32.mxu1 %vm7056_vm2, %v7055_v17  ;;  %6629 = vmatpush3.bf16.msra.mxu1 %v6628_v57 }
 0xc10   : > { %6630 = vmatprep.subr.bf16.mxu1 %v7062_v11 }
 0xc13   : > { %6632 = vmatpush3.bf16.msra.mxu1 %v6631_v3 }
 0xc14   : > { %6633 = vmatprep.subr.bf16.mxu1 %v7062_v11 }
 0xc17   : > { %6635 = vmatpush3.bf16.msra.mxu1 %v6634_v12  ;;  %v1635_v12 = vld [vmem:[%s8307_s9 + $0x10] sm:$0xff] }
 0xc18   : > { %6636 = vmatprep.subr.bf16.mxu1 %v7062_v11 }
 0xce1   : > { %v1598_v13 = vpop.f32.mrb[20].mxu1 }
 0xce2   : > { %v1602_v14 = vadd.f32 %v1598_v13, %v7375_v9  ;;  %v6163_v15 = vpop.f32.mrb[21].mxu1  ;;  %v1636_v13 = vld [vmem:[%s8307_s9 + $0x18] sm:$0xff] }
 0xce4   : > { %v7450_v16 = vadd.f32 %v1602_v14, %v7176_v1  ;;  %v6878_v1 = vunpack.i.l.bf16 %v6877_v22  ;;  %v6640_v14 = vpack.c.bf16 %v1636_v13, %v1635_v12  ;;  %v2817_v13 = vld [vmem:[%s8308_s10] sm:$0xff] }
 0xce6   : > { %v1604_v18 = vmul.f32 %v7450_v16, %v7450_v16  ;;  %v1768_v27 = vsel %vm534_vm1, %v6878_v1, %v6879_v24 }
 0xce8   : > { %v1605_v19 = vsel %vm534_vm1, %v1604_v18, 0.0 }
 0xce9   : > { %1606 = vadd.xlane.f32.xlu1 %v1605_v19 }
 0xcfa   : > { %6881 = vrot.lane.b32.xlu1 %v6880_v21, %s8325_s18 }
 0xd76   : > { %v1607_v9 = vpop.xlane.xlu1 %1606 }
 0xd77   : > { %v1608_v23 = vmul.f32 0.015625, %v1607_v9 }
 0xd79   : > { %v1609_v25 = vadd.f32 1e-06, %v1608_v23 }
 0xd7a   : > { %v6882_v26 = vpop.permute.xlu1 %6881 }
 0xd7b   : > { %6943 = vrsqrt.f32 %v1609_v25  ;;  %v6884_v28 = vunpack.i.h.bf16 %v6882_v26  ;;  %v6883_v29 = vunpack.i.l.bf16 %v6882_v26 }
 0xd7d   : > { %v1769_v30 = vsel %vm534_vm1, %v6883_v29, %v6884_v28 }
 0xd7e   : > { %v6637_v31 = vpack.c.bf16 %v1769_v30, %v1768_v27 }
 0xd80   : > { %6638 = vmatpush3.bf16.msra.mxu1 %v6637_v31 }
 0xd81   : > { %6207 = vmatprep.subr.mxu1 %v7055_v17 }
 0xd83   : > { %6200 = vmatmul.mubr.msk.f32.vlgmr.msra.gmra.mrb[22].mxu1 %vm534_vm1, %v510_v32 }
 0xd84   : > { %6209 = vmatprep.mubr.msk.f32.mxu1 %vm7056_vm2, %v7055_v17 }
 0xd85   : > { %v6944_v38 = vpop.eup %6943 }
 0xd86   : > { %v1611_v39 = vmul.f32 %v6944_v38, %v7450_v16 }
 0xd88   : > { %v1616_v42 = vmul.f32 %v1615_v37, %v1611_v39  ;;  %v1637_v39 = vld [vmem:[%s8307_s9 + $0x20] sm:$0xff] }
 0xd8a   : > { %6181 = vmatmul.mubr.msk.f32.vlgmr.msra.gmra.mrb[4].mxu0 %vm534_vm1, %v1616_v42  ;;  %v1638_v42 = vld [vmem:[%s8307_s9 + $0x28] sm:$0xff] }
 0xd8b   : > { %6204 = vmatprep.mubr.msk.f32.mxu0 %vm7056_vm2, %v7055_v17 }
 0xe56   : > { %v7474_v43 = vpop.f32.mrb[22].mxu1 }
 0xe57   : > { %v6201_v44 = vpop.f32.mrb[23].mxu1  ;;  %2016 = vrot.lane.b32.xlu0 %v7474_v43, %s8337_s15  ;;  %6203 = vmatpush3.xpose.msk.msra.mxu0 %vm649_vm3, %v7474_v43 }
 0xe58   : > { %6212 = vmatprep.subr.mxu0 %v7055_v17  ;;  %v6646_v44 = vpack.c.bf16 %v1638_v42, %v1637_v39  ;;  %v2907_v42 = vld [vmem:[%s8309_s11 + $0x40] sm:$0xff] }
 0xe5d   : > { %v7481_v35 = vpop.f32.mrb[4].mxu0 }
 0xe5e   : > { %2014 = vrot.lane.b32.xlu1 %v7481_v35, %s8337_s15  ;;  %v6182_v46 = vpop.f32.mrb[5].mxu0  ;;  %6205 = vmatmul.mubr.msk.f32.vlgmr.msra.gmra.mrb[6].mxu0 %vm649_vm3, %v7481_v35 }
 0xe5f   : > { %6214 = vmatprep.mubr.msk.f32.mxu0 %vm7056_vm2, %v7055_v17 }
 0xec9   : > { %v2017_v47 = vpop.permute.xlu0 %2016 }
 0xeca   : > { %6213 = vmatpush3.xpose.msk.msra.mxu0 %vm649_vm3, %v2017_v47 }
 0xecb   : > { %6639 = vmatprep.subr.bf16.mxu0 %v7062_v11 }
 0xed0   : > { %v2015_v48 = vpop.permute.xlu1 %2014 }
 0xed1   : > { %6215 = vmatmul.mubr.msk.f32.vlgmr.msra.gmra.mrb[8].mxu0 %vm649_vm3, %v2015_v48 }
 0xed2   : > { %6226 = vmatprep.mubr.msk.f32.mxu0 %vm7056_vm2, %v7055_v17  ;;  %6641 = vmatpush3.bf16.msra.mxu0 %v6640_v14  ;;  %v2818_v14 = vld [vmem:[%s8308_s10 + $0x8] sm:$0xff] }
 0xed3   : > { %6236 = vmatprep.subr.mxu0 %v7055_v17 }
 0xf31   : > { %v1923_v49 = vpop.f32.mrb[6].mxu0 }
 0xf32   : > { %v6206_v40 = vpop.f32.mrb[7].mxu0  ;;  %v1927_v50 = vsel %vm725_vm4, %v1923_v49, -inf }
 0xf33   : > { %1928 = vmax.xlane.f32.xlu0 %v1927_v50 }
 0xfa4   : > { %v2088_v51 = vpop.f32.mrb[8].mxu0 }
 0xfa5   : > { %v6216_v52 = vpop.f32.mrb[9].mxu0  ;;  %v2092_v53 = vsel %vm725_vm4, %v2088_v51, -inf }
 0xfa6   : > { %2093 = vmax.xlane.f32.xlu1 %v2092_v53 }
 0xfb7   : > { %2103 = vrot.lane.b32.xlu1 %v7474_v43, %s8338_s17 }
 0xfbb   : > { %2327 = vrot.lane.b32.xlu1 %v7474_v43, %s8339_s19 }
 0xfbf   : > { %2325 = vrot.lane.b32.xlu1 %v7481_v35, %s8339_s19 }
 0xfc0   : > { %v1929_v54 = vpop.xlane.xlu0 %1928 }
 0xfc1   : > { %v1930_v55 = vsub.f32 %v1923_v49, %v1929_v54 }
 0xfc3   : > { %v1931_v56 = vmul.f32 1.442695, %v1930_v55 }
 0xfc5   : > { %6945 = vpow2.f32 %v1931_v56 }
 0xfcf   : > { %v6946_v57 = vpop.eup %6945 }
 0xfd0   : > { %v1933_v58 = vsel %vm725_vm4, %v6946_v57, 0.0 }
 0xfd1   : > { %1934 = vadd.xlane.f32.xlu0 %v1933_v58 }
0x1033   : > { %v2094_v59 = vpop.xlane.xlu1 %2093 }
0x1034   : > { %v2095_v60 = vsub.f32 %v2088_v51, %v2094_v59  ;;  %v1639_v59 = vld [vmem:[%s8307_s9 + $0x30] sm:$0xff] }
0x1036   : > { %v2096_v61 = vmul.f32 1.442695, %v2095_v60  ;;  %v1640_v60 = vld [vmem:[%s8307_s9 + $0x38] sm:$0xff] }
0x1037   : > { %v2104_v6 = vpop.permute.xlu1 %2103 }
0x1038   : > { %6947 = vpow2.f32 %v2096_v61  ;;  %v6649_v61 = vpack.c.bf16 %v1640_v60, %v1639_v59  ;;  %v2913_v60 = vld [vmem:[%s8309_s11 + $0x70] sm:$0xff] }
0x103b   : > { %v2328_v19 = vpop.permute.xlu1 %2327 }
0x103f   : > { %v2326_v22 = vpop.permute.xlu1 %2325 }
0x1042   : > { %v6948_v62 = vpop.eup %6947 }
0x1043   : > { %v2098_v63 = vsel %vm725_vm4, %v6948_v62, 0.0 }
0x1044   : > { %2099 = vadd.xlane.f32.xlu0 %v2098_v63 }
0x105a   : > { %1938 = vrot.lane.b32.xlu0 %v7474_v43, %s8325_s18 }
0x105e   : > { %v1935_v0 = vpop.xlane.xlu0 %1934 }
0x105f   : > { %6949 = vrcp.f32 %v1935_v0 }
0x1069   : > { %v6950_v3 = vpop.eup %6949 }
0x106a   : > { %v1937_v4 = vmul.f32 %v6950_v3, %v6946_v57 }
0x10d1   : > { %v2100_v2 = vpop.xlane.xlu0 %2099 }
0x10d2   : > { %6951 = vrcp.f32 %v2100_v2 }
0x10d5   : > { %v1939_v5 = vpop.permute.xlu0 %1938 }
0x10d6   : > { %6208 = vmatpush3.msra.mxu1 %v1939_v5 }
0x10d7   : > { %6210 = vmatmul.mubr.msk.f32.vlgmr.msra.gmra.mrb[24].mxu1 %vm725_vm4, %v1937_v4  ;;  %6217 = vmatprep.subr.mxu1 %v7055_v17 }
0x10d8   : > { %6218 = vmatpush3.msra.mxu1 %v2104_v6  ;;  %6219 = vmatprep.mubr.msk.f32.mxu1 %vm7056_vm2, %v7055_v17 }
0x10d9   : > { %6642 = vmatprep.subr.bf16.mxu1 %v7062_v11 }
0x10dc   : > { %v6952_v7 = vpop.eup %6951 }
0x10dd   : > { %v2102_v10 = vmul.f32 %v6952_v7, %v6948_v62 }
0x10df   : > { %6220 = vmatmul.mubr.msk.f32.vlgmr.msra.gmra.mrb[26].mxu1 %vm725_vm4, %v2102_v10 }
0x10e0   : > { %6644 = vmatpush3.bf16.msra.mxu1 %v6643_v8  ;;  %6233 = vmatprep.mubr.msk.f32.mxu1 %vm7056_vm2, %v7055_v17 }
0x10e1   : > { %6241 = vmatprep.subr.mxu1 %v7055_v17 }
0x11aa   : > { %v2010_v15 = vpop.f32.mrb[24].mxu1 }
0x11ab   : > { %v6211_v18 = vpop.f32.mrb[25].mxu1  ;;  %6234 = vmatmul.mubr.msk.f32.vlgmr.msra.gmra.mrb[28].mxu1 %vm649_vm3, %v2010_v15  ;;  %v6652_v15 = vpack.c.bf16 %v2818_v14, %v2817_v13  ;;  %v5754_v13 = vld [vmem:[%s8304_s6 + $0xa8] sm:$0xff]  ;;  %v5756_v14 = vld [vmem:[%s8304_s6 + $0xb8] sm:$0xff] }
0x11ac   : > { %6243 = vmatprep.mubr.msk.f32.mxu1 %vm7056_vm2, %v7055_v17  ;;  %v2820_v18 = vld [vmem:[%s8308_s10 + $0x18] sm:$0xff] }
0x11b2   : > { %v2175_v20 = vpop.f32.mrb[26].mxu1 }
0x11b3   : > { %v6221_v21 = vpop.f32.mrb[27].mxu1  ;;  %6227 = vmatmul.mubr.msk.f32.vlgmr.msra.gmra.mrb[10].mxu0 %vm649_vm3, %v2175_v20  ;;  %v2821_v20 = vld [vmem:[%s8308_s10 + $0x20] sm:$0xff] }
0x11b4   : > { %6237 = vmatpush3.xpose.msk.msra.mxu0 %vm649_vm3, %v2328_v19  ;;  %6238 = vmatprep.mubr.msk.f32.mxu0 %vm7056_vm2, %v7055_v17  ;;  %v2822_v21 = vld [vmem:[%s8308_s10 + $0x28] sm:$0xff] }
0x11b5   : > { %6645 = vmatprep.subr.bf16.mxu0 %v7062_v11 }
0x11b7   : > { %6239 = vmatmul.mubr.msk.f32.vlgmr.msra.gmra.mrb[12].mxu0 %vm649_vm3, %v2326_v22  ;;  %v6658_v22 = vpack.c.bf16 %v2822_v21, %v2821_v20  ;;  %v5758_v20 = vld [vmem:[%s8304_s6 + $0xc8] sm:$0xff]  ;;  %v5760_v21 = vld [vmem:[%s8304_s6 + $0xd8] sm:$0xff] }
0x11b8   : > { %6250 = vmatprep.mubr.msk.f32.mxu0 %vm7056_vm2, %v7055_v17  ;;  %6647 = vmatpush3.bf16.msra.mxu0 %v6646_v44  ;;  %v2908_v44 = vld [vmem:[%s8309_s11 + $0x48] sm:$0xff] }
0x11b9   : > { %6258 = vmatprep.subr.mxu0 %v7055_v17 }
0x127e   : > { %v2321_v9 = vpop.f32.mrb[28].mxu1 }
0x127f   : > { %v6235_v23 = vpop.f32.mrb[29].mxu1 }
0x1280   : > { %v2824_v23 = vld [vmem:[%s8308_s10 + $0x38] sm:$0xff] }
0x1286   : > { %v2248_v24 = vpop.f32.mrb[10].mxu0 }
0x1287   : > { %v2322_v1 = vadd.f32 %v2321_v9, %v2248_v24  ;;  %v6228_v25 = vpop.f32.mrb[11].mxu0  ;;  %v2823_v9 = vld [vmem:[%s8308_s10 + $0x30] sm:$0xff] }
0x1288   : > { %v6661_v24 = vpack.c.bf16 %v2824_v23, %v2823_v9  ;;  %v2900_v25 = vld [vmem:[%s8309_s11 + $0x8] sm:$0xff]  ;;  %v5757_v9 = vld [vmem:[%s8304_s6 + $0xc0] sm:$0xff]  ;;  %v5759_v23 = vld [vmem:[%s8304_s6 + $0xd0] sm:$0xff] }
0x128a   : > { %v2399_v26 = vpop.f32.mrb[12].mxu0 }
0x128b   : > { %v6240_v27 = vpop.f32.mrb[13].mxu0  ;;  %v2403_v28 = vsel %vm725_vm4, %v2399_v26, -inf }
0x128c   : > { %2404 = vmax.xlane.f32.xlu0 %v2403_v28  ;;  %v2902_v28 = vld [vmem:[%s8309_s11 + $0x18] sm:$0xff] }
0x12a2   : > { %2414 = vrot.lane.b32.xlu0 %v7474_v43, %s8340_s28 }
0x12a6   : > { %2564 = vrot.lane.b32.xlu0 %v7481_v35, %s8341_s23 }
0x1319   : > { %v2405_v29 = vpop.xlane.xlu0 %2404 }
0x131a   : > { %v2406_v30 = vsub.f32 %v2399_v26, %v2405_v29  ;;  %v2901_v26 = vld [vmem:[%s8309_s11 + $0x10] sm:$0xff] }
0x131b   : > { %v6667_v29 = vpack.c.bf16 %v2902_v28, %v2901_v26  ;;  %v5763_v28 = vld [vmem:[%s8304_s6 + $0xf0] sm:$0xff] }
0x131c   : > { %v2407_v31 = vmul.f32 1.442695, %v2406_v30  ;;  %v2903_v30 = vld [vmem:[%s8309_s11 + $0x20] sm:$0xff] }
0x131d   : > { %v2415_v32 = vpop.permute.xlu0 %2414 }
0x131e   : > { %6953 = vpow2.f32 %v2407_v31  ;;  %6242 = vmatpush3.msra.mxu1 %v2415_v32  ;;  %v2904_v31 = vld [vmem:[%s8309_s11 + $0x28] sm:$0xff] }
0x131f   : > { %6253 = vmatprep.subr.mxu1 %v7055_v17  ;;  %v6670_v32 = vpack.c.bf16 %v2904_v31, %v2903_v30 }
0x1321   : > { %v2565_v49 = vpop.permute.xlu0 %2564 }
0x1328   : > { %v6954_v37 = vpop.eup %6953 }
0x1329   : > { %v2409_v38 = vsel %vm725_vm4, %v6954_v37, 0.0 }
0x132a   : > { %2410 = vadd.xlane.f32.xlu1 %v2409_v38  ;;  %v2906_v38 = vld [vmem:[%s8309_s11 + $0x38] sm:$0xff] }
0x133b   : > { %2566 = vrot.lane.b32.xlu1 %v7474_v43, %s8341_s23 }
0x13b7   : > { %v2411_v35 = vpop.xlane.xlu1 %2410 }
0x13b8   : > { %6955 = vrcp.f32 %v2411_v35  ;;  %v6676_v35 = vpack.c.bf16 %v2908_v44, %v2907_v42 }
0x13bb   : > { %v2567_v48 = vpop.permute.xlu1 %2566 }
0x13c2   : > { %v6956_v46 = vpop.eup %6955 }
0x13c3   : > { %v2413_v47 = vmul.f32 %v6956_v46, %v6954_v37  ;;  %v2905_v37 = vld [vmem:[%s8309_s11 + $0x30] sm:$0xff] }
0x13c4   : > { %v6673_v39 = vpack.c.bf16 %v2906_v38, %v2905_v37  ;;  %v2909_v46 = vld [vmem:[%s8309_s11 + $0x50] sm:$0xff]  ;;  %v7742_v37 = vld [vmem:[%s8303_s5 + $0x4] sm:$0x7] }
0x13c5   : > { %6244 = vmatmul.mubr.msk.f32.vlgmr.msra.gmra.mrb[30].mxu1 %vm725_vm4, %v2413_v47  ;;  %v2910_v47 = vld [vmem:[%s8309_s11 + $0x58] sm:$0xff]  ;;  %v2999_v38 = vrot.slane %v7742_v37, %v545_v34 }
0x13c6   : > { %6254 = vmatpush3.xpose.msk.msra.mxu1 %vm649_vm3, %v2567_v48  ;;  %6255 = vmatprep.mubr.msk.f32.mxu1 %vm7056_vm2, %v7055_v17  ;;  %v6679_v48 = vpack.c.bf16 %v2910_v47, %v2909_v46 }
0x13c7   : > { %6648 = vmatprep.subr.bf16.mxu1 %v7062_v11 }
0x13c9   : > { %6256 = vmatmul.mubr.msk.f32.vlgmr.msra.gmra.mrb[32].mxu1 %vm649_vm3, %v2565_v49  ;;  %v2911_v49 = vld [vmem:[%s8309_s11 + $0x60] sm:$0xff] }
0x13ca   : > { %6267 = vmatprep.mubr.msk.f32.mxu1 %vm7056_vm2, %v7055_v17  ;;  %6650 = vmatpush3.bf16.msra.mxu1 %v6649_v61  ;;  %v2914_v61 = vld [vmem:[%s8309_s11 + $0x78] sm:$0xff] }
0x13cb   : > { %6663 = vmatprep.subr.bf16.mxu1 %v7062_v11 }
0x1498   : > { %v2486_v40 = vpop.f32.mrb[30].mxu1 }
0x1499   : > { %v6245_v50 = vpop.f32.mrb[31].mxu1  ;;  %6251 = vmatmul.mubr.msk.f32.vlgmr.msra.gmra.mrb[14].mxu0 %vm649_vm3, %v2486_v40  ;;  %v2912_v40 = vld [vmem:[%s8309_s11 + $0x68] sm:$0xff] }
0x149a   : > { %6260 = vmatprep.mubr.msk.f32.mxu0 %vm7056_vm2, %v7055_v17  ;;  %v6682_v50 = vpack.c.bf16 %v2912_v40, %v2911_v49  ;;  %v7010_v40 = vld [vmem:[%s8302_s4] sm:$0xff] }
0x149c   : > { %v2638_v51 = vpop.f32.mrb[32].mxu1 }
0x149d   : > { %v6257_v52 = vpop.f32.mrb[33].mxu1  ;;  %v2642_v53 = vsel %vm725_vm4, %v2638_v51, -inf }
0x149e   : > { %2643 = vmax.xlane.f32.xlu1 %v2642_v53 }
0x152b   : > { %v2644_v54 = vpop.xlane.xlu1 %2643 }
0x152c   : > { %v2645_v55 = vsub.f32 %v2638_v51, %v2644_v54  ;;  %v2814_v54 = vsub.s32 2, %v7231_v33 }
0x152e   : > { %v2646_v56 = vmul.f32 1.442695, %v2645_v55  ;;  %v7009_v55 = vld [vmem:[%s8303_s5] sm:$0x7] }
0x1530   : > { %6957 = vpow2.f32 %v2646_v56  ;;  %v2815_v56 = vrot.slane %v7009_v55, %v2814_v54 }
0x153a   : > { %v6958_v57 = vpop.eup %6957 }
0x153b   : > { %v2648_v58 = vsel %vm725_vm4, %v6958_v57, 0.0 }
0x153c   : > { %2649 = vadd.xlane.f32.xlu0 %v2648_v58 }
0x1552   : > { %2653 = vrot.lane.b32.xlu0 %v7474_v43, %s8342_s24 }
0x156c   : > { %v2559_v62 = vpop.f32.mrb[14].mxu0 }
0x156d   : > { %v2563_v63 = vadd.f32 %v2559_v62, %v2322_v1  ;;  %v6252_v0 = vpop.f32.mrb[15].mxu0  ;;  %v2899_v1 = vld [vmem:[%s8309_s11] sm:$0xff]  ;;  %v6685_v62 = vpack.c.bf16 %v2914_v61, %v2913_v60 }
0x156e   : > { %v6664_v27 = vpack.c.bf16 %v2900_v25, %v2899_v1  ;;  %v5762_v1 = vld [vmem:[%s8304_s6 + $0xe8] sm:$0xff]  ;;  %v5764_v25 = vld [vmem:[%s8304_s6 + $0xf8] sm:$0xff] }
0x156f   : > { %v6699_v26 = vpack.c.bf16 %v5764_v25, %v5762_v1 }
0x15c9   : > { %v2650_v2 = vpop.xlane.xlu0 %2649 }
0x15ca   : > { %6959 = vrcp.f32 %v2650_v2 }
0x15cd   : > { %v2654_v3 = vpop.permute.xlu0 %2653 }
0x15ce   : > { %6259 = vmatpush3.msra.mxu0 %v2654_v3 }
0x15cf   : > { %6651 = vmatprep.subr.bf16.mxu0 %v7062_v11 }
0x15d4   : > { %v6960_v43 = vpop.eup %6959 }
0x15d5   : > { %v2652_v4 = vmul.f32 %v6960_v43, %v6958_v57 }
0x15d7   : > { %6261 = vmatmul.mubr.msk.f32.vlgmr.msra.gmra.mrb[16].mxu0 %vm725_vm4, %v2652_v4 }
0x15d8   : > { %6286 = vmatprep.mubr.msk.f32.mxu0 %vm7056_vm2, %v7055_v17  ;;  %6653 = vmatpush3.bf16.msra.mxu0 %v6652_v15  ;;  %v6691_v15 = vpack.c.bf16 %v5756_v14, %v5754_v13 }
0x15d9   : > { %6654 = vmatprep.subr.bf16.mxu0 %v7062_v11 }
0x16aa   : > { %v2725_v5 = vpop.f32.mrb[16].mxu0 }
0x16ab   : > { %v6262_v6 = vpop.f32.mrb[17].mxu0  ;;  %6268 = vmatmul.mubr.msk.f32.vlgmr.msra.gmra.mrb[34].mxu1 %vm649_vm3, %v2725_v5 }
0x16ac   : > { %6321 = vmatprep.mubr.msk.f32.mxu1 %vm7056_vm2, %v7055_v17  ;;  %6665 = vmatpush3.bf16.msra.mxu1 %v6664_v27  ;;  %v5761_v27 = vld [vmem:[%s8304_s6 + $0xe0] sm:$0xff] }
0x16ad   : > { %6666 = vmatprep.subr.bf16.mxu1 %v7062_v11 }
0x16b0   : > { %6668 = vmatpush3.bf16.msra.mxu1 %v6667_v29  ;;  %v6701_v29 = vpack.c.bf16 %v5763_v28, %v5761_v27 }
0x16b1   : > { %6669 = vmatprep.subr.bf16.mxu1 %v7062_v11 }
0x16b4   : > { %6671 = vmatpush3.bf16.msra.mxu1 %v6670_v32 }
0x16b5   : > { %6672 = vmatprep.subr.bf16.mxu1 %v7062_v11 }
0x16b8   : > { %6674 = vmatpush3.bf16.msra.mxu1 %v6673_v39 }
0x16b9   : > { %6675 = vmatprep.subr.bf16.mxu1 %v7062_v11 }
0x16bc   : > { %6677 = vmatpush3.bf16.msra.mxu1 %v6676_v35 }
0x16bd   : > { %6678 = vmatprep.subr.bf16.mxu1 %v7062_v11 }
0x16c0   : > { %6680 = vmatpush3.bf16.msra.mxu1 %v6679_v48 }
0x16c1   : > { %6681 = vmatprep.subr.bf16.mxu1 %v7062_v11 }
0x16c4   : > { %6683 = vmatpush3.bf16.msra.mxu1 %v6682_v50 }
0x16c5   : > { %6684 = vmatprep.subr.bf16.mxu1 %v7062_v11 }
0x16c8   : > { %6686 = vmatpush3.bf16.msra.mxu1 %v6685_v62 }
0x16c9   : > { %6329 = vmatprep.subr.mxu1 %v7055_v17 }
0x177e   : > { %v2798_v45 = vpop.f32.mrb[34].mxu1 }
0x177f   : > { %v2802_v41 = vadd.f32 %v2798_v45, %v2563_v63  ;;  %v6269_v7 = vpop.f32.mrb[35].mxu1  ;;  %v5750_v45 = vld [vmem:[%s8304_s6 + $0x88] sm:$0xff] }
0x1781   : > { %v7585_v8 = vadd.f32 %v2802_v41, %v7450_v16  ;;  %v2819_v16 = vld [vmem:[%s8308_s10 + $0x10] sm:$0xff]  ;;  %v5752_v41 = vld [vmem:[%s8304_s6 + $0x98] sm:$0xff] }
0x1782   : > { %v6655_v19 = vpack.c.bf16 %v2820_v18, %v2819_v16  ;;  %v6687_v7 = vpack.c.bf16 %v5752_v41, %v5750_v45  ;;  %v5753_v16 = vld [vmem:[%s8304_s6 + $0xa0] sm:$0xff]  ;;  %v5755_v18 = vld [vmem:[%s8304_s6 + $0xb0] sm:$0xff] }
0x1783   : > { %v2804_v10 = vmul.f32 %v7585_v8, %v7585_v8 }
0x1784   : > { %6656 = vmatpush3.bf16.msra.mxu0 %v6655_v19  ;;  %v6693_v19 = vpack.c.bf16 %v5755_v18, %v5753_v16  ;;  %v5765_v16 = vld [vmem:[%s8305_s7 + $0x40] sm:$0xff]  ;;  %v5766_v18 = vld [vmem:[%s8305_s7 + $0x48] sm:$0xff] }
0x1785   : > { %v2805_v12 = vsel %vm534_vm1, %v2804_v10, 0.0  ;;  %6657 = vmatprep.subr.bf16.mxu0 %v7062_v11  ;;  %v5751_v10 = vld [vmem:[%s8304_s6 + $0x90] sm:$0xff] }
0x1786   : > { %2806 = vadd.xlane.f32.xlu1 %v2805_v12 }
0x1788   : > { %6659 = vmatpush3.bf16.msra.mxu0 %v6658_v22  ;;  %v6695_v22 = vpack.c.bf16 %v5760_v21, %v5758_v20  ;;  %v6707_v21 = vpack.c.bf16 %v5766_v18, %v5765_v16 }
0x1789   : > { %6660 = vmatprep.subr.bf16.mxu0 %v7062_v11 }
0x178c   : > { %6662 = vmatpush3.bf16.msra.mxu0 %v6661_v24  ;;  %v6697_v24 = vpack.c.bf16 %v5759_v23, %v5757_v9 }
0x178d   : > { %6688 = vmatprep.subr.bf16.mxu0 %v6687_v7  ;;  %v5767_v7 = vld [vmem:[%s8305_s7 + $0x50] sm:$0xff] }
0x1813   : > { %v2807_v51 = vpop.xlane.xlu1 %2806 }
0x1814   : > { %v2808_v52 = vmul.f32 0.015625, %v2807_v51 }
0x1816   : > { %v2809_v53 = vadd.f32 1e-06, %v2808_v52  ;;  %v7778_v52 = vld [vmem:[%s7169_s25] sm:$0xff] }
0x1818   : > { %6961 = vrsqrt.f32 %v2809_v53 }
0x1822   : > { %v6962_v57 = vpop.eup %6961 }
0x1823   : > { %v2811_v58 = vmul.f32 %v6962_v57, %v7585_v8 }
0x1825   : > { %v2816_v59 = vmul.f32 %v2815_v56, %v2811_v58  ;;  %v7012_v56 = vld [vmem:[%s8302_s4 + $0x8] sm:$0xff] }
0x1827   : > { %6287 = vmatmul.mubr.msk.f32.vlgmr.msra.gmra.mrb[18].mxu0 %vm534_vm1, %v2816_v59 }
0x1828   : > { %3094 = vmatprep.mubr.f32.mxu0 %v7055_v17 }
0x18fa   : > { %v2894_v63 = vpop.f32.mrb[18].mxu0 }
0x18fb   : > { %v2898_v0 = vmax.f32 %v2894_v63, 0.0  ;;  %v6288_v2 = vpop.f32.mrb[19].mxu0 }
0x18fd   : > { %6322 = vmatmul.mubr.f32.vlgmr.msra.gmra.mrb[36].mxu1 %v2898_v0 }
0x18fe   : > { %6331 = vmatprep.mubr.msk.f32.mxu1 %vm7056_vm2, %v7055_v17 }
0x19d0   : > { %v2981_v3 = vpop.f32.mrb[36].mxu1 }
0x19d1   : > { %v7685_v43 = vadd.f32 %v2981_v3, %v7585_v8  ;;  %v6323_v4 = vpop.f32.mrb[37].mxu1  ;;  %v5749_v8 = vld [vmem:[%s8304_s6 + $0x80] sm:$0xff] }
0x19d2   : > { %v6689_v12 = vpack.c.bf16 %v5751_v10, %v5749_v8  ;;  %v5768_v8 = vld [vmem:[%s8305_s7 + $0x58] sm:$0xff] }
0x19d3   : > { %v2988_v5 = vmul.f32 %v7685_v43, %v7685_v43  ;;  %v6704_v10 = vpack.c.bf16 %v5768_v8, %v5767_v7 }
0x19d4   : > { %6690 = vmatpush1.bf16.msra.mxu0 %v6689_v12 }
0x19d5   : > { %v2989_v6 = vsel %vm534_vm1, %v2988_v5, 0.0  ;;  %6692 = vmatprep.subr.bf16.mxu0 %v6691_v15 }
0x19d6   : > { %2990 = vadd.xlane.f32.xlu1 %v2989_v6 }
0x19d8   : > { %6694 = vmatpush1.bf16.msra.mxu0 %v6693_v19 }
0x19d9   : > { %6696 = vmatprep.subr.bf16.mxu0 %v6695_v22 }
0x19dc   : > { %6698 = vmatpush1.bf16.msra.mxu0 %v6697_v24 }
0x19dd   : > { %6700 = vmatprep.subr.bf16.mxu0 %v6699_v26 }
0x19e0   : > { %6702 = vmatpush1.bf16.msra.mxu0 %v6701_v29 }
0x19e1   : > { %6324 = vmatprep.subr.mxu0 %v7055_v17 }
0x1a63   : > { %v2991_v30 = vpop.xlane.xlu1 %2990 }
0x1a64   : > { %v2992_v31 = vmul.f32 0.015625, %v2991_v30 }
0x1a66   : > { %v2993_v32 = vadd.f32 1e-06, %v2992_v31 }
0x1a68   : > { %6963 = vrsqrt.f32 %v2993_v32 }
0x1a72   : > { %v6964_v39 = vpop.eup %6963 }
0x1a73   : > { %v2995_v42 = vmul.f32 %v6964_v39, %v7685_v43 }
0x1a75   : > { %v3000_v44 = vmul.f32 %v2999_v38, %v2995_v42  ;;  %v7013_v38 = vld [vmem:[%s8302_s4 + $0x10] sm:$0xff] }
0x1a77   : > { %5773 = vmatmul.mubr.msk.f32.vlgmr.msra.gmra.mrb[20].mxu0 %vm534_vm1, %v3000_v44 }
0x1a78   : > { %6326 = vmatprep.mubr.msk.f32.mxu0 %vm7056_vm2, %v7055_v17 }
0x1b4a   : > { %v7751_v35 = vpop.f32.mrb[20].mxu0 }
0x1b4b   : > { %3265 = vrot.lane.b32.xlu0 %v7751_v35, %s8338_s17  ;;  %3102 = vrot.lane.b32.xlu1 %v7751_v35, %s8343_s1  ;;  %v7757_v46 = vpop.f32.mrb[21].mxu0 }
0x1b4c   : > { %6330 = vmatpush3.msra.mxu1 %v7757_v46 }
0x1b4d   : > { %6339 = vmatprep.subr.mxu1 %v7055_v17 }
0x1b4f   : > { %3263 = vrot.lane.b32.xlu0 %v7751_v35, %s8337_s15 }
0x1bbd   : > { %v3103_v34 = vpop.permute.xlu1 %3102  ;;  %v3266_v47 = vpop.permute.xlu0 %3265 }
0x1bbe   : > { %6325 = vmatpush3.xpose.msk.msra.mxu0 %vm649_vm3, %v3103_v34 }
0x1bbf   : > { %6334 = vmatprep.subr.mxu0 %v7055_v17 }
0x1bc1   : > { %6327 = vmatmul.mubr.msk.f32.vlgmr.msra.gmra.mrb[22].mxu0 %vm649_vm3, %v7751_v35  ;;  %v3264_v48 = vpop.permute.xlu0 %3263 }
0x1bc2   : > { %6335 = vmatpush3.xpose.msk.msra.mxu0 %vm649_vm3, %v3266_v47  ;;  %6336 = vmatprep.mubr.msk.f32.mxu0 %vm7056_vm2, %v7055_v17 }
0x1bc3   : > { %6703 = vmatprep.subr.bf16.mxu0 %v7062_v11 }
0x1bc5   : > { %6337 = vmatmul.mubr.msk.f32.vlgmr.msra.gmra.mrb[24].mxu0 %vm649_vm3, %v3264_v48 }
0x1bc6   : > { %6348 = vmatprep.mubr.msk.f32.mxu0 %vm7056_vm2, %v7055_v17  ;;  %6705 = vmatpush3.bf16.msra.mxu0 %v6704_v10  ;;  %v5771_v10 = vld [vmem:[%s8305_s7 + $0x70] sm:$0xff] }
0x1bc7   : > { %6358 = vmatprep.subr.mxu0 %v7055_v17 }
0x1c94   : > { %v3174_v49 = vpop.f32.mrb[22].mxu0 }
0x1c95   : > { %v3175_v50 = vadd.f32 %v7010_v40, %v3174_v49  ;;  %v6328_v51 = vpop.f32.mrb[23].mxu0 }
0x1c96   : > { %v5769_v51 = vld [vmem:[%s8305_s7 + $0x60] sm:$0xff] }
0x1c97   : > { %v3178_v53 = vadd.f32 %v7778_v52, %v3175_v50 }
0x1c98   : > { %v3337_v55 = vpop.f32.mrb[24].mxu0 }
0x1c99   : > { %v3338_v57 = vadd.f32 %v7012_v56, %v3337_v55  ;;  %v6338_v58 = vpop.f32.mrb[25].mxu0  ;;  %v3179_v59 = vsel %vm725_vm4, %v3178_v53, -inf }
0x1c9a   : > { %3180 = vmax.xlane.f32.xlu1 %v3179_v59 }
0x1c9b   : > { %v3341_v60 = vadd.f32 %v7778_v52, %v3338_v57 }
0x1c9d   : > { %v3342_v61 = vsel %vm725_vm4, %v3341_v60, -inf }
0x1c9e   : > { %3343 = vmax.xlane.f32.xlu0 %v3342_v61 }
0x1cab   : > { %3354 = vrot.lane.b32.xlu1 %v7757_v46, %s8337_s15 }
0x1caf   : > { %3576 = vrot.lane.b32.xlu1 %v7751_v35, %s8339_s19 }
0x1d27   : > { %v3181_v62 = vpop.xlane.xlu1 %3180 }
0x1d28   : > { %v3182_v63 = vsub.f32 %v3178_v53, %v3181_v62  ;;  %v5770_v53 = vld [vmem:[%s8305_s7 + $0x68] sm:$0xff] }
0x1d2a   : > { %v3183_v0 = vmul.f32 1.442695, %v3182_v63 }
0x1d2b   : > { %v3344_v2 = vpop.xlane.xlu0 %3343  ;;  %v3355_v19 = vpop.permute.xlu1 %3354 }
0x1d2c   : > { %6965 = vpow2.f32 %v3183_v0  ;;  %v3345_v3 = vsub.f32 %v3341_v60, %v3344_v2  ;;  %v7014_v0 = vld [vmem:[%s8302_s4 + $0x18] sm:$0xff] }
0x1d2e   : > { %v3346_v4 = vmul.f32 1.442695, %v3345_v3 }
0x1d2f   : > { %v3577_v26 = vpop.permute.xlu1 %3576 }
0x1d30   : > { %6967 = vpow2.f32 %v3346_v4 }
0x1d36   : > { %v6966_v5 = vpop.eup %6965 }
0x1d37   : > { %v3185_v6 = vsel %vm725_vm4, %v6966_v5, 0.0 }
0x1d38   : > { %3186 = vadd.xlane.f32.xlu0 %v3185_v6 }
0x1d3a   : > { %v6968_v45 = vpop.eup %6967 }
0x1d3b   : > { %v3348_v41 = vsel %vm725_vm4, %v6968_v45, 0.0 }
0x1d3c   : > { %3349 = vadd.xlane.f32.xlu0 %v3348_v41 }
0x1d52   : > { %3578 = vrot.lane.b32.xlu0 %v7751_v35, %s8340_s28 }
0x1dc5   : > { %v3187_v12 = vpop.xlane.xlu0 %3186 }
0x1dc6   : > { %6969 = vrcp.f32 %v3187_v12 }
0x1dc9   : > { %v3350_v13 = vpop.xlane.xlu0 %3349 }
0x1dca   : > { %6971 = vrcp.f32 %v3350_v13 }
0x1dcd   : > { %v3579_v1 = vpop.permute.xlu0 %3578 }
0x1dd0   : > { %v6970_v14 = vpop.eup %6969 }
0x1dd1   : > { %v3189_v15 = vmul.f32 %v6970_v14, %v6966_v5 }
0x1dd3   : > { %6332 = vmatmul.mubr.msk.f32.vlgmr.msra.gmra.mrb[38].mxu1 %vm725_vm4, %v3189_v15 }
0x1dd4   : > { %v6972_v20 = vpop.eup %6971  ;;  %6340 = vmatpush3.msra.mxu1 %v3355_v19  ;;  %6341 = vmatprep.mubr.msk.f32.mxu1 %vm7056_vm2, %v7055_v17 }
0x1dd5   : > { %v3352_v22 = vmul.f32 %v6972_v20, %v6968_v45  ;;  %6706 = vmatprep.subr.bf16.mxu1 %v7062_v11  ;;  %v5790_v20 = vld [vmem:[%s8306_s8 + $0x80] sm:$0xff] }
0x1dd7   : > { %6342 = vmatmul.mubr.msk.f32.vlgmr.msra.gmra.mrb[40].mxu1 %vm725_vm4, %v3352_v22  ;;  %v5792_v22 = vld [vmem:[%s8306_s8 + $0x90] sm:$0xff] }
0x1dd8   : > { %6708 = vmatpush3.bf16.msra.mxu1 %v6707_v21  ;;  %6355 = vmatprep.mubr.msk.f32.mxu1 %vm7056_vm2, %v7055_v17  ;;  %v5791_v21 = vld [vmem:[%s8306_s8 + $0x88] sm:$0xff] }
0x1dd9   : > { %6363 = vmatprep.subr.mxu1 %v7055_v17 }
0x1ea6   : > { %v3259_v9 = vpop.f32.mrb[38].mxu1 }
0x1ea7   : > { %v6333_v23 = vpop.f32.mrb[39].mxu1  ;;  %6356 = vmatmul.mubr.msk.f32.vlgmr.msra.gmra.mrb[42].mxu1 %vm649_vm3, %v3259_v9  ;;  %v6885_v9 = vpack.i.bf16 %v5791_v21, %v5790_v20 }
0x1ea8   : > { %6365 = vmatprep.mubr.msk.f32.mxu1 %vm7056_vm2, %v7055_v17  ;;  %v5793_v23 = vld [vmem:[%s8306_s8 + $0x98] sm:$0xff] }
0x1eaa   : > { %v3426_v24 = vpop.f32.mrb[40].mxu1 }
0x1eab   : > { %v6343_v25 = vpop.f32.mrb[41].mxu1  ;;  %6349 = vmatmul.mubr.msk.f32.vlgmr.msra.gmra.mrb[26].mxu0 %vm649_vm3, %v3426_v24  ;;  %v6716_v24 = vpack.c.bf16 %v5792_v22, %v5790_v20 }
0x1eac   : > { %6359 = vmatpush3.xpose.msk.msra.mxu0 %vm649_vm3, %v3579_v1  ;;  %6360 = vmatprep.mubr.msk.f32.mxu0 %vm7056_vm2, %v7055_v17  ;;  %v5794_v1 = vld [vmem:[%s8306_s8 + $0xa0] sm:$0xff]  ;;  %v5795_v25 = vld [vmem:[%s8306_s8 + $0xa8] sm:$0xff] }
0x1ead   : > { %6709 = vmatprep.subr.bf16.mxu0 %v7062_v11 }
0x1eaf   : > { %6361 = vmatmul.mubr.msk.f32.vlgmr.msra.gmra.mrb[28].mxu0 %vm649_vm3, %v3577_v26  ;;  %v6890_v26 = vpack.i.bf16 %v5793_v23, %v5792_v22 }
0x1eb0   : > { %6372 = vmatprep.mubr.msk.f32.mxu0 %vm7056_vm2, %v7055_v17 }
0x1f7a   : > { %v3572_v27 = vpop.f32.mrb[42].mxu1 }
0x1f7b   : > { %v6357_v28 = vpop.f32.mrb[43].mxu1 }
0x1f7c   : > { %v5797_v28 = vld [vmem:[%s8306_s8 + $0xb8] sm:$0xff] }
0x1f7e   : > { %v3499_v29 = vpop.f32.mrb[26].mxu0 }
0x1f7f   : > { %v7827_v30 = vadd.f32 %v3572_v27, %v3499_v29  ;;  %v6350_v31 = vpop.f32.mrb[27].mxu0  ;;  %v5796_v27 = vld [vmem:[%s8306_s8 + $0xb0] sm:$0xff]  ;;  %v6895_v29 = vpack.i.bf16 %v5795_v25, %v5794_v1 }
0x1f80   : > { %v6900_v31 = vpack.i.bf16 %v5797_v28, %v5796_v27 }
0x1f82   : > { %v3650_v32 = vpop.f32.mrb[28].mxu0 }
0x1f83   : > { %v3651_v39 = vadd.f32 %v7013_v38, %v3650_v32  ;;  %v6362_v42 = vpop.f32.mrb[29].mxu0  ;;  %v5798_v32 = vld [vmem:[%s8306_s8 + $0xc0] sm:$0xff]  ;;  %v5799_v38 = vld [vmem:[%s8306_s8 + $0xc8] sm:$0xff] }
0x1f84   : > { %v5801_v42 = vld [vmem:[%s8306_s8 + $0xd8] sm:$0xff] }
0x1f85   : > { %v3654_v44 = vadd.f32 %v7778_v52, %v3651_v39  ;;  %v5800_v39 = vld [vmem:[%s8306_s8 + $0xd0] sm:$0xff] }
0x1f87   : > { %v3655_v34 = vsel %vm725_vm4, %v3654_v44, -inf }
0x1f88   : > { %3656 = vmax.xlane.f32.xlu1 %v3655_v34  ;;  %v6722_v34 = vpack.c.bf16 %v5800_v39, %v5798_v32 }
0x1f99   : > { %3818 = vrot.lane.b32.xlu1 %v7751_v35, %s8342_s24 }
0x1f9d   : > { %3816 = vrot.lane.b32.xlu1 %v7751_v35, %s8341_s23  ;;  %v6710_v35 = vpack.c.bf16 %v5770_v53, %v5769_v51  ;;  %v5802_v51 = vld [vmem:[%s8306_s8 + $0xe0] sm:$0xff] }
0x1f9f   : > { %6711 = vmatpush3.bf16.msra.mxu0 %v6710_v35 }
0x1fa0   : > { %6380 = vmatprep.subr.mxu0 %v7055_v17 }
0x2015   : > { %v3657_v47 = vpop.xlane.xlu1 %3656 }
0x2016   : > { %v3658_v48 = vsub.f32 %v3654_v44, %v3657_v47  ;;  %v6905_v44 = vpack.i.bf16 %v5799_v38, %v5798_v32  ;;  %v6910_v47 = vpack.i.bf16 %v5801_v42, %v5800_v39  ;;  %v7015_v42 = vld [vmem:[%s7163_s22] sm:$0xff] }
0x2018   : > { %v3659_v49 = vmul.f32 1.442695, %v3658_v48 }
0x2019   : > { %v3819_v58 = vpop.permute.xlu1 %3818 }
0x201a   : > { %6973 = vpow2.f32 %v3659_v49 }
0x201d   : > { %v3817_v60 = vpop.permute.xlu1 %3816 }
0x2024   : > { %v6974_v40 = vpop.eup %6973 }
0x2025   : > { %v3661_v50 = vsel %vm725_vm4, %v6974_v40, 0.0 }
0x2026   : > { %3662 = vadd.xlane.f32.xlu0 %v3661_v50  ;;  %v5805_v50 = vld [vmem:[%s8306_s8 + $0xf8] sm:$0xff] }
0x203c   : > { %3666 = vrot.lane.b32.xlu0 %v7757_v46, %s8339_s19 }
0x20b3   : > { %v3663_v55 = vpop.xlane.xlu0 %3662 }
0x20b4   : > { %6975 = vrcp.f32 %v3663_v55 }
0x20b7   : > { %v3667_v56 = vpop.permute.xlu0 %3666 }
0x20b8   : > { %6364 = vmatpush3.msra.mxu1 %v3667_v56 }
0x20b9   : > { %6375 = vmatprep.subr.mxu1 %v7055_v17 }
0x20be   : > { %v6976_v57 = vpop.eup %6975 }
0x20bf   : > { %v3665_v59 = vmul.f32 %v6976_v57, %v6974_v40  ;;  %v5804_v40 = vld [vmem:[%s8306_s8 + $0xf0] sm:$0xff] }
0x20c0   : > { %v6920_v53 = vpack.i.bf16 %v5805_v50, %v5804_v40  ;;  %v6725_v35 = vpack.c.bf16 %v5804_v40, %v5802_v51 }
0x20c1   : > { %6366 = vmatmul.mubr.msk.f32.vlgmr.msra.gmra.mrb[44].mxu1 %vm725_vm4, %v3665_v59 }
0x20c2   : > { %6376 = vmatpush3.xpose.msk.msra.mxu1 %vm649_vm3, %v3819_v58  ;;  %6377 = vmatprep.mubr.msk.f32.mxu1 %vm7056_vm2, %v7055_v17 }
0x20c3   : > { %6712 = vmatprep.subr.bf16.mxu1 %v7062_v11 }
0x20c5   : > { %6378 = vmatmul.mubr.msk.f32.vlgmr.msra.gmra.mrb[46].mxu1 %vm649_vm3, %v3817_v60 }
0x20c6   : > { %6389 = vmatprep.mubr.msk.f32.mxu1 %vm7056_vm2, %v7055_v17 }
0x2194   : > { %v3738_v61 = vpop.f32.mrb[44].mxu1 }
0x2195   : > { %v6367_v62 = vpop.f32.mrb[45].mxu1  ;;  %6373 = vmatmul.mubr.msk.f32.vlgmr.msra.gmra.mrb[30].mxu0 %vm649_vm3, %v3738_v61 }
0x2196   : > { %6382 = vmatprep.mubr.msk.f32.mxu0 %vm7056_vm2, %v7055_v17 }
0x2198   : > { %v3890_v63 = vpop.f32.mrb[46].mxu1 }
0x2199   : > { %v3891_v2 = vadd.f32 %v7014_v0, %v3890_v63  ;;  %v6379_v3 = vpop.f32.mrb[47].mxu1 }
0x219b   : > { %v3894_v4 = vadd.f32 %v7778_v52, %v3891_v2  ;;  %v5772_v52 = vld [vmem:[%s8305_s7 + $0x78] sm:$0xff] }
0x219c   : > { %v6713_v12 = vpack.c.bf16 %v5772_v52, %v5771_v10 }
0x219d   : > { %v3895_v5 = vsel %vm725_vm4, %v3894_v4, -inf }
0x219e   : > { %3896 = vmax.xlane.f32.xlu1 %v3895_v5  ;;  %6714 = vmatpush3.bf16.msra.mxu1 %v6713_v12 }
0x219f   : > { %6727 = vmatprep.subr.bf16.mxu1 %v7062_v11 }
0x21af   : > { %6886 = vrot.lane.b32.xlu1 %v6885_v9, %s8343_s1 }
0x21b3   : > { %6896 = vrot.lane.b32.xlu1 %v6895_v29, %s8343_s1 }
0x21b7   : > { %6906 = vrot.lane.b32.xlu1 %v6905_v44, %s8343_s1  ;;  %v4068_v44 = vrot.slane %v7742_v37, %v1614_v36 }
0x222b   : > { %v3897_v6 = vpop.xlane.xlu1 %3896 }
0x222c   : > { %v3898_v45 = vsub.f32 %v3894_v4, %v3897_v6 }
0x222e   : > { %v3899_v41 = vmul.f32 1.442695, %v3898_v45 }
0x222f   : > { %v6887_v56 = vpop.permute.xlu1 %6886 }
0x2230   : > { %6977 = vpow2.f32 %v3899_v41  ;;  %v6889_v59 = vunpack.i.h.bf16 %v6887_v56  ;;  %v6888_v60 = vunpack.i.l.bf16 %v6887_v56 }
0x2232   : > { %v4217_v62 = vsel %vm534_vm1, %v6888_v60, %v6889_v59 }
0x2233   : > { %v6897_v2 = vpop.permute.xlu1 %6896 }
0x2234   : > { %v6899_v5 = vunpack.i.h.bf16 %v6897_v2  ;;  %v6898_v6 = vunpack.i.l.bf16 %v6897_v2 }
0x2236   : > { %v4219_v41 = vsel %vm534_vm1, %v6898_v6, %v6899_v5 }
0x2237   : > { %v6907_v10 = vpop.permute.xlu1 %6906 }
0x223a   : > { %v6978_v7 = vpop.eup %6977 }
0x223b   : > { %v3901_v8 = vsel %vm725_vm4, %v6978_v7, 0.0 }
0x223c   : > { %3902 = vadd.xlane.f32.xlu0 %v3901_v8 }
0x2252   : > { %3906 = vrot.lane.b32.xlu0 %v7757_v46, %s8341_s23 }
0x2256   : > { %6891 = vrot.lane.b32.xlu0 %v6890_v26, %s8343_s1 }
0x225a   : > { %6901 = vrot.lane.b32.xlu0 %v6900_v31, %s8343_s1 }
0x225e   : > { %6911 = vrot.lane.b32.xlu0 %v6910_v47, %s8343_s1 }
0x2262   : > { %6921 = vrot.lane.b32.xlu0 %v6920_v53, %s8343_s1 }
0x2268   : > { %v3811_v13 = vpop.f32.mrb[30].mxu0 }
0x2269   : > { %v7876_v14 = vadd.f32 %v3811_v13, %v7827_v30  ;;  %v6374_v15 = vpop.f32.mrb[31].mxu0  ;;  %v6719_v30 = vpack.c.bf16 %v5796_v27, %v5794_v1  ;;  %v6909_v13 = vunpack.i.h.bf16 %v6907_v10 }
0x226a   : > { %v6908_v15 = vunpack.i.l.bf16 %v6907_v10  ;;  %v5808_v10 = vld [vmem:[%s8307_s9 + $0x50] sm:$0xff] }
0x22c9   : > { %v3903_v16 = vpop.xlane.xlu0 %3902 }
0x22ca   : > { %6979 = vrcp.f32 %v3903_v16 }
0x22cd   : > { %v3907_v46 = vpop.permute.xlu0 %3906 }
0x22ce   : > { %6381 = vmatpush3.msra.mxu0 %v3907_v46  ;;  %v4221_v46 = vsel %vm534_vm1, %v6908_v15, %v6909_v13 }
0x22cf   : > { %6715 = vmatprep.subr.bf16.mxu0 %v7062_v11 }
0x22d1   : > { %v6892_v55 = vpop.permute.xlu0 %6891 }
0x22d2   : > { %v6894_v57 = vunpack.i.h.bf16 %v6892_v55  ;;  %v6893_v58 = vunpack.i.l.bf16 %v6892_v55 }
0x22d4   : > { %v6980_v18 = vpop.eup %6979  ;;  %v4218_v61 = vsel %vm534_vm1, %v6893_v58, %v6894_v57 }
0x22d5   : > { %v3905_v19 = vmul.f32 %v6980_v18, %v6978_v7  ;;  %v6728_v63 = vpack.c.bf16 %v4218_v61, %v4217_v62  ;;  %v6902_v0 = vpop.permute.xlu0 %6901 }
0x22d6   : > { %v6904_v3 = vunpack.i.h.bf16 %v6902_v0  ;;  %v6903_v4 = vunpack.i.l.bf16 %v6902_v0 }
0x22d7   : > { %6383 = vmatmul.mubr.msk.f32.vlgmr.msra.gmra.mrb[32].mxu0 %vm725_vm4, %v3905_v19 }
0x22d8   : > { %6408 = vmatprep.mubr.msk.f32.mxu0 %vm7056_vm2, %v7055_v17  ;;  %6717 = vmatpush3.bf16.msra.mxu0 %v6716_v24  ;;  %v4220_v45 = vsel %vm534_vm1, %v6903_v4, %v6904_v3  ;;  %v5803_v24 = vld [vmem:[%s8306_s8 + $0xe8] sm:$0xff] }
0x22d9   : > { %6718 = vmatprep.subr.bf16.mxu0 %v7062_v11  ;;  %v6731_v7 = vpack.c.bf16 %v4220_v45, %v4219_v41  ;;  %v6912_v8 = vpop.permute.xlu0 %6911  ;;  %v6915_v1 = vpack.i.bf16 %v5803_v24, %v5802_v51 }
0x22da   : > { %v6914_v52 = vunpack.i.h.bf16 %v6912_v8  ;;  %v6913_v12 = vunpack.i.l.bf16 %v6912_v8 }
0x22dc   : > { %6720 = vmatpush3.bf16.msra.mxu0 %v6719_v30  ;;  %v4222_v16 = vsel %vm534_vm1, %v6913_v12, %v6914_v52  ;;  %v5809_v52 = vld [vmem:[%s8307_s9 + $0x58] sm:$0xff] }
0x22dd   : > { %6721 = vmatprep.subr.bf16.mxu0 %v7062_v11  ;;  %v6734_v18 = vpack.c.bf16 %v4222_v16, %v4221_v46  ;;  %v6922_v25 = vpop.permute.xlu0 %6921  ;;  %v6740_v12 = vpack.c.bf16 %v5809_v52, %v5808_v10  ;;  %v5806_v16 = vld [vmem:[%s8307_s9 + $0x40] sm:$0xff]  ;;  %v5807_v46 = vld [vmem:[%s8307_s9 + $0x48] sm:$0xff] }
0x22de   : > { %v6924_v27 = vunpack.i.h.bf16 %v6922_v25 }
0x22e0   : > { %6723 = vmatpush3.bf16.msra.mxu0 %v6722_v34 }
0x22e1   : > { %6724 = vmatprep.subr.bf16.mxu0 %v7062_v11 }
0x22e4   : > { %6726 = vmatpush3.bf16.msra.mxu0 %v6725_v35 }
0x22e5   : > { %6430 = vmatprep.subr.mxu0 %v7055_v17 }
0x23aa   : > { %v3978_v48 = vpop.f32.mrb[32].mxu0 }
0x23ab   : > { %v6384_v49 = vpop.f32.mrb[33].mxu0  ;;  %6390 = vmatmul.mubr.msk.f32.vlgmr.msra.gmra.mrb[48].mxu1 %vm649_vm3, %v3978_v48 }
0x23ac   : > { %6427 = vmatprep.mubr.msk.f32.mxu1 %vm7056_vm2, %v7055_v17  ;;  %6729 = vmatpush3.bf16.msra.mxu1 %v6728_v63 }
0x23ad   : > { %6730 = vmatprep.subr.bf16.mxu1 %v7062_v11 }
0x23b0   : > { %6732 = vmatpush3.bf16.msra.mxu1 %v6731_v7 }
0x23b1   : > { %6733 = vmatprep.subr.bf16.mxu1 %v7062_v11 }
0x23b4   : > { %6735 = vmatpush3.bf16.msra.mxu1 %v6734_v18 }
0x23b5   : > { %6736 = vmatprep.subr.bf16.mxu1 %v7062_v11 }
0x247e   : > { %v4051_v19 = vpop.f32.mrb[48].mxu1 }
0x247f   : > { %v4055_v20 = vadd.f32 %v4051_v19, %v7876_v14  ;;  %v6391_v21 = vpop.f32.mrb[49].mxu1  ;;  %v6743_v19 = vpack.c.bf16 %v5807_v46, %v5806_v16 }
0x2481   : > { %v7952_v22 = vadd.f32 %v4055_v20, %v7685_v43  ;;  %v6923_v43 = vunpack.i.l.bf16 %v6922_v25 }
0x2483   : > { %v4057_v9 = vmul.f32 %v7952_v22, %v7952_v22  ;;  %v4224_v30 = vsel %vm534_vm1, %v6923_v43, %v6924_v27 }
0x2485   : > { %v4058_v23 = vsel %vm534_vm1, %v4057_v9, 0.0 }
0x2486   : > { %4059 = vadd.xlane.f32.xlu1 %v4058_v23 }
0x2497   : > { %6916 = vrot.lane.b32.xlu1 %v6915_v1, %s8343_s1 }
0x2513   : > { %v4060_v14 = vpop.xlane.xlu1 %4059 }
0x2514   : > { %v4061_v26 = vmul.f32 0.015625, %v4060_v14 }
0x2516   : > { %v4062_v28 = vadd.f32 1e-06, %v4061_v26 }
0x2517   : > { %v6917_v29 = vpop.permute.xlu1 %6916 }
0x2518   : > { %6981 = vrsqrt.f32 %v4062_v28  ;;  %v6919_v31 = vunpack.i.h.bf16 %v6917_v29  ;;  %v6918_v32 = vunpack.i.l.bf16 %v6917_v29 }
0x251a   : > { %v4223_v38 = vsel %vm534_vm1, %v6918_v32, %v6919_v31 }
0x251b   : > { %v6737_v39 = vpack.c.bf16 %v4224_v30, %v4223_v38 }
0x251d   : > { %6738 = vmatpush3.bf16.msra.mxu1 %v6737_v39 }
0x251e   : > { %6435 = vmatprep.subr.mxu1 %v7055_v17 }
0x2520   : > { %6428 = vmatmul.mubr.msk.f32.vlgmr.msra.gmra.mrb[50].mxu1 %vm534_vm1, %v7015_v42 }
0x2521   : > { %6437 = vmatprep.mubr.msk.f32.mxu1 %vm7056_vm2, %v7055_v17 }
0x2522   : > { %v6982_v34 = vpop.eup %6981 }
0x2523   : > { %v4064_v47 = vmul.f32 %v6982_v34, %v7952_v22  ;;  %v5810_v34 = vld [vmem:[%s8307_s9 + $0x60] sm:$0xff] }
0x2525   : > { %v4069_v48 = vmul.f32 %v4068_v44, %v4064_v47  ;;  %v5811_v47 = vld [vmem:[%s8307_s9 + $0x68] sm:$0xff] }
0x2527   : > { %6409 = vmatmul.mubr.msk.f32.vlgmr.msra.gmra.mrb[34].mxu0 %vm534_vm1, %v4069_v48  ;;  %v6746_v48 = vpack.c.bf16 %v5811_v47, %v5810_v34  ;;  %v5848_v34 = vld [vmem:[%s8309_s11 + $0xb8] sm:$0xff] }
0x2528   : > { %6432 = vmatprep.mubr.msk.f32.mxu0 %vm7056_vm2, %v7055_v17 }
0x25f3   : > { %v7975_v49 = vpop.f32.mrb[50].mxu1 }
0x25f4   : > { %v6429_v40 = vpop.f32.mrb[51].mxu1  ;;  %4468 = vrot.lane.b32.xlu1 %v7975_v49, %s8337_s15  ;;  %6431 = vmatpush3.xpose.msk.msra.mxu0 %vm649_vm3, %v7975_v49 }
0x25f5   : > { %6440 = vmatprep.subr.mxu0 %v7055_v17 }
0x25fa   : > { %v7982_v36 = vpop.f32.mrb[34].mxu0 }
0x25fb   : > { %4466 = vrot.lane.b32.xlu0 %v7982_v36, %s8337_s15  ;;  %v6410_v50 = vpop.f32.mrb[35].mxu0  ;;  %6433 = vmatmul.mubr.msk.f32.vlgmr.msra.gmra.mrb[36].mxu0 %vm649_vm3, %v7982_v36 }
0x25fc   : > { %6442 = vmatprep.mubr.msk.f32.mxu0 %vm7056_vm2, %v7055_v17 }
0x2666   : > { %v4469_v51 = vpop.permute.xlu1 %4468 }
0x2667   : > { %6441 = vmatpush3.xpose.msk.msra.mxu0 %vm649_vm3, %v4469_v51 }
0x2668   : > { %6739 = vmatprep.subr.bf16.mxu0 %v7062_v11 }
0x266d   : > { %v4467_v53 = vpop.permute.xlu0 %4466 }
0x266e   : > { %6443 = vmatmul.mubr.msk.f32.vlgmr.msra.gmra.mrb[38].mxu0 %vm649_vm3, %v4467_v53 }
0x266f   : > { %6454 = vmatprep.mubr.msk.f32.mxu0 %vm7056_vm2, %v7055_v17  ;;  %6741 = vmatpush3.bf16.msra.mxu0 %v6740_v12 }
0x2670   : > { %6464 = vmatprep.subr.mxu0 %v7055_v17 }
0x26ce   : > { %v4375_v35 = vpop.f32.mrb[36].mxu0 }
0x26cf   : > { %v6434_v55 = vpop.f32.mrb[37].mxu0  ;;  %v4379_v56 = vsel %vm725_vm4, %v4375_v35, -inf }
0x26d0   : > { %4380 = vmax.xlane.f32.xlu1 %v4379_v56 }
0x26e1   : > { %4390 = vrot.lane.b32.xlu1 %v7975_v49, %s8343_s1 }
0x26e5   : > { %4779 = vrot.lane.b32.xlu1 %v7975_v49, %s8339_s19 }
0x26e9   : > { %4777 = vrot.lane.b32.xlu1 %v7982_v36, %s8339_s19 }
0x2741   : > { %v4540_v57 = vpop.f32.mrb[38].mxu0 }
0x2742   : > { %v6444_v58 = vpop.f32.mrb[39].mxu0  ;;  %v4544_v59 = vsel %vm725_vm4, %v4540_v57, -inf }
0x2743   : > { %4545 = vmax.xlane.f32.xlu0 %v4544_v59 }
0x275d   : > { %v4381_v60 = vpop.xlane.xlu1 %4380 }
0x275e   : > { %v4382_v61 = vsub.f32 %v4375_v35, %v4381_v60 }
0x2760   : > { %v4383_v62 = vmul.f32 1.442695, %v4382_v61 }
0x2761   : > { %v4391_v63 = vpop.permute.xlu1 %4390 }
0x2762   : > { %6983 = vpow2.f32 %v4383_v62  ;;  %6436 = vmatpush3.msra.mxu1 %v4391_v63 }
0x2763   : > { %6445 = vmatprep.subr.mxu1 %v7055_v17 }
0x2765   : > { %v4780_v23 = vpop.permute.xlu1 %4779 }
0x2769   : > { %v4778_v25 = vpop.permute.xlu1 %4777 }
0x276c   : > { %v6984_v0 = vpop.eup %6983 }
0x276d   : > { %v4385_v2 = vsel %vm725_vm4, %v6984_v0, 0.0 }
0x276e   : > { %4386 = vadd.xlane.f32.xlu0 %v4385_v2 }
0x27d0   : > { %v4546_v3 = vpop.xlane.xlu0 %4545 }
0x27d1   : > { %v4547_v4 = vsub.f32 %v4540_v57, %v4546_v3  ;;  %v5812_v3 = vld [vmem:[%s8307_s9 + $0x70] sm:$0xff] }
0x27d3   : > { %v4548_v5 = vmul.f32 1.442695, %v4547_v4 }
0x27d5   : > { %6985 = vpow2.f32 %v4548_v5 }
0x27df   : > { %v6986_v6 = vpop.eup %6985 }
0x27e0   : > { %v4550_v45 = vsel %vm725_vm4, %v6986_v6, 0.0 }
0x27e1   : > { %4551 = vadd.xlane.f32.xlu0 %v4550_v45 }
0x27f7   : > { %4555 = vrot.lane.b32.xlu0 %v7975_v49, %s8338_s17 }
0x27fb   : > { %v4387_v41 = vpop.xlane.xlu0 %4386 }
0x27fc   : > { %6987 = vrcp.f32 %v4387_v41 }
0x2806   : > { %v6988_v7 = vpop.eup %6987 }
0x2807   : > { %v4389_v8 = vmul.f32 %v6988_v7, %v6984_v0 }
0x2809   : > { %6438 = vmatmul.mubr.msk.f32.vlgmr.msra.gmra.mrb[52].mxu1 %vm725_vm4, %v4389_v8 }
0x280a   : > { %6447 = vmatprep.mubr.msk.f32.mxu1 %vm7056_vm2, %v7055_v17 }
0x286e   : > { %v4552_v13 = vpop.xlane.xlu0 %4551 }
0x286f   : > { %6989 = vrcp.f32 %v4552_v13 }
0x2872   : > { %v4556_v15 = vpop.permute.xlu0 %4555 }
0x2873   : > { %6446 = vmatpush3.msra.mxu1 %v4556_v15 }
0x2874   : > { %6742 = vmatprep.subr.bf16.mxu1 %v7062_v11 }
0x2879   : > { %v6990_v18 = vpop.eup %6989 }
0x287a   : > { %v4554_v20 = vmul.f32 %v6990_v18, %v6986_v6 }
0x287c   : > { %6448 = vmatmul.mubr.msk.f32.vlgmr.msra.gmra.mrb[54].mxu1 %vm725_vm4, %v4554_v20  ;;  %v5833_v20 = vld [vmem:[%s8308_s10 + $0x48] sm:$0xff] }
0x287d   : > { %6744 = vmatpush3.bf16.msra.mxu1 %v6743_v19  ;;  %6461 = vmatprep.mubr.msk.f32.mxu1 %vm7056_vm2, %v7055_v17  ;;  %v5832_v19 = vld [vmem:[%s8308_s10 + $0x40] sm:$0xff] }
0x287e   : > { %6469 = vmatprep.subr.mxu1 %v7055_v17 }
0x28dc   : > { %v4462_v21 = vpop.f32.mrb[52].mxu1 }
0x28dd   : > { %v6439_v9 = vpop.f32.mrb[53].mxu1  ;;  %6462 = vmatmul.mubr.msk.f32.vlgmr.msra.gmra.mrb[56].mxu1 %vm649_vm3, %v4462_v21  ;;  %v6752_v21 = vpack.c.bf16 %v5833_v20, %v5832_v19  ;;  %v526_v19 = vld [vmem:[%s8311_s13 + $0x50] sm:$0xff]  ;;  %v527_v20 = vld [vmem:[%s8311_s13 + $0x58] sm:$0xff] }
0x28de   : > { %6471 = vmatprep.mubr.msk.f32.mxu1 %vm7056_vm2, %v7055_v17  ;;  %v5835_v9 = vld [vmem:[%s8308_s10 + $0x58] sm:$0xff] }
0x294f   : > { %v4627_v24 = vpop.f32.mrb[54].mxu1 }
0x2950   : > { %v6449_v1 = vpop.f32.mrb[55].mxu1  ;;  %6455 = vmatmul.mubr.msk.f32.vlgmr.msra.gmra.mrb[40].mxu0 %vm649_vm3, %v4627_v24  ;;  %v5836_v24 = vld [vmem:[%s8308_s10 + $0x60] sm:$0xff] }
0x2951   : > { %6465 = vmatpush3.xpose.msk.msra.mxu0 %vm649_vm3, %v4780_v23  ;;  %6466 = vmatprep.mubr.msk.f32.mxu0 %vm7056_vm2, %v7055_v17  ;;  %v5837_v1 = vld [vmem:[%s8308_s10 + $0x68] sm:$0xff] }
0x2952   : > { %6745 = vmatprep.subr.bf16.mxu0 %v7062_v11 }
0x2954   : > { %6467 = vmatmul.mubr.msk.f32.vlgmr.msra.gmra.mrb[42].mxu0 %vm649_vm3, %v4778_v25  ;;  %v6758_v25 = vpack.c.bf16 %v5837_v1, %v5836_v24 }
0x2955   : > { %6478 = vmatprep.mubr.msk.f32.mxu0 %vm7056_vm2, %v7055_v17  ;;  %6747 = vmatpush3.bf16.msra.mxu0 %v6746_v48  ;;  %v5849_v48 = vld [vmem:[%s8309_s11 + $0xc0] sm:$0xff] }
0x2956   : > { %6486 = vmatprep.subr.mxu0 %v7055_v17 }
0x29b0   : > { %v4773_v14 = vpop.f32.mrb[56].mxu1 }
0x29b1   : > { %v6463_v26 = vpop.f32.mrb[57].mxu1 }
0x29b2   : > { %v5839_v26 = vld [vmem:[%s8308_s10 + $0x78] sm:$0xff] }
0x2a23   : > { %v4700_v27 = vpop.f32.mrb[40].mxu0 }
0x2a24   : > { %v4774_v43 = vadd.f32 %v4773_v14, %v4700_v27  ;;  %v6456_v28 = vpop.f32.mrb[41].mxu0  ;;  %v5838_v14 = vld [vmem:[%s8308_s10 + $0x70] sm:$0xff] }
0x2a25   : > { %v6761_v27 = vpack.c.bf16 %v5839_v26, %v5838_v14  ;;  %v5842_v28 = vld [vmem:[%s8309_s11 + $0x88] sm:$0xff] }
0x2a26   : > { %v529_v14 = vld [vmem:[%s8311_s13 + $0x68] sm:$0xff] }
0x2a27   : > { %v4851_v29 = vpop.f32.mrb[42].mxu0 }
0x2a28   : > { %v6468_v30 = vpop.f32.mrb[43].mxu0  ;;  %v4855_v31 = vsel %vm725_vm4, %v4851_v29, -inf }
0x2a29   : > { %4856 = vmax.xlane.f32.xlu1 %v4855_v31  ;;  %v5844_v31 = vld [vmem:[%s8309_s11 + $0x98] sm:$0xff] }
0x2a3a   : > { %5018 = vrot.lane.b32.xlu1 %v7975_v49, %s8341_s23 }
0x2a3e   : > { %5016 = vrot.lane.b32.xlu1 %v7982_v36, %s8341_s23  ;;  %s7022_s23 = scalar_lea.vmem %s5629_s27, 32 }
0x2ab6   : > { %v4857_v32 = vpop.xlane.xlu1 %4856 }
0x2ab7   : > { %v4858_v38 = vsub.f32 %v4851_v29, %v4857_v32  ;;  %v5843_v29 = vld [vmem:[%s8309_s11 + $0x90] sm:$0xff] }
0x2ab8   : > { %v6767_v32 = vpack.c.bf16 %v5844_v31, %v5843_v29 }
0x2ab9   : > { %v4859_v39 = vmul.f32 1.442695, %v4858_v38  ;;  %v5845_v38 = vld [vmem:[%s8309_s11 + $0xa0] sm:$0xff] }
0x2aba   : > { %v5019_v51 = vpop.permute.xlu1 %5018 }
0x2abb   : > { %6991 = vpow2.f32 %v4859_v39  ;;  %v5846_v39 = vld [vmem:[%s8309_s11 + $0xa8] sm:$0xff] }
0x2abe   : > { %v5017_v35 = vpop.permute.xlu1 %5016 }
0x2ac5   : > { %v6992_v42 = vpop.eup %6991 }
0x2ac6   : > { %v4861_v44 = vsel %vm725_vm4, %v6992_v42, 0.0 }
0x2ac7   : > { %4862 = vadd.xlane.f32.xlu0 %v4861_v44  ;;  %v5847_v44 = vld [vmem:[%s8309_s11 + $0xb0] sm:$0xff] }
0x2ac8   : > { %v6773_v47 = vpack.c.bf16 %v5848_v34, %v5847_v44 }
0x2add   : > { %4866 = vrot.lane.b32.xlu0 %v7975_v49, %s8340_s28  ;;  %s7016_s28 = scalar_lea.vmem %s5629_s27, 16 }
0x2ade   : > { %p7017_p6 = scmp.ne.s32.totalorder %s5629_s27, %s7016_s28  ;;  %p7024_p10 = scmp.lt.s32.totalorder %s7022_s23, %s7016_s28 }
0x2ae0   : > { %p7018_p7 = pnand %p7017_p6, %p6823_p5  ;;  %p7025_p11 = por %p7024_p10, %p7023_p9 }
0x2ae2   : > { %p7019_p8 = pneg %p7018_p7 }
0x2ae4   : > { %p7026_p12 = pnand %p7025_p11, %p7019_p8 }
0x2b54   : > { %v4863_v40 = vpop.xlane.xlu0 %4862 }
0x2b55   : > { %6993 = vrcp.f32 %v4863_v40  ;;  %v5850_v40 = vld [vmem:[%s8309_s11 + $0xc8] sm:$0xff] }
0x2b58   : > { %v4867_v36 = vpop.permute.xlu0 %4866 }
0x2b59   : > { %6470 = vmatpush3.msra.mxu1 %v4867_v36  ;;  %v6776_v36 = vpack.c.bf16 %v5850_v40, %v5849_v48 }
0x2b5a   : > { %6481 = vmatprep.subr.mxu1 %v7055_v17 }
0x2b5f   : > { %v6994_v50 = vpop.eup %6993 }
0x2b60   : > { %v4865_v53 = vmul.f32 %v6994_v50, %v6992_v42  ;;  %v6770_v42 = vpack.c.bf16 %v5846_v39, %v5845_v38  ;;  %v5851_v50 = vld [vmem:[%s8309_s11 + $0xd0] sm:$0xff] }
0x2b62   : > { %6472 = vmatmul.mubr.msk.f32.vlgmr.msra.gmra.mrb[58].mxu1 %vm725_vm4, %v4865_v53 }
0x2b63   : > { %6482 = vmatpush3.xpose.msk.msra.mxu1 %vm649_vm3, %v5019_v51  ;;  %6483 = vmatprep.mubr.msk.f32.mxu1 %vm7056_vm2, %v7055_v17  ;;  %v5852_v51 = vld [vmem:[%s8309_s11 + $0xd8] sm:$0xff] }
0x2b64   : > { %6748 = vmatprep.subr.bf16.mxu1 %v7062_v11  ;;  %v6779_v53 = vpack.c.bf16 %v5852_v51, %v5851_v50 }
0x2b66   : > { %6484 = vmatmul.mubr.msk.f32.vlgmr.msra.gmra.mrb[60].mxu1 %vm649_vm3, %v5017_v35  ;;  %v5853_v35 = vld [vmem:[%s8309_s11 + $0xe0] sm:$0xff] }
0x2b67   : > { %6495 = vmatprep.mubr.msk.f32.mxu1 %vm7056_vm2, %v7055_v17 }
0x2c35   : > { %v4938_v55 = vpop.f32.mrb[58].mxu1 }
0x2c36   : > { %v6473_v56 = vpop.f32.mrb[59].mxu1  ;;  %6479 = vmatmul.mubr.msk.f32.vlgmr.msra.gmra.mrb[44].mxu0 %vm649_vm3, %v4938_v55  ;;  %v5854_v55 = vld [vmem:[%s8309_s11 + $0xe8] sm:$0xff] }
0x2c37   : > { %6488 = vmatprep.mubr.msk.f32.mxu0 %vm7056_vm2, %v7055_v17  ;;  %v6782_v56 = vpack.c.bf16 %v5854_v55, %v5853_v35 }
0x2c39   : > { %v5090_v57 = vpop.f32.mrb[60].mxu1 }
0x2c3a   : > { %v6485_v58 = vpop.f32.mrb[61].mxu1  ;;  %v5094_v59 = vsel %vm725_vm4, %v5090_v57, -inf }
0x2c3b   : > { %5095 = vmax.xlane.f32.xlu0 %v5094_v59 }
0x2c51   : > { %5105 = vrot.lane.b32.xlu0 %v7975_v49, %s8342_s24  ;;  %v5813_v49 = vld [vmem:[%s8307_s9 + $0x78] sm:$0xff] }
0x2c52   : > { %v6749_v4 = vpack.c.bf16 %v5813_v49, %v5812_v3  ;;  %v516_v49 = vld [vmem:[%s8311_s13] sm:$0xff] }
0x2c54   : > { %6750 = vmatpush3.bf16.msra.mxu1 %v6749_v4 }
0x2c55   : > { %6763 = vmatprep.subr.bf16.mxu1 %v7062_v11 }
0x2cc8   : > { %v5096_v60 = vpop.xlane.xlu0 %5095 }
0x2cc9   : > { %v5097_v61 = vsub.f32 %v5090_v57, %v5096_v60  ;;  %v5267_v60 = vrot.slane %v7742_v37, %v2814_v54 }
0x2ccb   : > { %v5098_v62 = vmul.f32 1.442695, %v5097_v61 }
0x2ccc   : > { %v5106_v63 = vpop.permute.xlu0 %5105 }
0x2ccd   : > { %6995 = vpow2.f32 %v5098_v62  ;;  %6487 = vmatpush3.msra.mxu0 %v5106_v63 }
0x2cce   : > { %6751 = vmatprep.subr.bf16.mxu0 %v7062_v11 }
0x2cd7   : > { %v6996_v0 = vpop.eup %6995 }
0x2cd8   : > { %v5100_v2 = vsel %vm725_vm4, %v6996_v0, 0.0 }
0x2cd9   : > { %5101 = vadd.xlane.f32.xlu1 %v5100_v2  ;;  %v5856_v2 = vld [vmem:[%s8309_s11 + $0xf8] sm:$0xff] }
0x2d09   : > { %v5011_v5 = vpop.f32.mrb[44].mxu0 }
0x2d0a   : > { %v5015_v6 = vadd.f32 %v5011_v5, %v4774_v43  ;;  %v6480_v45 = vpop.f32.mrb[45].mxu0  ;;  %v5841_v43 = vld [vmem:[%s8309_s11 + $0x80] sm:$0xff] }
0x2d0b   : > { %v6764_v30 = vpack.c.bf16 %v5842_v28, %v5841_v43  ;;  %v519_v45 = vld [vmem:[%s8311_s13 + $0x18] sm:$0xff] }
0x2d66   : > { %v5102_v41 = vpop.xlane.xlu1 %5101 }
0x2d67   : > { %6997 = vrcp.f32 %v5102_v41 }
0x2d71   : > { %v6998_v7 = vpop.eup %6997 }
0x2d72   : > { %v5104_v8 = vmul.f32 %v6998_v7, %v6996_v0  ;;  %v5855_v0 = vld [vmem:[%s8309_s11 + $0xf0] sm:$0xff]  ;;  %v520_v7 = vld [vmem:[%s8311_s13 + $0x20] sm:$0xff] }
0x2d73   : > { %v6785_v33 = vpack.c.bf16 %v5856_v2, %v5855_v0 }
0x2d74   : > { %6489 = vmatmul.mubr.msk.f32.vlgmr.msra.gmra.mrb[46].mxu0 %vm725_vm4, %v5104_v8  ;;  %v521_v8 = vld [vmem:[%s8311_s13 + $0x28] sm:$0xff] }
0x2d75   : > { %6514 = vmatprep.mubr.msk.f32.mxu0 %vm7056_vm2, %v7055_v17  ;;  %6753 = vmatpush3.bf16.msra.mxu0 %v6752_v21  ;;  %v6808_v21 = vpack.c.bf16 %v527_v20, %v526_v19 }
0x2d76   : > { %6754 = vmatprep.subr.bf16.mxu0 %v7062_v11 }
0x2e47   : > { %v5177_v10 = vpop.f32.mrb[46].mxu0 }
0x2e48   : > { %v6490_v52 = vpop.f32.mrb[47].mxu0  ;;  %6496 = vmatmul.mubr.msk.f32.vlgmr.msra.gmra.mrb[62].mxu1 %vm649_vm3, %v5177_v10  ;;  %v6796_v10 = vpack.c.bf16 %v521_v8, %v520_v7 }
0x2e49   : > { %6549 = vmatprep.mubr.msk.f32.mxu1 %vm7056_vm2, %v7055_v17  ;;  %6765 = vmatpush3.bf16.msra.mxu1 %v6764_v30  ;;  %v522_v52 = vld [vmem:[%s8311_s13 + $0x30] sm:$0xff] }
0x2e4a   : > { %6766 = vmatprep.subr.bf16.mxu1 %v7062_v11 }
0x2e4d   : > { %6768 = vmatpush3.bf16.msra.mxu1 %v6767_v32 }
0x2e4e   : > { %6769 = vmatprep.subr.bf16.mxu1 %v7062_v11 }
0x2e51   : > { %6771 = vmatpush3.bf16.msra.mxu1 %v6770_v42  ;;  %v5578_v42 = vld [vmem:[%s8346_s26] sm:$0xff] }
0x2e52   : > { %6772 = vmatprep.subr.bf16.mxu1 %v7062_v11  ;;  %5592 = vadd.xlane.f32.xlu0 %v5578_v42 }
0x2e55   : > { %6774 = vmatpush3.bf16.msra.mxu1 %v6773_v47 }
0x2e56   : > { %6775 = vmatprep.subr.bf16.mxu1 %v7062_v11 }
0x2e59   : > { %6777 = vmatpush3.bf16.msra.mxu1 %v6776_v36 }
0x2e5a   : > { %6778 = vmatprep.subr.bf16.mxu1 %v7062_v11 }
0x2e5d   : > { %6780 = vmatpush3.bf16.msra.mxu1 %v6779_v53 }
0x2e5e   : > { %6781 = vmatprep.subr.bf16.mxu1 %v7062_v11 }
0x2e61   : > { %6783 = vmatpush3.bf16.msra.mxu1 %v6782_v56 }
0x2e62   : > { %6784 = vmatprep.subr.bf16.mxu1 %v7062_v11 }
0x2e65   : > { %6786 = vmatpush3.bf16.msra.mxu1 %v6785_v33 }
0x2edf   : > { %v5593_v51 = vpop.xlane.xlu0 %5592 }
0x2ee0   : > { %v5607_v53 = vrot.slane %v5593_v51, 4 }
0x2ee2   : > { %v5608_v35 = vadd.f32 %v5607_v53, %v5593_v51 }
0x2ee4   : > { %v5609_v55 = vrot.slane %v5608_v35, 2 }
0x2ee6   : > { %v5610_v56 = vadd.f32 %v5609_v55, %v5608_v35 }
0x2f1b   : > { %v5250_v12 = vpop.f32.mrb[62].mxu1 }
0x2f1c   : > { %v5254_v13 = vadd.f32 %v5250_v12, %v5015_v6  ;;  %v6497_v15 = vpop.f32.mrb[63].mxu1  ;;  %v518_v6 = vld [vmem:[%s8311_s13 + $0x10] sm:$0xff]  ;;  %v523_v12 = vld [vmem:[%s8311_s13 + $0x38] sm:$0xff] }
0x2f1d   : > { %v6792_v41 = vpack.c.bf16 %v519_v45, %v518_v6  ;;  %v524_v15 = vld [vmem:[%s8311_s13 + $0x40] sm:$0xff] }
0x2f1e   : > { %v8086_v16 = vadd.f32 %v5254_v13, %v7952_v22  ;;  %v5834_v22 = vld [vmem:[%s8308_s10 + $0x50] sm:$0xff]  ;;  %v6800_v13 = vpack.c.bf16 %v523_v12, %v522_v52  ;;  %v5594_v45 = vld [vmem:[#allocation2] sm:$0x1] }
0x2f1f   : > { %v6755_v23 = vpack.c.bf16 %v5835_v9, %v5834_v22 }
0x2f20   : > { %v5256_v46 = vmul.f32 %v8086_v16, %v8086_v16 }
0x2f21   : > { %6756 = vmatpush3.bf16.msra.mxu0 %v6755_v23 }
0x2f22   : > { %v5257_v18 = vsel %vm534_vm1, %v5256_v46, 0.0  ;;  %6757 = vmatprep.subr.bf16.mxu0 %v7062_v11  ;;  %v525_v46 = vld [vmem:[%s8311_s13 + $0x48] sm:$0xff] }
0x2f23   : > { %5258 = vadd.xlane.f32.xlu1 %v5257_v18  ;;  %v6804_v18 = vpack.c.bf16 %v525_v46, %v524_v15 }
0x2f25   : > { %6759 = vmatpush3.bf16.msra.mxu0 %v6758_v25  ;;  %v528_v25 = vld [vmem:[%s8311_s13 + $0x60] sm:$0xff] }
0x2f26   : > { %6760 = vmatprep.subr.bf16.mxu0 %v7062_v11  ;;  %v6812_v26 = vpack.c.bf16 %v529_v14, %v528_v25 }
0x2f29   : > { %6762 = vmatpush3.bf16.msra.mxu0 %v6761_v27  ;;  %v531_v27 = vld [vmem:[%s8311_s13 + $0x78] sm:$0xff] }
0x2f2a   : > { %6787 = vmatprep.subr.bf16.mxu0 %v7062_v11 }
0x2fb0   : > { %v5259_v57 = vpop.xlane.xlu1 %5258 }
0x2fb1   : > { %v5260_v58 = vmul.f32 0.015625, %v5259_v57  ;;  %v5611_v57 = vrot.slane %v5610_v56, 1 }
0x2fb3   : > { %v5261_v59 = vadd.f32 1e-06, %v5260_v58  ;;  %v5606_v58 = vld [vmem:[#allocation3] sm:$0x1] }
0x2fb5   : > { %6999 = vrsqrt.f32 %v5261_v59  ;;  %v5612_v59 = vadd.f32 %v5611_v57, %v5610_v56 }
0x2fbf   : > { %v7000_v61 = vpop.eup %6999 }
0x2fc0   : > { %v5263_v62 = vmul.f32 %v7000_v61, %v8086_v16 }
0x2fc2   : > { %v5268_v63 = vmul.f32 %v5267_v60, %v5263_v62  ;;  %v5613_v60 = vadd.f32 %v5612_v59, %v5606_v58 }
0x2fc4   : > { %6515 = vmatmul.mubr.msk.f32.vlgmr.msra.gmra.mrb[48].mxu0 %vm534_vm1, %v5268_v63  ;;  %5614 = vst.msk [vmem:[#allocation3] sm:$0x1] %vm5604_vm6, %v5613_v60 }
0x2fc5   : > { %6584 = vmatprep.mubr.msk.f32.mxu0 %vm7056_vm2, %v7055_v17  ;;  %v517_v17 = vld [vmem:[%s8311_s13 + $0x8] sm:$0xff] }
0x2fc6   : > { %v6788_v5 = vpack.c.bf16 %v517_v17, %v516_v49 }
0x2fc8   : > { %6790 = vmatpush3.bf16.xpose.msk.msra.mxu0 %vm8189_vm5, %v6788_v5 }
0x2fc9   : > { %6791 = vmatprep.subr.bf16.mxu0 %v7062_v11 }
0x2fcb   : > { %v5616_v17 = vld [vmem:[#allocation3] sm:$0x1] }
0x2fcc   : > { %v5617_v5 = vmax.f32 %v5616_v17, 1.0 }
0x2fd0   : > { %6794 = vmatpush3.bf16.xpose.msk.msra.mxu0 %vm8189_vm5, %v6792_v41 }
0x2fd1   : > { %6795 = vmatprep.subr.bf16.mxu0 %v7062_v11 }
0x2fd8   : > { %6798 = vmatpush3.bf16.xpose.msk.msra.mxu0 %vm8189_vm5, %v6796_v10 }
0x2fd9   : > { %6799 = vmatprep.subr.bf16.mxu0 %v7062_v11 }
0x2fe0   : > { %6802 = vmatpush3.bf16.xpose.msk.msra.mxu0 %vm8189_vm5, %v6800_v13 }
0x2fe1   : > { %6803 = vmatprep.subr.bf16.mxu0 %v7062_v11 }
0x2fe8   : > { %6806 = vmatpush3.bf16.xpose.msk.msra.mxu0 %vm8189_vm5, %v6804_v18 }
0x2fe9   : > { %6807 = vmatprep.subr.bf16.mxu0 %v7062_v11 }
0x2ff0   : > { %6810 = vmatpush3.bf16.xpose.msk.msra.mxu0 %vm8189_vm5, %v6808_v21 }
0x2ff1   : > { %6811 = vmatprep.subr.bf16.mxu0 %v7062_v11 }
0x2ff8   : > { %6814 = vmatpush3.bf16.xpose.msk.msra.mxu0 %vm8189_vm5, %v6812_v26 }
0x2ff9   : > { %6815 = vmatprep.subr.bf16.mxu0 %v7062_v11  ;;  %v5857_v11 = vld [vmem:[%s8310_s12] ss:$0 sm:$0xff] }
0x3097   : > { %v5347_v54 = vpop.f32.mrb[48].mxu0 }
0x3098   : > { %v5351_v37 = vmax.f32 %v5347_v54, 0.0  ;;  %v6516_v3 = vpop.f32.mrb[49].mxu0 }
0x309a   : > { %6550 = vmatmul.mubr.f32.vlgmr.msra.gmra.mrb[64].mxu1 %v5351_v37 }
0x316d   : > { %v5435_v22 = vpop.f32.mrb[64].mxu1 }
0x316e   : > { %v5439_v9 = vadd.f32 %v5435_v22, %v8086_v16  ;;  %v6551_v23 = vpop.f32.mrb[65].mxu1  ;;  %v530_v16 = vld [vmem:[%s8311_s13 + $0x70] sm:$0xff] }
0x316f   : > { %v6816_v43 = vpack.c.bf16 %v531_v27, %v530_v16 }
0x3170   : > { %v5441_v24 = vmul.f32 %v5439_v9, %v5439_v9 }
0x3171   : > { %6818 = vmatpush3.bf16.xpose.msk.msra.mxu0 %vm8189_vm5, %v6816_v43 }
0x3172   : > { %v5442_v1 = vsel %vm534_vm1, %v5441_v24, 0.0 }
0x3173   : > { %5443 = vadd.xlane.f32.xlu1 %v5442_v1 }
0x3200   : > { %v5444_v28 = vpop.xlane.xlu1 %5443 }
0x3201   : > { %v5445_v29 = vmul.f32 0.015625, %v5444_v28 }
0x3203   : > { %v5446_v30 = vadd.f32 1e-06, %v5445_v29 }
0x3205   : > { %7001 = vrsqrt.f32 %v5446_v30 }
0x320f   : > { %v7002_v31 = vpop.eup %7001 }
0x3210   : > { %v5448_v32 = vmul.f32 %v7002_v31, %v5439_v9 }
0x3212   : > { %v5455_v38 = vmul.f32 %v5857_v11, %v5448_v32 }
0x3214   : > { %v5456_v39 = vmul.f32 0.125, %v5455_v38 }
0x3216   : > { %6585 = vmatmul.mubr.msk.f32.vlgmr.msra.gmra.mrb[50].mxu0 %vm534_vm1, %v5456_v39 }
0x32e9   : > { %v5574_v44 = vpop.f32.mrb[50].mxu0 }
0x32ea   : > { %5579 = vmax.xlane.f32.xlu1 %v5574_v44  ;;  %v6586_v34 = vpop.f32.mrb[51].mxu0  ;;  %v5589_v50 = vmul.f32 %v5578_v42, %v5574_v44 }
0x3377   : > { %v5580_v47 = vpop.xlane.xlu1 %5579 }
0x3378   : > { %v5581_v48 = vsub.f32 %v5574_v44, %v5580_v47 }
0x337a   : > { %v5582_v40 = vmul.f32 1.442695, %v5581_v48 }
0x337c   : > { %7003 = vpow2.f32 %v5582_v40 }
0x3386   : > { %v7004_v36 = vpop.eup %7003 }
0x3387   : > { %5584 = vadd.xlane.f32.xlu1 %v7004_v36 }
0x338b   : > { %5590 = vadd.xlane.f32.xlu1 %v5589_v50 }
0x3414   : > { %v5585_v61 = vpop.xlane.xlu1 %5584 }
0x3415   : > { %7005 = vlog2.f32 %v5585_v61 }
0x3416   : > { %7007 = vrcp.f32 %v5617_v5 }
0x3418   : > { %v5591_v2 = vpop.xlane.xlu1 %5590 }
0x341f   : > { %v7006_v62 = vpop.eup %7005 }
0x3420   : > { %v5587_v63 = vmul.f32 0.6931472, %v7006_v62  ;;  %v7008_v8 = vpop.eup %7007 }
0x3422   : > { %v5588_v0 = vadd.f32 %v5587_v63, %v5580_v47 }
0x3424   : > { %v5595_v33 = vsub.f32 %v5588_v0, %v5591_v2 }
0x3426   : > { %v5596_v54 = vmul.f32 %v5595_v33, %v5593_v51 }
0x3428   : > { %v5597_v37 = vrot.slane %v5596_v54, 4 }
0x342a   : > { %v5598_v3 = vadd.f32 %v5597_v37, %v5596_v54 }
0x342c   : > { %v5599_v49 = vrot.slane %v5598_v3, 2 }
0x342e   : > { %v5600_v4 = vadd.f32 %v5599_v49, %v5598_v3 }
0x3430   : > { %v5601_v6 = vrot.slane %v5600_v4, 1 }
0x3432   : > { %v5602_v41 = vadd.f32 %v5601_v6, %v5600_v4 }
0x3434   : > { %v5603_v7 = vadd.f32 %v5602_v41, %v5594_v45 }
0x3436   : > { %5605 = vst.msk [vmem:[#allocation2] sm:$0x1] %vm5604_vm6, %v5603_v7 }
0x343d   : > { %v5615_v10 = vld [vmem:[#allocation2] sm:$0x1] }
0x343e   : > { %v5619_v52 = vmul.f32 %v7008_v8, %v5615_v10 }
0x3440   : > { %5620 = vst.msk [vmem:[#allocation4] sm:$0x1] %vm5604_vm6, %v5619_v52 }
0x3441   : > { %7029 = shalt.err (!%p7026_p12)
}
0x3442   : > { %s8347_s24 = sld [smem:[#allocation11_spill]] }
0x3448   : > { %s7030_s29 = scalar_lea.hbm %s8347_s24, 16 }
0x3449   : > { %p7031_p13 = scmp.ne.s32.totalorder %s8347_s24, %s7030_s29  ;;  %p7036_p2 = scmp.lt.u32.totalorder %s7030_s29, %s8347_s24 }
0x344b   : > { %p7032_p0 = pnand %p7031_p13, %p6823_p5 }
0x344d   : > { %p7033_p1 = pneg %p7032_p0 }
0x344f   : > { %p7038_p3 = pnand %p7036_p2, %p7033_p1 }
0x3451   : > { %7041 = shalt.err (!%p7038_p3)
}
0x3452   : > { %6820 = dma.vmem_to_hbm [thread:$0]  (%p6823_p5), %s5629_s27, 16, %s8347_s24, [#allocation5]  }
0x3453   : > { %7047 = dma.done.wait (%p6823_p5), [#allocation5], 16  }
0x3454   : > { %7049 = vsyncadd (%p6823_p5), [#allocation5], 4294967280 }
0x3455 PF: > { %s8348_s21 = sld [smem:[#allocation7_spill]] }
0x345b   : > { %s25_s29 = sadd.s32 1, %s8348_s21  }
0x345c   : > { %p22_p4 = scmp.ge.s32.totalorder %s25_s29, 4  }
0x345e   :  { %24 = sbr.rel (!%p22_p4) target bundleno = 6 (0x6), region = 123 }
0x3465   :  { %5641 = vsyncpa [#allocation5], 1 }
0x3466   :  { %5643 = vsyncpa [#allocation5 + $0x1], 1 }

</bundles_post_ra>
